<compile_context>
chip_gen: v7x
topology: tpu7x:2x2x1
jax: 0.10.0
libtpu: 0.0.40
codegen_flags: <defaults>
</compile_context>

<pallas_src>
import math
from functools import partial

import jax
import jax.numpy as jnp
from jax.experimental import pallas as pl
from jax.experimental.pallas import tpu as pltpu

# ---------------- efficient-KAN spline constants (library defaults) ----------------
GRID_SIZE = 5
SPLINE_ORDER = 3
NUM_COEFF = GRID_SIZE + SPLINE_ORDER          # 8 spline basis functions per input feature
NUM_BASES = NUM_COEFF + 1                     # + SiLU base term -> 9 fused matmul groups
GRID_RANGE = (-1.0, 1.0)
_H = (GRID_RANGE[1] - GRID_RANGE[0]) / GRID_SIZE
KNOTS = tuple(GRID_RANGE[0] + _H * (j - SPLINE_ORDER)
              for j in range(GRID_SIZE + 2 * SPLINE_ORDER + 1))   # 12 uniform knots
_NUM_CELLS = GRID_SIZE + 2 * SPLINE_ORDER                          # 11 knot intervals


def _round_up(a, b):
    return (a + b - 1) // b * b


def _tensorcores_per_chip():
    """Best-effort TensorCores-per-chip detection (v5e/v6e: 1, v7x: 2)."""
    try:
        kind = jax.devices()[0].device_kind.lower()
    except Exception:
        return 1
    if any(s in kind for s in ("v2", "v3", "v4", "v5", "v6")):
        return 1
    if "7" in kind:
        return 2
    return 1


# --------------------------- spline basis evaluation ---------------------------
def _b_splines_closed(x):
    """Closed-form uniform cubic B-spline bases (== Cox-de Boor on the uniform grid).

    B_j(x) = B((x - t_j)/h) with the cardinal cubic B-spline written in truncated-
    power form; the 12 relu-cubes are shared across all 8 bases, and clamping u to
    [0, 11] makes out-of-range inputs give exactly-zero bases (matching the
    half-open order-0 intervals of efficient-KAN).
    x: (B, IN) f32 -> list of NUM_COEFF arrays (B, IN) f32.
    """
    u = (x - KNOTS[0]) * (1.0 / _H)
    u = jnp.clip(u, 0.0, float(_NUM_CELLS))
    cubes = []
    for m in range(_NUM_CELLS + 1):                    # 12 shared truncated cubes
        v = jnp.maximum(u - float(m), 0.0)
        cubes.append(v * v * v)
    c0, c1, c4 = 1.0 / 6.0, -4.0 / 6.0, 1.0 / 6.0
    bases = []
    for j in range(NUM_COEFF):
        bases.append(c0 * cubes[j] + c1 * cubes[j + 1] + cubes[j + 2]
                     + c1 * cubes[j + 3] + c4 * cubes[j + 4])
    return bases


def _b_splines_ref(x):
    """Reference Cox-de Boor recursion (matches efficient_kan.KANLinear.b_splines)."""
    t = KNOTS
    bases = [((x >= t[j]) & (x < t[j + 1])).astype(x.dtype) for j in range(len(t) - 1)]
    for k in range(1, SPLINE_ORDER + 1):
        nb = []
        for j in range(len(bases) - 1):
            nb.append((x - t[j]) / (t[j + k] - t[j]) * bases[j]
                      + (t[j + k + 1] - x) / (t[j + k + 1] - t[j + 1]) * bases[j + 1])
        bases = nb
    return bases


# ------------------------------ Pallas kernel ------------------------------
def _scale_to_bf16(a, alpha):
    if alpha != 1.0:
        a = a * alpha
    return a.astype(jnp.bfloat16)


def kan_linear_kernel(x_ref, w_ref, o_ref, *, alphas, red_axis):
    """One KANLinear layer; reduction over input-feature tiles on grid axis `red_axis`.

    x_ref : (B_pad, blk) f32               input tile
    w_ref : (NUM_BASES*blk, OUT_pad) int8  packed [base|c0..c7] quantized weight tile
    o_ref : (B_pad, OUT_pad) f32           output, resident across the reduction axis
    """
    @pl.when(pl.program_id(red_axis) == 0)
    def _():
        o_ref[...] = jnp.zeros_like(o_ref)

    x = x_ref[...]                                     # (B_pad, blk) f32
    silu_x = x * jax.nn.sigmoid(x)                     # SiLU base activation (EUP)
    bases = _b_splines_closed(x)                       # NUM_COEFF x (B_pad, blk)
    # Per-group alpha folded into the (tiny) activations; cast each piece to bf16
    # before concatenation so the fused feature buffer is never materialized in f32.
    pieces = [_scale_to_bf16(silu_x, alphas[0])]
    pieces += [_scale_to_bf16(bases[c], alphas[c + 1]) for c in range(NUM_COEFF)]
    feats = jnp.concatenate(pieces, axis=-1)           # (B_pad, NUM_BASES*blk) bf16

    w = w_ref[...].astype(jnp.bfloat16)                # int8 -> bf16 (exact, |q|<=127)
    o_ref[...] += jnp.dot(feats, w, preferred_element_type=jnp.float32)


# ------------------------- host-side weight packing -------------------------
def pack_kan_layer(base_w, spline_w, spline_scaler, *, n_par=1, max_in_blk=2048,
                   max_w_tile_bytes=8 * 1024 * 1024, weight_dtype=jnp.int8):
    """Quantize + pack one KANLinear's weights for the fused streaming kernel.

    base_w        : (OUT, IN)  f32
    spline_w      : (OUT, IN, NUM_COEFF) f32
    spline_scaler : (OUT, IN)  f32
    Effective weight = q * alpha[group] * s_col[out]; alpha is folded into the
    kernel's activations, s_col is applied on the final result in the wrapper.
    """
    assert max_in_blk % 128 == 0
    out_f, in_f = base_w.shape
    out_pad = _round_up(out_f, 128)                    # lane-dense output
    w_bytes = jnp.dtype(weight_dtype).itemsize

    blk = max_in_blk
    while blk > 128 and NUM_BASES * blk * out_pad * w_bytes > max_w_tile_bytes:
        blk //= 2
    blk = max(128, (blk // 128) * 128)
    blk = min(blk, _round_up(in_f, 128))

    if n_par > 1 and _round_up(in_f, blk) // blk >= n_par:
        in_pad = _round_up(in_f, n_par * blk)
    else:
        n_par = 1
        in_pad = _round_up(in_f, blk)
    n_k = in_pad // blk

    scaled = spline_w * spline_scaler[..., None]                         # (OUT, IN, C)
    w_all = jnp.concatenate(
        [base_w.T[None], jnp.transpose(scaled, (2, 1, 0))], axis=0)     # (9, IN, OUT)
    w_all = jnp.pad(w_all, ((0, 0), (0, in_pad - in_f), (0, out_pad - out_f)))

    if weight_dtype == jnp.int8:
        amax_g = jnp.max(jnp.abs(w_all.reshape(NUM_BASES, -1)), axis=1)  # per-group
        alpha = jnp.where(amax_g > 0, amax_g, 1.0)
        w_norm = w_all / alpha[:, None, None]
        amax_c = jnp.max(jnp.abs(w_norm), axis=(0, 1))                   # per-out-col
        s_col = jnp.where(amax_c > 0, amax_c, 1.0) / 127.0
        q = jnp.clip(jnp.round(w_norm / s_col[None, None, :]), -127, 127)
        w_store = q.astype(jnp.int8)
        alphas = tuple(float(a) for a in alpha)
    else:                                              # bf16 fallback (e.g. v7x A/B)
        w_store = w_all.astype(weight_dtype)
        s_col = jnp.ones((out_pad,), jnp.float32)
        alphas = (1.0,) * NUM_BASES

    w_packed = (w_store.reshape(NUM_BASES, n_k, blk, out_pad)
                       .transpose(1, 0, 2, 3)
                       .reshape(n_k * NUM_BASES * blk, out_pad))
    return dict(w_packed=w_packed, s_col=s_col.astype(jnp.float32), alphas=alphas,
                in_features=in_f, out_features=out_f, in_pad=in_pad, out_pad=out_pad,
                blk=blk, n_k=n_k, n_par=n_par)


def dequantize_layer(layer):
    """Rebuild the effective (dequantized) weights for the pure-JAX reference."""
    n_k, blk, out_pad = layer["n_k"], layer["blk"], layer["out_pad"]
    in_f, out_f = layer["in_features"], layer["out_features"]
    w = layer["w_packed"].astype(jnp.float32)
    w = (w.reshape(n_k, NUM_BASES, blk, out_pad)
          .transpose(1, 0, 2, 3)
          .reshape(NUM_BASES, n_k * blk, out_pad))
    w = w * layer["s_col"][None, None, :]
    w = w * jnp.array(layer["alphas"], jnp.float32)[:, None, None]
    w = w[:, :in_f, :out_f]
    base_w = w[0].T                                    # (OUT, IN)
    spline_scaled = jnp.transpose(w[1:], (2, 1, 0))    # (OUT, IN, C)
    return base_w, spline_scaled


# ------------------------------ layer wrapper -------------------------------
def kan_linear(x, layer):
    """x:(B, IN) -> (B, OUT) for one packed KANLinear layer."""
    B, in_f = x.shape
    assert in_f == layer["in_features"]
    blk, n_k, n_par = layer["blk"], layer["n_k"], layer["n_par"]
    in_pad, out_pad = layer["in_pad"], layer["out_pad"]
    out_f = layer["out_features"]
    b_pad = _round_up(B, 16)                           # bf16 (16,128) native sublanes

    x_p = jnp.pad(x.astype(jnp.float32), ((0, b_pad - B), (0, in_pad - in_f)))

    w_itemsize = layer["w_packed"].dtype.itemsize
    w_tile_bytes = NUM_BASES * blk * out_pad * w_itemsize
    deq_bytes = NUM_BASES * blk * out_pad * 2          # bf16 dequant copy
    need = (2 * w_tile_bytes + deq_bytes + 2 * b_pad * blk * 4
            + b_pad * NUM_BASES * blk * 2 + 4 * b_pad * out_pad * 4 + (8 << 20))
    vmem_limit = int(min(64 << 20, max(32 << 20, need)))   # <=64 MiB for v7x physical

    cost = pl.CostEstimate(
        flops=2 * b_pad * NUM_BASES * in_pad * out_pad,
        transcendentals=b_pad * in_pad,
        bytes_accessed=(int(layer["w_packed"].size) * w_itemsize
                        + b_pad * in_pad * 4 + n_par * b_pad * out_pad * 4))

    if n_par == 1:
        # Single-TensorCore chips (v5e/v6e): no partials slab, no extra reduction.
        kernel = partial(kan_linear_kernel, alphas=layer["alphas"], red_axis=0)
        out_full = pl.pallas_call(
            kernel,
            out_shape=jax.ShapeDtypeStruct((b_pad, out_pad), jnp.float32),
            grid_spec=pltpu.PrefetchScalarGridSpec(
                num_scalar_prefetch=0,
                grid=(n_k,),
                in_specs=[
                    pl.BlockSpec((b_pad, blk), lambda k: (0, k)),
                    pl.BlockSpec((NUM_BASES * blk, out_pad), lambda k: (k, 0)),
                ],
                out_specs=pl.BlockSpec((b_pad, out_pad), lambda k: (0, 0)),
            ),
            compiler_params=pltpu.CompilerParams(
                dimension_semantics=("arbitrary",),
                vmem_limit_bytes=vmem_limit),
            cost_estimate=cost,
        )(x_p, layer["w_packed"])
    else:
        # 2-TensorCore chips (v7x): split the weight stream across cores for real.
        n_k_per = n_k // n_par
        kernel = partial(kan_linear_kernel, alphas=layer["alphas"], red_axis=1)
        partials = pl.pallas_call(
            kernel,
            out_shape=jax.ShapeDtypeStruct((n_par, b_pad, out_pad), jnp.float32),
            grid_spec=pltpu.PrefetchScalarGridSpec(
                num_scalar_prefetch=0,
                grid=(n_par, n_k_per),
                in_specs=[
                    pl.BlockSpec((b_pad, blk),
                                 lambda p, k: (0, p * n_k_per + k)),
                    pl.BlockSpec((NUM_BASES * blk, out_pad),
                                 lambda p, k: (p * n_k_per + k, 0)),
                ],
                out_specs=pl.BlockSpec((None, b_pad, out_pad),
                                       lambda p, k: (p, 0, 0)),
            ),
            compiler_params=pltpu.CompilerParams(
                dimension_semantics=(pltpu.CORE_PARALLEL, pltpu.ARBITRARY),
                vmem_limit_bytes=vmem_limit),
            cost_estimate=cost,
        )(x_p, layer["w_packed"])
        out_full = jnp.sum(partials, axis=0)

    # Per-output-column dequant scale factors out of the whole reduction -> apply once.
    return out_full[:B, :out_f] * layer["s_col"][None, :out_f]


# ------------------------- parameter initialization -------------------------
def init_kan_raw_params(key, layer_dims):
    """Deterministic stand-in for efficient-KAN KANLinear params (f32, unpacked)."""
    params = []
    for fin, fout in zip(layer_dims[:-1], layer_dims[1:]):
        key, k1, k2, k3 = jax.random.split(key, 4)
        base_w = jax.random.normal(k1, (fout, fin), jnp.float32) / math.sqrt(fin)
        spline_w = jax.random.normal(k2, (fout, fin, NUM_COEFF), jnp.float32) * (
            0.1 / math.sqrt(fin))
        spline_scaler = jax.random.normal(k3, (fout, fin), jnp.float32) / math.sqrt(fin)
        params.append((base_w, spline_w, spline_scaler))
    return params, key


# -------------------------------- forward ----------------------------------
def esm3_kan_forward(tokens, embed_table, kan1_layers, kan2_layers,
                     batch_size, num_label_types, pred_len):
    # TODO(synk): the ESM3_sm_open_v0 transformer has no clean Pallas equivalent
    #             here; its `.embeddings` output is stood in by a deterministic
    #             embedding-table lookup (the torch.save side effect is dropped).
    emb = jnp.take(embed_table, tokens, axis=0)        # (B, L, E)
    x = emb.reshape(emb.shape[0], -1)                  # nn.Flatten -> (B, d_in)
    for layer in kan1_layers:                          # KAN_model
        x = kan_linear(x, layer)
    for layer in kan2_layers:                          # KAN_model2
        x = kan_linear(x, layer)
    return x.reshape(batch_size, num_label_types, pred_len)


def kan_linear_ref(x, base_w, spline_scaled):
    """Pure-JAX reference of one KANLinear on the dequantized weights."""
    x = x.astype(jnp.float32)
    silu = x * jax.nn.sigmoid(x)
    out = jnp.dot(silu.astype(jnp.bfloat16), base_w.T.astype(jnp.bfloat16),
                  preferred_element_type=jnp.float32)
    bases = _b_splines_ref(x)                          # Cox-de Boor ground truth
    for c in range(NUM_COEFF):
        out = out + jnp.dot(bases[c].astype(jnp.bfloat16),
                            spline_scaled[:, :, c].T.astype(jnp.bfloat16),
                            preferred_element_type=jnp.float32)
    return out


if __name__ == "__main__":
    # Small, consistent stand-ins for the module's hyperparameters.
    batch_size = 2
    seq_len = 16           # stand-in for protein+peptide token length
    embed_dim = 128        # stand-in for ESM3 embedding dim (1536)
    d_in = seq_len * embed_dim          # 2048  (original: 849408)
    num_neurons = 32                    # original: 100
    num_label_types = 3
    peptide_len, protein_len = 5, 10
    pred_len = protein_len + peptide_len + 1            # 16   (original: 551)
    d_out = pred_len * num_label_types                  # 48   (original: 1653)
    vocab = 64

    key = jax.random.PRNGKey(0)
    key, k_tok, k_emb = jax.random.split(key, 3)
    tokens = jax.random.randint(k_tok, (batch_size, seq_len), 0, vocab, jnp.int32)
    embed_table = 0.5 * jax.random.normal(k_emb, (vocab, embed_dim), jnp.float32)

    kan1_raw, key = init_kan_raw_params(key, [d_in, num_neurons, d_out])
    kan2_raw, key = init_kan_raw_params(key, [d_out, num_neurons, d_out])

    n_par = 2 if _tensorcores_per_chip() >= 2 else 1
    # max_in_blk=512 so the d_in layer exercises a multi-tile reduction at these small
    # demo shapes; production default is 2048 (~2.4 MiB int8 weight tiles).
    kan1_layers = [pack_kan_layer(*p, n_par=n_par, max_in_blk=512) for p in kan1_raw]
    kan2_layers = [pack_kan_layer(*p, n_par=n_par, max_in_blk=512) for p in kan2_raw]

    out = esm3_kan_forward(tokens, embed_table, kan1_layers, kan2_layers,
                           batch_size, num_label_types, pred_len)
    out = jax.block_until_ready(out)
    assert out.shape == (batch_size, num_label_types, pred_len)

    # Pure-JAX reference of the whole KAN stack on the same dequantized weights.
    x_ref = jnp.take(embed_table, tokens, axis=0).reshape(batch_size, -1)
    for layer in kan1_layers + kan2_layers:
        bw, spl = dequantize_layer(layer)
        x_ref = kan_linear_ref(x_ref, bw, spl)
    ref = x_ref.reshape(batch_size, num_label_types, pred_len)
    assert jnp.allclose(out, ref, rtol=2e-2, atol=2e-2), "mismatch vs reference"

    print("KERNEL_OK")
</pallas_src>

<mosaic_0001>
module attributes {stable_mosaic.version = 11 : i64} {
  func.func @kan_linear_kernel(%arg0: i32, %arg1: memref<16x512xf32, #tpu.memory_space<vmem>>, %arg2: memref<4608x128xi8, #tpu.memory_space<vmem>>, %arg3: memref<16x128xf32, #tpu.memory_space<vmem>>) attributes {dimension_semantics = [#tpu.dimension_semantics<arbitrary>], iteration_bounds = array<i64: 4>, scalar_prefetch = 0 : i64, scratch_operands = 0 : i64, tpu.core_type = #tpu.core_type<tc>, window_params = [{transform_indices = @transform_0, window_bounds = array<i64: 16, 512>}, {transform_indices = @transform_1, window_bounds = array<i64: 4608, 128>}, {pipeline_mode = #tpu.pipeline_mode<synchronous>, transform_indices = @transform_2, window_bounds = array<i64: 16, 128>}]} {
    %c0_i32 = arith.constant 0 : i32
    %0 = arith.cmpi eq, %arg0, %c0_i32 : i32
    %1 = arith.extui %0 : i1 to i32
    %c0_i32_0 = arith.constant 0 : i32
    %2 = arith.cmpi ne, %1, %c0_i32_0 : i32
    scf.if %2 {
      %cst_78 = arith.constant 0.000000e+00 : f32
      %220 = vector.broadcast %cst_78 : f32 to vector<16x128xf32>
      %c0_79 = arith.constant 0 : index
      %c0_80 = arith.constant 0 : index
      %221 = vector.load %arg3[%c0_79, %c0_80] : memref<16x128xf32, #tpu.memory_space<vmem>>, vector<16x128xf32>
      tpu.vector_store %arg3[%c0_79, %c0_80], %220 {strides = array<i32>} : memref<16x128xf32, #tpu.memory_space<vmem>>, vector<16x128xf32>,
    } else {
    }
    %c0 = arith.constant 0 : index
    %c0_1 = arith.constant 0 : index
    %3 = vector.load %arg1[%c0, %c0_1] : memref<16x512xf32, #tpu.memory_space<vmem>>, vector<16x512xf32>
    %4 = arith.negf %3 : vector<16x512xf32>
    %5 = math.exp %4 : vector<16x512xf32>
    %cst = arith.constant 1.000000e+00 : f32
    %6 = vector.broadcast %cst : f32 to vector<16x512xf32>
    %7 = arith.addf %6, %5 : vector<16x512xf32>
    %8 = arith.divf %6, %7 : vector<16x512xf32>
    %9 = arith.mulf %3, %8 : vector<16x512xf32>
    %cst_2 = arith.constant -2.200000e+00 : f32
    %10 = vector.broadcast %cst_2 : f32 to vector<16x512xf32>
    %11 = arith.subf %3, %10 : vector<16x512xf32>
    %cst_3 = arith.constant 2.500000e+00 : f32
    %12 = vector.broadcast %cst_3 : f32 to vector<16x512xf32>
    %13 = arith.mulf %11, %12 : vector<16x512xf32>
    %cst_4 = arith.constant 0.000000e+00 : f32
    %cst_5 = arith.constant 1.100000e+01 : f32
    %14 = vector.broadcast %cst_4 : f32 to vector<16x512xf32>
    %15 = arith.maximumf %14, %13 : vector<16x512xf32>
    %16 = vector.broadcast %cst_5 : f32 to vector<16x512xf32>
    %17 = arith.minimumf %16, %15 : vector<16x512xf32>
    %cst_6 = arith.constant 0.000000e+00 : f32
    %18 = vector.broadcast %cst_6 : f32 to vector<16x512xf32>
    %19 = arith.subf %17, %18 : vector<16x512xf32>
    %cst_7 = arith.constant 0.000000e+00 : f32
    %20 = vector.broadcast %cst_7 : f32 to vector<16x512xf32>
    %21 = arith.maximumf %19, %20 : vector<16x512xf32>
    %22 = arith.mulf %21, %21 : vector<16x512xf32>
    %23 = arith.mulf %22, %21 : vector<16x512xf32>
    %cst_8 = arith.constant 1.000000e+00 : f32
    %24 = vector.broadcast %cst_8 : f32 to vector<16x512xf32>
    %25 = arith.subf %17, %24 : vector<16x512xf32>
    %cst_9 = arith.constant 0.000000e+00 : f32
    %26 = vector.broadcast %cst_9 : f32 to vector<16x512xf32>
    %27 = arith.maximumf %25, %26 : vector<16x512xf32>
    %28 = arith.mulf %27, %27 : vector<16x512xf32>
    %29 = arith.mulf %28, %27 : vector<16x512xf32>
    %cst_10 = arith.constant 2.000000e+00 : f32
    %30 = vector.broadcast %cst_10 : f32 to vector<16x512xf32>
    %31 = arith.subf %17, %30 : vector<16x512xf32>
    %cst_11 = arith.constant 0.000000e+00 : f32
    %32 = vector.broadcast %cst_11 : f32 to vector<16x512xf32>
    %33 = arith.maximumf %31, %32 : vector<16x512xf32>
    %34 = arith.mulf %33, %33 : vector<16x512xf32>
    %35 = arith.mulf %34, %33 : vector<16x512xf32>
    %cst_12 = arith.constant 3.000000e+00 : f32
    %36 = vector.broadcast %cst_12 : f32 to vector<16x512xf32>
    %37 = arith.subf %17, %36 : vector<16x512xf32>
    %cst_13 = arith.constant 0.000000e+00 : f32
    %38 = vector.broadcast %cst_13 : f32 to vector<16x512xf32>
    %39 = arith.maximumf %37, %38 : vector<16x512xf32>
    %40 = arith.mulf %39, %39 : vector<16x512xf32>
    %41 = arith.mulf %40, %39 : vector<16x512xf32>
    %cst_14 = arith.constant 4.000000e+00 : f32
    %42 = vector.broadcast %cst_14 : f32 to vector<16x512xf32>
    %43 = arith.subf %17, %42 : vector<16x512xf32>
    %cst_15 = arith.constant 0.000000e+00 : f32
    %44 = vector.broadcast %cst_15 : f32 to vector<16x512xf32>
    %45 = arith.maximumf %43, %44 : vector<16x512xf32>
    %46 = arith.mulf %45, %45 : vector<16x512xf32>
    %47 = arith.mulf %46, %45 : vector<16x512xf32>
    %cst_16 = arith.constant 5.000000e+00 : f32
    %48 = vector.broadcast %cst_16 : f32 to vector<16x512xf32>
    %49 = arith.subf %17, %48 : vector<16x512xf32>
    %cst_17 = arith.constant 0.000000e+00 : f32
    %50 = vector.broadcast %cst_17 : f32 to vector<16x512xf32>
    %51 = arith.maximumf %49, %50 : vector<16x512xf32>
    %52 = arith.mulf %51, %51 : vector<16x512xf32>
    %53 = arith.mulf %52, %51 : vector<16x512xf32>
    %cst_18 = arith.constant 6.000000e+00 : f32
    %54 = vector.broadcast %cst_18 : f32 to vector<16x512xf32>
    %55 = arith.subf %17, %54 : vector<16x512xf32>
    %cst_19 = arith.constant 0.000000e+00 : f32
    %56 = vector.broadcast %cst_19 : f32 to vector<16x512xf32>
    %57 = arith.maximumf %55, %56 : vector<16x512xf32>
    %58 = arith.mulf %57, %57 : vector<16x512xf32>
    %59 = arith.mulf %58, %57 : vector<16x512xf32>
    %cst_20 = arith.constant 7.000000e+00 : f32
    %60 = vector.broadcast %cst_20 : f32 to vector<16x512xf32>
    %61 = arith.subf %17, %60 : vector<16x512xf32>
    %cst_21 = arith.constant 0.000000e+00 : f32
    %62 = vector.broadcast %cst_21 : f32 to vector<16x512xf32>
    %63 = arith.maximumf %61, %62 : vector<16x512xf32>
    %64 = arith.mulf %63, %63 : vector<16x512xf32>
    %65 = arith.mulf %64, %63 : vector<16x512xf32>
    %cst_22 = arith.constant 8.000000e+00 : f32
    %66 = vector.broadcast %cst_22 : f32 to vector<16x512xf32>
    %67 = arith.subf %17, %66 : vector<16x512xf32>
    %cst_23 = arith.constant 0.000000e+00 : f32
    %68 = vector.broadcast %cst_23 : f32 to vector<16x512xf32>
    %69 = arith.maximumf %67, %68 : vector<16x512xf32>
    %70 = arith.mulf %69, %69 : vector<16x512xf32>
    %71 = arith.mulf %70, %69 : vector<16x512xf32>
    %cst_24 = arith.constant 9.000000e+00 : f32
    %72 = vector.broadcast %cst_24 : f32 to vector<16x512xf32>
    %73 = arith.subf %17, %72 : vector<16x512xf32>
    %cst_25 = arith.constant 0.000000e+00 : f32
    %74 = vector.broadcast %cst_25 : f32 to vector<16x512xf32>
    %75 = arith.maximumf %73, %74 : vector<16x512xf32>
    %76 = arith.mulf %75, %75 : vector<16x512xf32>
    %77 = arith.mulf %76, %75 : vector<16x512xf32>
    %cst_26 = arith.constant 1.000000e+01 : f32
    %78 = vector.broadcast %cst_26 : f32 to vector<16x512xf32>
    %79 = arith.subf %17, %78 : vector<16x512xf32>
    %cst_27 = arith.constant 0.000000e+00 : f32
    %80 = vector.broadcast %cst_27 : f32 to vector<16x512xf32>
    %81 = arith.maximumf %79, %80 : vector<16x512xf32>
    %82 = arith.mulf %81, %81 : vector<16x512xf32>
    %83 = arith.mulf %82, %81 : vector<16x512xf32>
    %cst_28 = arith.constant 1.100000e+01 : f32
    %84 = vector.broadcast %cst_28 : f32 to vector<16x512xf32>
    %85 = arith.subf %17, %84 : vector<16x512xf32>
    %cst_29 = arith.constant 0.000000e+00 : f32
    %86 = vector.broadcast %cst_29 : f32 to vector<16x512xf32>
    %87 = arith.maximumf %85, %86 : vector<16x512xf32>
    %88 = arith.mulf %87, %87 : vector<16x512xf32>
    %89 = arith.mulf %88, %87 : vector<16x512xf32>
    %cst_30 = arith.constant 0.166666672 : f32
    %90 = vector.broadcast %cst_30 : f32 to vector<16x512xf32>
    %91 = arith.mulf %90, %23 : vector<16x512xf32>
    %cst_31 = arith.constant -0.666666686 : f32
    %92 = vector.broadcast %cst_31 : f32 to vector<16x512xf32>
    %93 = arith.mulf %92, %29 : vector<16x512xf32>
    %94 = arith.addf %91, %93 : vector<16x512xf32>
    %95 = arith.addf %94, %35 : vector<16x512xf32>
    %cst_32 = arith.constant -0.666666686 : f32
    %96 = vector.broadcast %cst_32 : f32 to vector<16x512xf32>
    %97 = arith.mulf %96, %41 : vector<16x512xf32>
    %98 = arith.addf %95, %97 : vector<16x512xf32>
    %cst_33 = arith.constant 0.166666672 : f32
    %99 = vector.broadcast %cst_33 : f32 to vector<16x512xf32>
    %100 = arith.mulf %99, %47 : vector<16x512xf32>
    %101 = arith.addf %98, %100 : vector<16x512xf32>
    %cst_34 = arith.constant 0.166666672 : f32
    %102 = vector.broadcast %cst_34 : f32 to vector<16x512xf32>
    %103 = arith.mulf %102, %29 : vector<16x512xf32>
    %cst_35 = arith.constant -0.666666686 : f32
    %104 = vector.broadcast %cst_35 : f32 to vector<16x512xf32>
    %105 = arith.mulf %104, %35 : vector<16x512xf32>
    %106 = arith.addf %103, %105 : vector<16x512xf32>
    %107 = arith.addf %106, %41 : vector<16x512xf32>
    %cst_36 = arith.constant -0.666666686 : f32
    %108 = vector.broadcast %cst_36 : f32 to vector<16x512xf32>
    %109 = arith.mulf %108, %47 : vector<16x512xf32>
    %110 = arith.addf %107, %109 : vector<16x512xf32>
    %cst_37 = arith.constant 0.166666672 : f32
    %111 = vector.broadcast %cst_37 : f32 to vector<16x512xf32>
    %112 = arith.mulf %111, %53 : vector<16x512xf32>
    %113 = arith.addf %110, %112 : vector<16x512xf32>
    %cst_38 = arith.constant 0.166666672 : f32
    %114 = vector.broadcast %cst_38 : f32 to vector<16x512xf32>
    %115 = arith.mulf %114, %35 : vector<16x512xf32>
    %cst_39 = arith.constant -0.666666686 : f32
    %116 = vector.broadcast %cst_39 : f32 to vector<16x512xf32>
    %117 = arith.mulf %116, %41 : vector<16x512xf32>
    %118 = arith.addf %115, %117 : vector<16x512xf32>
    %119 = arith.addf %118, %47 : vector<16x512xf32>
    %cst_40 = arith.constant -0.666666686 : f32
    %120 = vector.broadcast %cst_40 : f32 to vector<16x512xf32>
    %121 = arith.mulf %120, %53 : vector<16x512xf32>
    %122 = arith.addf %119, %121 : vector<16x512xf32>
    %cst_41 = arith.constant 0.166666672 : f32
    %123 = vector.broadcast %cst_41 : f32 to vector<16x512xf32>
    %124 = arith.mulf %123, %59 : vector<16x512xf32>
    %125 = arith.addf %122, %124 : vector<16x512xf32>
    %cst_42 = arith.constant 0.166666672 : f32
    %126 = vector.broadcast %cst_42 : f32 to vector<16x512xf32>
    %127 = arith.mulf %126, %41 : vector<16x512xf32>
    %cst_43 = arith.constant -0.666666686 : f32
    %128 = vector.broadcast %cst_43 : f32 to vector<16x512xf32>
    %129 = arith.mulf %128, %47 : vector<16x512xf32>
    %130 = arith.addf %127, %129 : vector<16x512xf32>
    %131 = arith.addf %130, %53 : vector<16x512xf32>
    %cst_44 = arith.constant -0.666666686 : f32
    %132 = vector.broadcast %cst_44 : f32 to vector<16x512xf32>
    %133 = arith.mulf %132, %59 : vector<16x512xf32>
    %134 = arith.addf %131, %133 : vector<16x512xf32>
    %cst_45 = arith.constant 0.166666672 : f32
    %135 = vector.broadcast %cst_45 : f32 to vector<16x512xf32>
    %136 = arith.mulf %135, %65 : vector<16x512xf32>
    %137 = arith.addf %134, %136 : vector<16x512xf32>
    %cst_46 = arith.constant 0.166666672 : f32
    %138 = vector.broadcast %cst_46 : f32 to vector<16x512xf32>
    %139 = arith.mulf %138, %47 : vector<16x512xf32>
    %cst_47 = arith.constant -0.666666686 : f32
    %140 = vector.broadcast %cst_47 : f32 to vector<16x512xf32>
    %141 = arith.mulf %140, %53 : vector<16x512xf32>
    %142 = arith.addf %139, %141 : vector<16x512xf32>
    %143 = arith.addf %142, %59 : vector<16x512xf32>
    %cst_48 = arith.constant -0.666666686 : f32
    %144 = vector.broadcast %cst_48 : f32 to vector<16x512xf32>
    %145 = arith.mulf %144, %65 : vector<16x512xf32>
    %146 = arith.addf %143, %145 : vector<16x512xf32>
    %cst_49 = arith.constant 0.166666672 : f32
    %147 = vector.broadcast %cst_49 : f32 to vector<16x512xf32>
    %148 = arith.mulf %147, %71 : vector<16x512xf32>
    %149 = arith.addf %146, %148 : vector<16x512xf32>
    %cst_50 = arith.constant 0.166666672 : f32
    %150 = vector.broadcast %cst_50 : f32 to vector<16x512xf32>
    %151 = arith.mulf %150, %53 : vector<16x512xf32>
    %cst_51 = arith.constant -0.666666686 : f32
    %152 = vector.broadcast %cst_51 : f32 to vector<16x512xf32>
    %153 = arith.mulf %152, %59 : vector<16x512xf32>
    %154 = arith.addf %151, %153 : vector<16x512xf32>
    %155 = arith.addf %154, %65 : vector<16x512xf32>
    %cst_52 = arith.constant -0.666666686 : f32
    %156 = vector.broadcast %cst_52 : f32 to vector<16x512xf32>
    %157 = arith.mulf %156, %71 : vector<16x512xf32>
    %158 = arith.addf %155, %157 : vector<16x512xf32>
    %cst_53 = arith.constant 0.166666672 : f32
    %159 = vector.broadcast %cst_53 : f32 to vector<16x512xf32>
    %160 = arith.mulf %159, %77 : vector<16x512xf32>
    %161 = arith.addf %158, %160 : vector<16x512xf32>
    %cst_54 = arith.constant 0.166666672 : f32
    %162 = vector.broadcast %cst_54 : f32 to vector<16x512xf32>
    %163 = arith.mulf %162, %59 : vector<16x512xf32>
    %cst_55 = arith.constant -0.666666686 : f32
    %164 = vector.broadcast %cst_55 : f32 to vector<16x512xf32>
    %165 = arith.mulf %164, %65 : vector<16x512xf32>
    %166 = arith.addf %163, %165 : vector<16x512xf32>
    %167 = arith.addf %166, %71 : vector<16x512xf32>
    %cst_56 = arith.constant -0.666666686 : f32
    %168 = vector.broadcast %cst_56 : f32 to vector<16x512xf32>
    %169 = arith.mulf %168, %77 : vector<16x512xf32>
    %170 = arith.addf %167, %169 : vector<16x512xf32>
    %cst_57 = arith.constant 0.166666672 : f32
    %171 = vector.broadcast %cst_57 : f32 to vector<16x512xf32>
    %172 = arith.mulf %171, %83 : vector<16x512xf32>
    %173 = arith.addf %170, %172 : vector<16x512xf32>
    %cst_58 = arith.constant 0.166666672 : f32
    %174 = vector.broadcast %cst_58 : f32 to vector<16x512xf32>
    %175 = arith.mulf %174, %65 : vector<16x512xf32>
    %cst_59 = arith.constant -0.666666686 : f32
    %176 = vector.broadcast %cst_59 : f32 to vector<16x512xf32>
    %177 = arith.mulf %176, %71 : vector<16x512xf32>
    %178 = arith.addf %175, %177 : vector<16x512xf32>
    %179 = arith.addf %178, %77 : vector<16x512xf32>
    %cst_60 = arith.constant -0.666666686 : f32
    %180 = vector.broadcast %cst_60 : f32 to vector<16x512xf32>
    %181 = arith.mulf %180, %83 : vector<16x512xf32>
    %182 = arith.addf %179, %181 : vector<16x512xf32>
    %cst_61 = arith.constant 0.166666672 : f32
    %183 = vector.broadcast %cst_61 : f32 to vector<16x512xf32>
    %184 = arith.mulf %183, %89 : vector<16x512xf32>
    %185 = arith.addf %182, %184 : vector<16x512xf32>
    %cst_62 = arith.constant 0.109194845 : f32
    %186 = vector.broadcast %cst_62 : f32 to vector<16x512xf32>
    %187 = arith.mulf %9, %186 : vector<16x512xf32>
    %188 = arith.truncf %187 : vector<16x512xf32> to vector<16x512xbf16>
    %cst_63 = arith.constant 6.43781153E-4 : f32
    %189 = vector.broadcast %cst_63 : f32 to vector<16x512xf32>
    %190 = arith.mulf %101, %189 : vector<16x512xf32>
    %191 = arith.truncf %190 : vector<16x512xf32> to vector<16x512xbf16>
    %cst_64 = arith.constant 5.53355145E-4 : f32
    %192 = vector.broadcast %cst_64 : f32 to vector<16x512xf32>
    %193 = arith.mulf %113, %192 : vector<16x512xf32>
    %194 = arith.truncf %193 : vector<16x512xf32> to vector<16x512xbf16>
    %cst_65 = arith.constant 4.93188447E-4 : f32
    %195 = vector.broadcast %cst_65 : f32 to vector<16x512xf32>
    %196 = arith.mulf %125, %195 : vector<16x512xf32>
    %197 = arith.truncf %196 : vector<16x512xf32> to vector<16x512xbf16>
    %cst_66 = arith.constant 4.72371699E-4 : f32
    %198 = vector.broadcast %cst_66 : f32 to vector<16x512xf32>
    %199 = arith.mulf %137, %198 : vector<16x512xf32>
    %200 = arith.truncf %199 : vector<16x512xf32> to vector<16x512xbf16>
    %cst_67 = arith.constant 4.5815864E-4 : f32
    %201 = vector.broadcast %cst_67 : f32 to vector<16x512xf32>
    %202 = arith.mulf %149, %201 : vector<16x512xf32>
    %203 = arith.truncf %202 : vector<16x512xf32> to vector<16x512xbf16>
    %cst_68 = arith.constant 4.81031631E-4 : f32
    %204 = vector.broadcast %cst_68 : f32 to vector<16x512xf32>
    %205 = arith.mulf %161, %204 : vector<16x512xf32>
    %206 = arith.truncf %205 : vector<16x512xf32> to vector<16x512xbf16>
    %cst_69 = arith.constant 5.116820e-04 : f32
    %207 = vector.broadcast %cst_69 : f32 to vector<16x512xf32>
    %208 = arith.mulf %173, %207 : vector<16x512xf32>
    %209 = arith.truncf %208 : vector<16x512xf32> to vector<16x512xbf16>
    %cst_70 = arith.constant 5.02499344E-4 : f32
    %210 = vector.broadcast %cst_70 : f32 to vector<16x512xf32>
    %211 = arith.mulf %185, %210 : vector<16x512xf32>
    %212 = arith.truncf %211 : vector<16x512xf32> to vector<16x512xbf16>
    %213 = tpu.concatenate %188, %191, %194, %197, %200, %203, %206, %209, %212 in 1 : vector<16x512xbf16>, vector<16x512xbf16>, vector<16x512xbf16>, vector<16x512xbf16>, vector<16x512xbf16>, vector<16x512xbf16>, vector<16x512xbf16>, vector<16x512xbf16>, vector<16x512xbf16> -> vector<16x4608xbf16>
    %c0_71 = arith.constant 0 : index
    %c0_72 = arith.constant 0 : index
    %214 = vector.load %arg2[%c0_71, %c0_72] : memref<4608x128xi8, #tpu.memory_space<vmem>>, vector<4608x128xi8>
    %215 = arith.sitofp %214 : vector<4608x128xi8> to vector<4608x128xbf16>
    %c0_73 = arith.constant 0 : index
    %c0_74 = arith.constant 0 : index
    %216 = vector.load %arg3[%c0_73, %c0_74] : memref<16x128xf32, #tpu.memory_space<vmem>>, vector<16x128xf32>
    %cst_75 = arith.constant dense<0.000000e+00> : vector<16x128xf32>
    %217 = tpu.matmul %213, %215, %cst_75 {dimension_numbers = #tpu.dot_dimension_numbers<[1], [0], [0], [1], [0, 0, 1, 1], [], []>} : vector<16x4608xbf16>, vector<4608x128xbf16>, vector<16x128xf32> -> vector<16x128xf32>
    %218 = arith.addf %216, %217 : vector<16x128xf32>
    %c0_76 = arith.constant 0 : index
    %c0_77 = arith.constant 0 : index
    %219 = vector.load %arg3[%c0_76, %c0_77] : memref<16x128xf32, #tpu.memory_space<vmem>>, vector<16x128xf32>
    tpu.vector_store %arg3[%c0_76, %c0_77], %218 {strides = array<i32>} : memref<16x128xf32, #tpu.memory_space<vmem>>, vector<16x128xf32>,
    return
  }
  func.func @transform_0(%arg0: i32) -> (i32, i32) {
    %c0_i32 = arith.constant 0 : i32
    %c0_i32_0 = arith.constant 0 : i32
    return %c0_i32, %arg0 : i32, i32
  }
  func.func @transform_1(%arg0: i32) -> (i32, i32) {
    %c0_i32 = arith.constant 0 : i32
    %c0_i32_0 = arith.constant 0 : i32
    return %arg0, %c0_i32 : i32, i32
  }
  func.func @transform_2(%arg0: i32) -> (i32, i32) {
    %c0_i32 = arith.constant 0 : i32
    %c0_i32_0 = arith.constant 0 : i32
    %c0_i32_1 = arith.constant 0 : i32
    return %c0_i32, %c0_i32_0 : i32, i32
  }
}

</mosaic_0001>

<bundles_post_ra>
// kernel: tpu_custom_call.1
= control target key start
LH: loop header
LB: loop body
LE: loop exit
PB: predicated region body
PF: predicated region fallthrough
CT: control target
= control target key end

     0   :  { %7 = vsyncpa [#allocation3], 0  ;;  %s5125_s0 = inlined_call_operand.hbm [shape: f32[16,2048], index: 0, kind: input, shape index: {}]   ;;  %s5126_s1 = inlined_call_operand.hbm [shape: s8[18432,128], index: 1, kind: input, shape index: {}]   ;;  %s5127_s2 = inlined_call_operand.hbm [shape: f32[16,128], index: 2, kind: output, shape index: {}]  }
   0x1   :  { %9 = vsyncpa [#allocation3 + $0x1], 0 }
   0x2   :  { %10 = vsyncpa [#allocation6], 0 }
   0x3   :  { %12 = vsyncpa [#allocation6 + $0x1], 0 }
   0x4   :  { %13 = vsyncpa [#allocation4], 0  ;;  %s3234_s9 = smov 0   ;;  %s3236_s10 = smov 0  }
   0x5   :  { %s3238_s11 = smov 0   ;;  %s3240_s12 = smov 0  }
   0x6 LB: > { %s3253_s13 = sadd.s32 4294967295, %s3206_s12   ;;  %s3256_s14 = sadd.s32 1, %s3206_s12   ;;  %s3206_s12 = sphi %s3240_s12, %s5457_s12   ;;  %s3202_s11 = sphi %s3238_s11, %s5456_s11   ;;  %s3198_s10 = sphi %s3236_s10, %s5455_s10   ;;  %s3194_s9 = sphi %s3234_s9, %s5454_s9  }
   0x7   : > { %s23_s15 = ssub.s32 %s3206_s12, %s3256_s14  ;;  %s26_s16 = sadd.s32 1, %s3202_s11 }
   0x8   : > { %p24_p0 = scmp.eq.s32.totalorder %s23_s15, 0  ;;  %p33_p1 = scmp.ne.s32.totalorder %s3202_s11, %s3198_s10 }
   0x9   : > { %p34_p2 = scmp.eq.s32.totalorder %s3206_s12, 0  ;;  %p39_p3 = scmp.ne.s32.totalorder %s3198_s10, %s3194_s9 }
   0xa   : > { %s3266_s17 = scalar_select %p24_p0, %s3202_s11, %s26_s16  }
   0xb   : > { %p35_p4 = por %p34_p2, %p33_p1  ;;  %p40_p5 = scmp.eq.s32.totalorder %s3253_s13, 0 }
   0xc   : > { %p3002_p6 = scmp.lt.s32.totalorder %s3206_s12, 4  ;;  %s3275_s19 = sand.u32 1, %s3202_s11  }
   0xd   : > { %p3270_p7 = por %p40_p5, %p39_p3  ;;  %s2472_s20 = sshll.u32 %s3275_s19, 6 }
   0xe   : > { %s2587_s21 = sshll.u32 %s3206_s12, 9  ;;  %s114_s25 = scalar_lea.vmem [#allocation2], %s2472_s20 }
   0xf   : > { %s5203_s18 = scalar_select %p3270_p7, 1, 0 }
  0x10   : > { %s3282_s24 = scalar_lea.hbm %s5125_s0, %s2587_s21  ;;  %s121_s26 = sshll.u32 %s114_s25, 4  ;;  %s3284_s26 = int_to_ptr.vmem [resolvable:$true] %s121_s26 }
  0x11   : > { %p3286_p8 = pnand %p3002_p6, %p35_p4  ;;  %s111_s28 = scalar_lea.sflag [#allocation3], %s3275_s19 }
  0x12   : > { %s3078_s29 = scalar_lea.hbm %s3282_s24, 1024  ;;  %s3083_s4 = scalar_lea.hbm %s5125_s0, 4096 }
  0x13   : > { %p3079_p9 = scmp.ne.s32.totalorder %s3282_s24, %s3078_s29  ;;  %p3080_p10 = pneg %p3286_p8 }
  0x14   : > { %p3084_p13 = scmp.lt.u32.totalorder %s3282_s24, %s5125_s0  ;;  %p3085_p0 = scmp.lt.u32.totalorder %s3083_s4, %s3078_s29 }
  0x15   : > { %p3081_p11 = pnand %p3080_p10, %p3079_p9  ;;  %p3087_p2 = scmp.lt.u32.totalorder %s3078_s29, %s3282_s24 }
  0x16   : > { %p3086_p1 = por %p3085_p0, %p3084_p13 }
  0x17   : > { %p3082_p12 = pneg %p3081_p11 }
  0x18   : > { %p3088_p3 = por %p3087_p2, %p3086_p1 }
  0x1a   : > { %p3089_p4 = pnand %p3088_p3, %p3082_p12 }
  0x1c   : > { %3092 = shalt.err (!%p3089_p4)
}
  0x1d   : > { %s3093_s7 = scalar_lea.vmem %s3284_s26, 1024  ;;  %s3208_s8 = smov [#allocation2]  }
  0x1e   : > { %p3094_p5 = scmp.ne.s32.totalorder %s3284_s26, %s3093_s7  ;;  %s3098_s9 = sshll.u32 %s3208_s8, 4  ;;  %s3099_s9 = int_to_ptr.vmem [resolvable:$false] %s3098_s9 }
  0x1f   : > { %s3100_s15 = scalar_lea.vmem %s3099_s9, 2048  ;;  %p3101_p11 = scmp.lt.s32.totalorder %s3284_s26, %s3099_s9 }
  0x20   : > { %p3096_p6 = pnand %p3094_p5, %p3080_p10  ;;  %p3102_p13 = scmp.lt.s32.totalorder %s3100_s15, %s3093_s7 }
  0x22   : > { %p3097_p9 = pneg %p3096_p6  ;;  %p3103_p0 = por %p3102_p13, %p3101_p11 }
  0x24   : > { %p3104_p1 = pnand %p3103_p0, %p3097_p9 }
  0x26   : > { %3107 = shalt.err (!%p3104_p1)
}
  0x27   : > { %s3209_s16 = smov 2048   ;;  %s3210_s20 = smov 512  }
  0x28   : > { %s3211_s21 = smov 32   ;;  %p2476_p12 = scmp.ge.s32.totalorder %s3206_s12, 1 }
  0x29   : > { %2998 = dma.hbm_to_vmem [thread:$0]  (!%p3286_p8), %s3282_s24, 1024, %s3284_s26, %s111_s28, %s3209_s16, %s3210_s20, %s3211_s21  }
  0x2a   : > { %p150_p2 = scmp.lt.s32.totalorder %s3206_s12, 5  ;;  %s2985_s22 = smul.u32 1152, %s3275_s19 }
  0x2b   : > { %s2588_s25 = smul.u32 18432, %s3206_s12  ;;  %s132_s24 = scalar_lea.sflag [#allocation6], %s3275_s19 }
  0x2c   : > { %p3321_p3 = pnand %p2476_p12, %p150_p2  ;;  %s135_s4 = scalar_lea.vmem [#allocation5], %s2985_s22 }
  0x2d   : > { %s3329_s3 = scalar_lea.hbm %s5126_s1, %s2588_s25  ;;  %s142_s5 = sshll.u32 %s135_s4, 4  ;;  %s3331_s5 = int_to_ptr.vmem [resolvable:$true] %s142_s5 }
  0x2e   : > { %s3108_s26 = scalar_lea.hbm %s3329_s3, 18432  ;;  %s3113_s6 = scalar_lea.hbm %s5126_s1, 73728 }
  0x2f   : > { %p3109_p4 = scmp.ne.s32.totalorder %s3329_s3, %s3108_s26  ;;  %p3114_p9 = scmp.lt.u32.totalorder %s3329_s3, %s5126_s1 }
  0x30   : > { %p3115_p11 = scmp.lt.u32.totalorder %s3113_s6, %s3108_s26  ;;  %p3117_p0 = scmp.lt.u32.totalorder %s3108_s26, %s3329_s3 }
  0x31   : > { %p3111_p5 = pnand %p3109_p4, %p3080_p10 }
  0x32   : > { %p3116_p13 = por %p3115_p11, %p3114_p9 }
  0x33   : > { %p3112_p6 = pneg %p3111_p5 }
  0x34   : > { %p3118_p1 = por %p3117_p0, %p3116_p13 }
  0x36   : > { %p3119_p12 = pnand %p3118_p1, %p3112_p6 }
  0x38   : > { %3122 = shalt.err (!%p3119_p12)
}
  0x39   : > { %s3123_s9 = scalar_lea.vmem %s3331_s5, 18432  ;;  %s3212_s15 = smov [#allocation5]  }
  0x3a   : > { %p3124_p2 = scmp.ne.s32.totalorder %s3331_s5, %s3123_s9  ;;  %s3128_s16 = sshll.u32 %s3212_s15, 4  ;;  %s3129_s16 = int_to_ptr.vmem [resolvable:$false] %s3128_s16 }
  0x3b   : > { %s3130_s20 = scalar_lea.vmem %s3129_s16, 36864  ;;  %p3131_p7 = scmp.lt.s32.totalorder %s3331_s5, %s3129_s16 }
  0x3c   : > { %p3126_p4 = pnand %p3124_p2, %p3080_p10  ;;  %p3132_p9 = scmp.lt.s32.totalorder %s3130_s20, %s3123_s9 }
  0x3e   : > { %p3127_p5 = pneg %p3126_p4  ;;  %p3133_p11 = por %p3132_p9, %p3131_p7 }
  0x40   : > { %p3134_p13 = pnand %p3133_p11, %p3127_p5 }
  0x42   : > { %3137 = shalt.err (!%p3134_p13)
}
  0x43   : > { %s3213_s21 = smov 128   ;;  %s3214_s22 = smov 8  }
  0x44   : > { %3001 = dma.hbm_to_vmem [thread:$0]  (!%p3286_p8), %s3329_s3, 18432, %s3331_s5, %s132_s24, %s3213_s21, %s3213_s21, %s3214_s22  }
  0x45   : > { %154 = sbr.rel (%p3321_p3) target bundleno = 681 (0x2a9), region = 28 }
  0x4c   : > { %s156_s25 = sand.u32 1, %s3198_s10   ;;  %p5206_p7 = scmp.ne.s32.totalorder %s5203_s18, 0 }
  0x4d   : > { %s2477_s29 = sshll.u32 %s156_s25, 6  ;;  %s157_s30 = scalar_lea.sflag [#allocation3], %s156_s25 }
  0x4e   : > { %s3362_s4 = scalar_lea.vmem [#allocation2], %s2477_s29 }
  0x4f   : > { %3181 = dma.done.wait (%p5206_p7), %s157_s30, 1024  }
  0x50   : > { %3183 = vsyncadd (%p5206_p7), %s157_s30, 4294966272  ;;  %s2986_s26 = smul.u32 1152, %s156_s25  ;;  %s166_s27 = scalar_lea.sflag [#allocation6], %s156_s25 }
  0x52   : > { %s3368_s19 = scalar_lea.vmem [#allocation5], %s2986_s26 }
  0x53   : > { %3185 = dma.done.wait (%p5206_p7), %s166_s27, 18432  }
  0x54   : > { %3187 = vsyncadd (%p5206_p7), %s166_s27, 4294948864  ;;  %p2478_p8 = scmp.ne.s32.totalorder %s3253_s13, 0 }
  0x55   : > { %v3215_v0 = vmov (!%p2478_p8), 0.0  }
  0x56   : > { %196 = sbr.rel (%p2478_p8) target bundleno = 93 (0x5d), region = 40  ;;  %197 = vst [vmem:[#allocation7] sm:$0xff] (!%p2478_p8), %v3215_v0  ;;  %198 = vst [vmem:[#allocation7 + $0x8] sm:$0xff] (!%p2478_p8), %v3215_v0 }
  0x5d PF: > { %v1215_v1 = vld [vmem:[%s3368_s19 + $0x20] sm:$0xff]  ;;  %v1216_v11 = vld [vmem:[%s3368_s19 + $0x28] sm:$0xff]  ;;  %v3388_v17 = vld [vmem:[%s3368_s19 + $0x30] sm:$0xff]  ;;  %s3216_s18 = smov [#allocation7]   ;;  %p3003_p10 = scmp.eq.s32.totalorder %s3253_s13, 3 }
  0x5e   : > { %v1223_v2 = vld [vmem:[%s3368_s19 + $0x60] sm:$0xff]  ;;  %v1363_v4 = vunpack.c.l.s8.bf16 %v1215_v1  ;;  %v1364_v5 = vunpack.c.h.s8.bf16 %v1215_v1  ;;  %v1224_v12 = vld [vmem:[%s3368_s19 + $0x68] sm:$0xff]  ;;  %v1365_v18 = vunpack.c.l.s8.bf16 %v1216_v11  ;;  %v3391_v20 = vld [vmem:[%s3368_s19 + $0x70] sm:$0xff]  ;;  %v1366_v27 = vunpack.c.h.s8.bf16 %v1216_v11  ;;  %s2393_s23 = sshll.u32 %s3216_s18, 4  ;;  %s2394_s23 = int_to_ptr.vmem [resolvable:$true] %s2393_s23 }
  0x5f   : > { %v1211_v3 = vld [vmem:[%s3368_s19] sm:$0xff]  ;;  %v1379_v6 = vunpack.c.l.s8.bf16 %v1223_v2  ;;  %v1380_v7 = vunpack.c.h.s8.bf16 %v1223_v2  ;;  %v3382_v13 = vld [vmem:[%s3368_s19 + $0x8] sm:$0xff]  ;;  %v1381_v19 = vunpack.c.l.s8.bf16 %v1224_v12  ;;  %v3394_v21 = vld [vmem:[%s3368_s19 + $0x10] sm:$0xff]  ;;  %v1382_v28 = vunpack.c.h.s8.bf16 %v1224_v12  ;;  %s3138_s3 = scalar_lea.vmem %s2394_s23, 256  ;;  %p3145_p1 = scmp.lt.s32.totalorder %s2394_s23, %s2394_s23 }
  0x60   : > { %v1219_v8 = vld [vmem:[%s3368_s19 + $0x40] sm:$0xff]  ;;  %v1355_v9 = vunpack.c.l.s8.bf16 %v1211_v3  ;;  %2589 = vmatprep.subr.bf16.mxu0 %v1363_v4  ;;  %v3385_v14 = vld [vmem:[%s3368_s19 + $0x48] sm:$0xff]  ;;  %v1356_v15 = vunpack.c.h.s8.bf16 %v1211_v3  ;;  %v3397_v22 = vld [vmem:[%s3368_s19 + $0x50] sm:$0xff]  ;;  %v1357_v23 = vunpack.c.l.s8.bf16 %v3382_v13  ;;  %v1358_v29 = vunpack.c.h.s8.bf16 %v3382_v13  ;;  %p3139_p3 = scmp.ne.s32.totalorder %s2394_s23, %s3138_s3  ;;  %p3146_p12 = scmp.lt.s32.totalorder %s3138_s3, %s3138_s3 }
  0x61   : > { %v1371_v10 = vunpack.c.l.s8.bf16 %v1219_v8  ;;  %2611 = vmatprep.subr.bf16.mxu1 %v1379_v6  ;;  %v1372_v16 = vunpack.c.h.s8.bf16 %v1219_v8  ;;  %v1373_v24 = vunpack.c.l.s8.bf16 %v3385_v14  ;;  %v3402_v25 = vld [vmem:[%s3362_s4 + $0x8] sm:$0xff]  ;;  %v1374_v30 = vunpack.c.h.s8.bf16 %v3385_v14  ;;  %v3410_v31 = vld [vmem:[%s3362_s4 + $0x18] sm:$0xff]  ;;  %v3423_v38 = vld [vmem:[%s3362_s4] sm:$0xff] }
  0x62   : > { %2590 = vmatpush3.bf16.msra.mxu0 %v1355_v9  ;;  %v3405_v26 = vld [vmem:[%s3362_s4 + $0x28] sm:$0xff]  ;;  %v3413_v32 = vld [vmem:[%s3362_s4 + $0x38] sm:$0xff]  ;;  %v1367_v33 = vunpack.c.l.s8.bf16 %v3388_v17  ;;  %v1383_v34 = vunpack.c.l.s8.bf16 %v3391_v20  ;;  %v1359_v35 = vunpack.c.l.s8.bf16 %v3394_v21  ;;  %v1375_v36 = vunpack.c.l.s8.bf16 %v3397_v22  ;;  %v3426_v39 = vld [vmem:[%s3362_s4 + $0x20] sm:$0xff]  ;;  %p3140_p6 = pnand %p3139_p3, %p3003_p10  ;;  %p3147_p2 = por %p3146_p12, %p3145_p1 }
  0x63   : > { %2612 = vmatpush3.bf16.msra.mxu1 %v1371_v10  ;;  %2591 = vmatprep.subr.bf16.mxu0 %v1364_v5  ;;  %v3420_v37 = vld [vmem:[%s3368_s19 + $0x38] sm:$0xff]  ;;  %v1368_v40 = vunpack.c.h.s8.bf16 %v3388_v17  ;;  %v2480_v41 = vmul.f32 -1.442695, %v3402_v25  ;;  %v2484_v42 = vmul.f32 -1.442695, %v3405_v26  ;;  %v1384_v44 = vunpack.c.h.s8.bf16 %v3391_v20  ;;  %v3453_v60 = vld [vmem:[%s3362_s4 + $0x10] sm:$0xff] }
  0x64   : > { %2613 = vmatprep.subr.bf16.mxu1 %v1380_v7  ;;  %v2488_v43 = vadd.f32 2.2, %v3402_v25  ;;  %v2492_v45 = vadd.f32 2.2, %v3405_v26  ;;  %v2482_v46 = vmul.f32 -1.442695, %v3410_v31  ;;  %v1360_v48 = vunpack.c.h.s8.bf16 %v3394_v21  ;;  %p3141_p0 = pneg %p3140_p6 }
  0x65   : > { %v2486_v47 = vmul.f32 -1.442695, %v3413_v32  ;;  %3046 = vpow2.f32 %v2480_v41  ;;  %v2490_v49 = vadd.f32 2.2, %v3410_v31  ;;  %v2494_v50 = vadd.f32 2.2, %v3413_v32 }
  0x66   : > { %2592 = vmatpush3.bf16.msra.mxu0 %v1356_v15  ;;  %v1376_v51 = vunpack.c.h.s8.bf16 %v3397_v22  ;;  %v3441_v52 = vld [vmem:[%s3368_s19 + $0x78] sm:$0xff]  ;;  %3048 = vpow2.f32 %v2484_v42  ;;  %v2479_v54 = vmul.f32 -1.442695, %v3423_v38  ;;  %v2483_v55 = vmul.f32 -1.442695, %v3426_v39  ;;  %v3458_v0 = vld [vmem:[%s3362_s4 + $0x30] sm:$0xff]  ;;  %p3148_p4 = pnand %p3147_p2, %p3141_p0 }
  0x67   : > { %2614 = vmatpush3.bf16.msra.mxu1 %v1372_v16  ;;  %2593 = vmatprep.subr.bf16.mxu0 %v1365_v18  ;;  %v3444_v53 = vld [vmem:[%s3368_s19 + $0x18] sm:$0xff]  ;;  %v1369_v56 = vunpack.c.l.s8.bf16 %v3420_v37  ;;  %v272_v58 = vmul.f32 2.5, %v2488_v43  ;;  %v276_v59 = vmul.f32 2.5, %v2492_v45  ;;  %3050 = vpow2.f32 %v2482_v46  ;;  %v3465_v7 = vld [vmem:[%s3368_s19 + $0xa0] sm:$0xff]  ;;  %v3518_v22 = vld [vmem:[%s3368_s19 + $0xe8] sm:$0xff] }
  0x68   : > { %2615 = vmatprep.subr.bf16.mxu1 %v1381_v19  ;;  %v3450_v57 = vld [vmem:[%s3368_s19 + $0x58] sm:$0xff]  ;;  %3052 = vpow2.f32 %v2486_v47  ;;  %v274_v61 = vmul.f32 2.5, %v2490_v49  ;;  %v2487_v62 = vadd.f32 2.2, %v3423_v38  ;;  %v2491_v63 = vadd.f32 2.2, %v3426_v39 }
  0x69   : > { %v1385_v1 = vunpack.c.l.s8.bf16 %v3441_v52  ;;  %v1361_v2 = vunpack.c.l.s8.bf16 %v3444_v53  ;;  %v278_v3 = vmul.f32 2.5, %v2494_v50  ;;  %3054 = vpow2.f32 %v2479_v54  ;;  %v3468_v8 = vld [vmem:[%s3368_s19 + $0xe0] sm:$0xff] }
  0x6a   : > { %2594 = vmatpush3.bf16.msra.mxu0 %v1357_v23  ;;  %v1377_v4 = vunpack.c.l.s8.bf16 %v3450_v57  ;;  %v1370_v5 = vunpack.c.h.s8.bf16 %v3420_v37  ;;  %3056 = vpow2.f32 %v2483_v55  ;;  %v271_v6 = vmul.f32 2.5, %v2487_v62  ;;  %v3515_v62 = vld [vmem:[%s3368_s19 + $0xa8] sm:$0xff] }
  0x6b   : > { %2616 = vmatpush3.bf16.msra.mxu1 %v1373_v24  ;;  %2595 = vmatprep.subr.bf16.mxu0 %v1366_v27  ;;  %v280_v9 = vmax.f32 %v272_v58, 0.0  ;;  %v275_v10 = vmul.f32 2.5, %v2491_v63  ;;  %v2481_v11 = vmul.f32 -1.442695, %v3453_v60  ;;  %v2485_v12 = vmul.f32 -1.442695, %v3458_v0 }
  0x6c   : > { %2617 = vmatprep.subr.bf16.mxu1 %v1382_v28  ;;  %v284_v13 = vmax.f32 %v276_v59, 0.0  ;;  %v282_v14 = vmax.f32 %v274_v61, 0.0  ;;  %v2489_v15 = vadd.f32 2.2, %v3453_v60  ;;  %v2493_v16 = vadd.f32 2.2, %v3458_v0 }
  0x6d   : > { %v1386_v18 = vunpack.c.h.s8.bf16 %v3441_v52  ;;  %v1362_v19 = vunpack.c.h.s8.bf16 %v3444_v53  ;;  %v286_v23 = vmax.f32 %v278_v3, 0.0  ;;  %3058 = vpow2.f32 %v2481_v11 }
  0x6e   : > { %2596 = vmatpush3.bf16.msra.mxu0 %v1358_v29  ;;  %v1378_v24 = vunpack.c.h.s8.bf16 %v3450_v57  ;;  %v279_v27 = vmax.f32 %v271_v6, 0.0  ;;  %3060 = vpow2.f32 %v2485_v12  ;;  %v1395_v28 = vunpack.c.l.s8.bf16 %v3465_v7  ;;  %v3483_v29 = vld [vmem:[%s3368_s19 + $0x80] sm:$0xff] }
  0x6f   : > { %2618 = vmatpush3.bf16.msra.mxu1 %v1374_v30  ;;  %2597 = vmatprep.subr.bf16.mxu0 %v1367_v33  ;;  %v3486_v30 = vld [vmem:[%s3368_s19 + $0xc0] sm:$0xff]  ;;  %v3047_v33 = vpop.eup %3046  ;;  %v1411_v41 = vunpack.c.l.s8.bf16 %v3468_v8  ;;  %v3495_v45 = vmin.f32 %v284_v13, 11.0  ;;  %v3497_v46 = vmin.f32 %v282_v14, 11.0  ;;  %v277_v47 = vmul.f32 2.5, %v2493_v16  ;;  %v3540_v16 = vld [vmem:[%s3368_s19 + $0xf0] sm:$0xff] }
  0x70   : > { %2619 = vmatprep.subr.bf16.mxu1 %v1383_v34  ;;  %v3492_v34 = vmin.f32 %v280_v9, 11.0  ;;  %v3049_v42 = vpop.eup %3048  ;;  %v232_v43 = vadd.f32 1.0, %v3047_v33  ;;  %v3499_v17 = vmin.f32 %v286_v23, 11.0  ;;  %v1387_v20 = vunpack.c.l.s8.bf16 %v3483_v29  ;;  %v3551_v33 = vld [vmem:[%s3368_s19 + $0x90] sm:$0xff] }
  0x71   : > { %v3051_v49 = vpop.eup %3050  ;;  %v236_v50 = vadd.f32 1.0, %v3049_v42  ;;  %v3507_v55 = vmin.f32 %v279_v27, 11.0  ;;  %v1396_v58 = vunpack.c.h.s8.bf16 %v3465_v7  ;;  %v285_v6 = vmax.f32 %v277_v47, 0.0 }
  0x72   : > { %2598 = vmatpush3.bf16.msra.mxu0 %v1359_v35  ;;  %v283_v35 = vmax.f32 %v275_v10, 0.0  ;;  %3062 = vrcp.f32 %v232_v43  ;;  %v234_v54 = vadd.f32 1.0, %v3051_v49  ;;  %v1388_v10 = vunpack.c.h.s8.bf16 %v3483_v29 }
  0x73   : > { %2620 = vmatpush3.bf16.msra.mxu1 %v1375_v36  ;;  %2599 = vmatprep.subr.bf16.mxu0 %v1368_v40  ;;  %v273_v36 = vmul.f32 2.5, %v2489_v15  ;;  %v1403_v40 = vunpack.c.l.s8.bf16 %v3486_v30  ;;  %3064 = vrcp.f32 %v236_v50  ;;  %v1404_v11 = vunpack.c.h.s8.bf16 %v3486_v30  ;;  %v3537_v15 = vld [vmem:[%s3368_s19 + $0xb0] sm:$0xff] }
  0x74   : > { %2621 = vmatprep.subr.bf16.mxu1 %v1384_v44  ;;  %v3053_v44 = vpop.eup %3052  ;;  %v3512_v21 = vmin.f32 %v283_v35, 11.0  ;;  %3066 = vrcp.f32 %v234_v54  ;;  %v1397_v12 = vunpack.c.l.s8.bf16 %v3515_v62  ;;  %v3554_v35 = vld [vmem:[%s3368_s19 + $0xd0] sm:$0xff]  ;;  %v3556_v43 = vmin.f32 %v285_v6, 11.0 }
  0x75   : > { %v3055_v59 = vpop.eup %3054  ;;  %v238_v61 = vadd.f32 1.0, %v3053_v44  ;;  %v296_v54 = vmax.f32 %v3492_v34, 0.0  ;;  %v300_v53 = vmax.f32 %v3495_v45, 0.0  ;;  %v2500_v57 = vadd.f32 -1.0, %v3495_v45 }
  0x76   : > { %2600 = vmatpush3.bf16.msra.mxu0 %v1360_v48  ;;  %5207 = vst [vmem:[#allocation11_spill] sm:$0xff] %v3512_v21  ;;  %v281_v48 = vmax.f32 %v273_v36, 0.0  ;;  %v3057_v63 = vpop.eup %3056  ;;  %v231_v3 = vadd.f32 1.0, %v3055_v59  ;;  %5208 = vst [vmem:[#allocation12_spill] sm:$0xff] %v3556_v43  ;;  %v302_v29 = vmax.f32 %v3499_v17, 0.0  ;;  %v1400_v30 = vunpack.c.h.s8.bf16 %v3537_v15 }
  0x77   : > { %2622 = vmatpush3.bf16.msra.mxu1 %v1376_v51  ;;  %2601 = vmatprep.subr.bf16.mxu0 %v1369_v56  ;;  %v3521_v51 = vld [vmem:[%s3368_s19 + $0x88] sm:$0xff]  ;;  %v1412_v56 = vunpack.c.h.s8.bf16 %v3468_v8  ;;  %3068 = vrcp.f32 %v238_v61  ;;  %v235_v9 = vadd.f32 1.0, %v3057_v63  ;;  %v3059_v23 = vpop.eup %3058  ;;  %v304_v59 = vmul.f32 %v296_v54, %v296_v54 }
  0x78   : > { %2623 = vmatprep.subr.bf16.mxu1 %v1385_v1  ;;  %v3525_v1 = vld [vmem:[%s3368_s19 + $0xc8] sm:$0xff]  ;;  %3070 = vrcp.f32 %v231_v3  ;;  %v1389_v14 = vunpack.c.l.s8.bf16 %v3521_v51  ;;  %v3061_v36 = vpop.eup %3060  ;;  %v233_v42 = vadd.f32 1.0, %v3059_v23  ;;  %v2504_v61 = vadd.f32 -2.0, %v3492_v34 }
  0x79   : > { %3072 = vrcp.f32 %v235_v9  ;;  %v2512_v63 = vadd.f32 -3.0, %v3492_v34  ;;  %v308_v6 = vmul.f32 %v300_v53, %v300_v53  ;;  %v2502_v8 = vadd.f32 -1.0, %v3499_v17 }
  0x7a   : > { %2602 = vmatpush3.bf16.msra.mxu0 %v1361_v2  ;;  %v3546_v2 = vmin.f32 %v281_v48, 11.0  ;;  %3074 = vrcp.f32 %v233_v42  ;;  %v2508_v48 = vadd.f32 -2.0, %v3495_v45  ;;  %v312_v42 = vmul.f32 %v304_v59, %v296_v54 }
  0x7b   : > { %2624 = vmatpush3.bf16.msra.mxu1 %v1377_v4  ;;  %2603 = vmatprep.subr.bf16.mxu0 %v1370_v5  ;;  %v237_v5 = vadd.f32 1.0, %v3061_v36  ;;  %v316_v47 = vmul.f32 %v308_v6, %v300_v53 }
  0x7c   : > { %2625 = vmatprep.subr.bf16.mxu1 %v1386_v18  ;;  %v364_v44 = vmax.f32 %v2508_v48, 0.0 }
  0x7d   : > { %3076 = vrcp.f32 %v237_v5  ;;  %v360_v5 = vmax.f32 %v2504_v61, 0.0 }
  0x7e   : > { %2604 = vmatpush3.bf16.msra.mxu0 %v1362_v19  ;;  %v2496_v19 = vadd.f32 -1.0, %v3492_v34  ;;  %v372_v54 = vmul.f32 %v364_v44, %v364_v44 }
  0x7f   : > { %2626 = vmatpush3.bf16.msra.mxu1 %v1378_v24  ;;  %2633 = vmatprep.subr.bf16.mxu0 %v1395_v28  ;;  %v3063_v24 = vpop.eup %3062 }
  0x80   : > { %2655 = vmatprep.subr.bf16.mxu1 %v1411_v41  ;;  %v3065_v3 = vpop.eup %3064  ;;  %v256_v28 = vmul.f32 %v3063_v24, %v3402_v25  ;;  %v328_v9 = vmax.f32 %v2496_v19, 0.0  ;;  %v332_v41 = vmax.f32 %v2500_v57, 0.0  ;;  %v368_v24 = vmul.f32 %v360_v5, %v360_v5 }
  0x81   : > { %v3067_v23 = vpop.eup %3066  ;;  %v260_v36 = vmul.f32 %v3065_v3, %v3405_v26 }
  0x82   : > { %v3069_v49 = vpop.eup %3068  ;;  %v1104_v50 = vmul.f32 0.109194845, %v256_v28  ;;  %v258_v18 = vmul.f32 %v3067_v23, %v3410_v31  ;;  %v336_v37 = vmul.f32 %v328_v9, %v328_v9  ;;  %v340_v25 = vmul.f32 %v332_v41, %v332_v41 }
  0x83   : > { %v3071_v52 = vpop.eup %3070  ;;  %v1108_v4 = vmul.f32 0.109194845, %v260_v36  ;;  %v262_v27 = vmul.f32 %v3069_v49, %v3413_v32  ;;  %v3590_v3 = vmul.f32 %v368_v24, %v360_v5  ;;  %v3592_v28 = vmul.f32 %v372_v54, %v364_v44 }
  0x84   : > { %v3073_v19 = vpop.eup %3072  ;;  %v1106_v57 = vmul.f32 0.109194845, %v258_v18  ;;  %v255_v13 = vmul.f32 %v3071_v52, %v3423_v38  ;;  %v3585_v26 = vmul.f32 %v336_v37, %v328_v9  ;;  %v3588_v31 = vmul.f32 %v340_v25, %v332_v41 }
  0x85   : > { %v1112_v59 = vpack.c.bf16 %v1108_v4, %v1104_v50  ;;  %v1110_v61 = vmul.f32 0.109194845, %v262_v27  ;;  %v259_v48 = vmul.f32 %v3073_v19, %v3426_v39  ;;  %v2516_v32 = vadd.f32 -3.0, %v3495_v45  ;;  %v3075_v49 = vpop.eup %3074 }
  0x86   : > { %v1103_v53 = vmul.f32 0.109194845, %v255_v13  ;;  %v392_v37 = vmax.f32 %v2512_v63, 0.0  ;;  %v2520_v52 = vadd.f32 -4.0, %v3492_v34  ;;  %v257_v27 = vmul.f32 %v3075_v49, %v3453_v60 }
  0x87   : > { %1677 = vmatprep.mubr.bf16.mxu0 %v1112_v59  ;;  %v1114_v18 = vpack.c.bf16 %v1110_v61, %v1106_v57  ;;  %v1107_v38 = vmul.f32 0.109194845, %v259_v48  ;;  %v3077_v4 = vpop.eup %3076  ;;  %v396_v39 = vmax.f32 %v2516_v32, 0.0  ;;  %v2524_v50 = vadd.f32 -4.0, %v3495_v45 }
  0x88   : > { %v2528_v13 = vadd.f32 -5.0, %v3492_v34  ;;  %v261_v6 = vmul.f32 %v3077_v4, %v3458_v0  ;;  %v400_v9 = vmul.f32 %v392_v37, %v392_v37  ;;  %v424_v41 = vmax.f32 %v2520_v52, 0.0 }
  0x89   : > { %1718 = vmatprep.mubr.bf16.mxu1 %v1114_v18  ;;  %v1111_v44 = vpack.c.bf16 %v1107_v38, %v1103_v53  ;;  %v1105_v23 = vmul.f32 0.109194845, %v257_v27  ;;  %v404_v36 = vmul.f32 %v396_v39, %v396_v39  ;;  %v428_v5 = vmax.f32 %v2524_v50, 0.0 }
  0x8a   : > { %v2532_v63 = vadd.f32 -5.0, %v3495_v45  ;;  %v1109_v25 = vmul.f32 0.109194845, %v261_v6  ;;  %v3601_v24 = vmul.f32 %v400_v9, %v392_v37  ;;  %v432_v60 = vmul.f32 %v424_v41, %v424_v41 }
  0x8b   : > { %1678 = vmatmul.mubr.bf16.vlgmr.msra.gmra.mrb[0].mxu0 %v1111_v44  ;;  %v456_v19 = vmax.f32 %v2528_v13, 0.0  ;;  %v3605_v57 = vmul.f32 %v404_v36, %v396_v39  ;;  %v436_v54 = vmul.f32 %v428_v5, %v428_v5  ;;  %v672_v59 = vmul.f32 0.16666667, %v312_v42 }
  0x8c   : > { %5209 = vst [vmem:[#allocation13_spill] sm:$0xff] %v3601_v24  ;;  %2634 = vmatpush3.bf16.msra.mxu0 %v1387_v20  ;;  %v460_v0 = vmax.f32 %v2532_v63, 0.0  ;;  %v1113_v61 = vpack.c.bf16 %v1109_v25, %v1105_v23  ;;  %v3609_v48 = vmul.f32 %v432_v60, %v424_v41  ;;  %v676_v32 = vmul.f32 0.16666667, %v316_v47 }
  0x8d   : > { %5210 = vst [vmem:[#allocation14_spill] sm:$0xff] %v3605_v57  ;;  %2635 = vmatprep.subr.bf16.mxu0 %v1396_v58  ;;  %v464_v53 = vmul.f32 %v456_v19, %v456_v19  ;;  %v3611_v49 = vmul.f32 %v436_v54, %v428_v5  ;;  %v680_v38 = vmul.f32 -0.6666667, %v3585_v26  ;;  %v684_v20 = vmul.f32 -0.6666667, %v3588_v31 }
  0x8e   : > { %v468_v18 = vmul.f32 %v460_v0, %v460_v0  ;;  %1719 = vmatmul.mubr.bf16.vlgmr.msra.gmra.mrb[0].mxu1 %v1113_v61  ;;  %v3618_v42 = vmul.f32 -0.6666667, %v3601_v24  ;;  %v3621_v7 = vmul.f32 -0.6666667, %v3605_v57  ;;  %v720_v58 = vmul.f32 0.16666667, %v3609_v48 }
  0x8f   : > { %v3615_v37 = vmul.f32 %v464_v53, %v456_v19  ;;  %2656 = vmatpush3.bf16.msra.mxu1 %v1403_v40  ;;  %v688_v52 = vadd.f32 %v680_v38, %v672_v59  ;;  %v692_v4 = vadd.f32 %v684_v20, %v676_v32  ;;  %v724_v27 = vmul.f32 0.16666667, %v3611_v49 }
  0x90   : > { %5212 = vst [vmem:[#allocation16_spill] sm:$0xff] %v3618_v42  ;;  %5213 = vst [vmem:[#allocation17_spill] sm:$0xff] %v3621_v7  ;;  %2636 = vmatpush3.bf16.msra.mxu0 %v1388_v10  ;;  %v3628_v47 = vmul.f32 %v468_v18, %v460_v0  ;;  %2657 = vmatprep.subr.bf16.mxu1 %v1412_v56  ;;  %v298_v40 = vmax.f32 %v3497_v46, 0.0  ;;  %v2498_v10 = vadd.f32 -1.0, %v3497_v46  ;;  %v334_v5 = vmax.f32 %v2502_v8, 0.0 }
  0x91   : > { %5211 = vst [vmem:[#allocation15_spill] sm:$0xff] %v3615_v37  ;;  %2637 = vmatprep.subr.bf16.mxu0 %v1397_v12  ;;  %v3636_v39 = vmul.f32 -0.6666667, %v3615_v37  ;;  %v696_v50 = vadd.f32 %v688_v52, %v3590_v3  ;;  %v700_v13 = vadd.f32 %v692_v4, %v3592_v28  ;;  %v310_v6 = vmul.f32 %v302_v29, %v302_v29 }
  0x92   : > { %5214 = vst [vmem:[#allocation18_spill] sm:$0xff] %v3628_v47  ;;  %v3644_v44 = vmul.f32 -0.6666667, %v3628_v47  ;;  %v306_v12 = vmul.f32 %v298_v40, %v298_v40  ;;  %v330_v9 = vmax.f32 %v2498_v10, 0.0  ;;  %v5219_v63 = vunpack.c.l.s8.bf16 %v3518_v22  ;;  %v3678_v10 = vld [vmem:[%s3368_s19 + $0xb8] sm:$0xff] }
  0x93   : > { %5215 = vst [vmem:[#allocation19_spill] sm:$0xff] %v3636_v39  ;;  %v3648_v56 = vadd.f32 %v3636_v39, %v720_v58  ;;  %2658 = vmatpush3.bf16.msra.mxu1 %v1404_v11  ;;  %v712_v41 = vadd.f32 %v3618_v42, %v696_v50  ;;  %v716_v23 = vadd.f32 %v3621_v7, %v700_v13  ;;  %v5220_v25 = vunpack.c.h.s8.bf16 %v3515_v62 }
  0x94   : > { %5216 = vst [vmem:[#allocation20_spill] sm:$0xff] %v3644_v44  ;;  %2638 = vmatpush3.bf16.msra.mxu0 %v1389_v14  ;;  %v3657_v36 = vadd.f32 %v3644_v44, %v724_v27  ;;  %2659 = vmatprep.subr.bf16.mxu1 %v5219_v63  ;;  %v1416_v11 = vunpack.c.h.s8.bf16 %v3540_v16  ;;  %v338_v60 = vmul.f32 %v330_v9, %v330_v9  ;;  %v2506_v14 = vadd.f32 -2.0, %v3497_v46 }
  0x95   : > { %5217 = vst [vmem:[#allocation21_spill] sm:$0xff] %v3648_v56  ;;  %2639 = vmatprep.subr.bf16.mxu0 %v5220_v25  ;;  %v728_v19 = vadd.f32 %v720_v58, %v712_v41  ;;  %v732_v54 = vadd.f32 %v724_v27, %v716_v23  ;;  %v342_v0 = vmul.f32 %v334_v5, %v334_v5  ;;  %v2510_v59 = vadd.f32 -2.0, %v3499_v17 }
  0x96   : > { %5218 = vst [vmem:[#allocation22_spill] sm:$0xff] %v3657_v36  ;;  %v314_v61 = vmul.f32 %v306_v12, %v298_v40  ;;  %v362_v53 = vmax.f32 %v2506_v14, 0.0  ;;  %v2514_v32 = vadd.f32 -3.0, %v3497_v46  ;;  %v2518_v62 = vadd.f32 -3.0, %v3499_v17 }
  0x97   : > { %v5221_v18 = vunpack.c.l.s8.bf16 %v3525_v1  ;;  %v5222_v38 = vunpack.c.h.s8.bf16 %v3521_v51  ;;  %v1116_v20 = vmul.f32 0.00064378115, %v728_v19  ;;  %v1120_v58 = vmul.f32 0.00064378115, %v732_v54 }
  0x98   : > { %v318_v52 = vmul.f32 %v310_v6, %v302_v29  ;;  %v366_v4 = vmax.f32 %v2510_v59, 0.0  ;;  %v5223_v27 = vunpack.c.h.s8.bf16 %v3518_v22  ;;  %v5224_v40 = vunpack.c.l.s8.bf16 %v3537_v15  ;;  %v3687_v22 = vld [vmem:[%s3368_s19 + $0xf8] sm:$0xff] }
  0x99   : > { %2660 = vmatpush3.bf16.msra.mxu1 %v5221_v18  ;;  %2640 = vmatpush3.bf16.msra.mxu0 %v5222_v38  ;;  %v3680_v50 = vmul.f32 %v338_v60, %v330_v9  ;;  %v394_v13 = vmax.f32 %v2514_v32, 0.0  ;;  %v398_v8 = vmax.f32 %v2518_v62, 0.0  ;;  %v2522_v51 = vadd.f32 -4.0, %v3497_v46  ;;  %v1230_v59 = vld [vmem:[%s3368_s19 + $0x98] sm:$0xff] }
  0x9a   : > { %2661 = vmatprep.subr.bf16.mxu1 %v5223_v27  ;;  %2641 = vmatprep.subr.bf16.mxu0 %v5224_v40  ;;  %v1124_v12 = vpack.c.bf16 %v1120_v58, %v1116_v20  ;;  %v3683_v41 = vmul.f32 %v342_v0, %v334_v5  ;;  %v370_v29 = vmul.f32 %v362_v53, %v362_v53  ;;  %v2526_v6 = vadd.f32 -4.0, %v3499_v17  ;;  %v3707_v27 = vld [vmem:[%s3368_s19 + $0xd8] sm:$0xff] }
  0x9b   : > { %v374_v23 = vmul.f32 %v366_v4, %v366_v4  ;;  %v402_v15 = vmul.f32 %v394_v13, %v394_v13  ;;  %v406_v63 = vmul.f32 %v398_v8, %v398_v8  ;;  %v426_v25 = vmax.f32 %v2522_v51, 0.0 }
  0x9c   : > { %v5225_v9 = vunpack.c.h.s8.bf16 %v3525_v1  ;;  %v5226_v60 = vunpack.c.l.s8.bf16 %v3551_v33  ;;  %v1392_v14 = vunpack.c.h.s8.bf16 %v3551_v33  ;;  %v1408_v5 = vunpack.c.h.s8.bf16 %v3554_v35  ;;  %1759 = vmatprep.mubr.bf16.mxu0 %v1124_v12 }
  0x9d   : > { %v1401_v19 = vunpack.c.l.s8.bf16 %v3678_v10  ;;  %v430_v54 = vmax.f32 %v2526_v6, 0.0  ;;  %v5227_v0 = vunpack.c.l.s8.bf16 %v3540_v16  ;;  %v3699_v32 = vmul.f32 %v402_v15, %v394_v13 }
  0x9e   : > { %2662 = vmatpush3.bf16.msra.mxu1 %v5225_v9  ;;  %2642 = vmatpush3.bf16.msra.mxu0 %v5226_v60  ;;  %v3701_v1 = vmul.f32 %v406_v63, %v398_v8  ;;  %v434_v62 = vmul.f32 %v426_v25, %v426_v25  ;;  %v674_v18 = vmul.f32 0.16666667, %v314_v61  ;;  %v1417_v38 = vunpack.c.l.s8.bf16 %v3687_v22 }
  0x9f   : > { %2663 = vmatprep.subr.bf16.mxu1 %v5227_v0  ;;  %2643 = vmatprep.subr.bf16.mxu0 %v1400_v30  ;;  %5228 = vst [vmem:[#allocation23_spill] sm:$0xff] %v3699_v32  ;;  %v3704_v33 = vmul.f32 %v370_v29, %v362_v53  ;;  %v438_v20 = vmul.f32 %v430_v54, %v430_v54  ;;  %v678_v58 = vmul.f32 0.16666667, %v318_v52  ;;  %v682_v30 = vmul.f32 -0.6666667, %v3680_v50 }
  0xa0   : > { %5229 = vst [vmem:[#allocation24_spill] sm:$0xff] %v3701_v1  ;;  %v3709_v40 = vmul.f32 %v374_v23, %v366_v4  ;;  %v3711_v16 = vmul.f32 %v434_v62, %v426_v25  ;;  %v686_v13 = vmul.f32 -0.6666667, %v3683_v41  ;;  %v5230_v8 = vunpack.c.l.s8.bf16 %v3554_v35 }
  0xa1   : > { %v1393_v61 = vunpack.c.l.s8.bf16 %v1230_v59  ;;  %v1402_v53 = vunpack.c.h.s8.bf16 %v3678_v10  ;;  %v3718_v51 = vmul.f32 %v438_v20, %v430_v54  ;;  %v3721_v52 = vmul.f32 -0.6666667, %v3699_v32 }
  0xa2   : > { %2664 = vmatpush3.bf16.msra.mxu1 %v5230_v8  ;;  %2644 = vmatpush3.bf16.msra.mxu0 %v1392_v14  ;;  %v690_v4 = vadd.f32 %v682_v30, %v674_v18  ;;  %v694_v12 = vadd.f32 %v686_v13, %v678_v58  ;;  %v3724_v29 = vmul.f32 -0.6666667, %v3701_v1  ;;  %v295_v6 = vmax.f32 %v3507_v55, 0.0 }
  0xa3   : > { %5231 = vst [vmem:[#allocation25_spill] sm:$0xff] %v3721_v52  ;;  %2665 = vmatprep.subr.bf16.mxu1 %v1416_v11  ;;  %2645 = vmatprep.subr.bf16.mxu0 %v1401_v19  ;;  %v1409_v35 = vunpack.c.l.s8.bf16 %v3707_v27  ;;  %v3729_v23 = vmul.f32 0.16666667, %v3711_v16  ;;  %v3732_v10 = vmul.f32 0.16666667, %v3718_v51  ;;  %v299_v15 = vmax.f32 %v3512_v21, 0.0 }
  0xa4   : > { %5232 = vst [vmem:[#allocation26_spill] sm:$0xff] %v3724_v29  ;;  %v698_v11 = vadd.f32 %v690_v4, %v3704_v33  ;;  %v702_v63 = vadd.f32 %v694_v12, %v3709_v40  ;;  %v303_v25 = vmul.f32 %v295_v6, %v295_v6  ;;  %v2495_v9 = vadd.f32 -1.0, %v3507_v55 }
  0xa5   : > { %v1418_v60 = vunpack.c.h.s8.bf16 %v3687_v22  ;;  %v1394_v14 = vunpack.c.h.s8.bf16 %v1230_v59  ;;  %v307_v19 = vmul.f32 %v299_v15, %v299_v15  ;;  %v2499_v54 = vadd.f32 -1.0, %v3512_v21 }
  0xa6   : > { %2666 = vmatpush3.bf16.msra.mxu1 %v1408_v5  ;;  %2646 = vmatpush3.bf16.msra.mxu0 %v1393_v61  ;;  %v1410_v0 = vunpack.c.h.s8.bf16 %v3707_v27  ;;  %v714_v62 = vadd.f32 %v3721_v52, %v698_v11  ;;  %v718_v18 = vadd.f32 %v3724_v29, %v702_v63  ;;  %v327_v20 = vmax.f32 %v2495_v9, 0.0 }
  0xa7   : > { %2667 = vmatprep.subr.bf16.mxu1 %v1417_v38  ;;  %2647 = vmatprep.subr.bf16.mxu0 %v1402_v53  ;;  %v311_v58 = vmul.f32 %v303_v25, %v295_v6  ;;  %v315_v30 = vmul.f32 %v307_v19, %v299_v15  ;;  %v331_v13 = vmax.f32 %v2499_v54, 0.0  ;;  %v2503_v5 = vadd.f32 -2.0, %v3507_v55 }
  0xa8   : > { %v730_v22 = vadd.f32 %v3729_v23, %v714_v62  ;;  %v734_v59 = vadd.f32 %v3732_v10, %v718_v18  ;;  %v335_v8 = vmul.f32 %v327_v20, %v327_v20  ;;  %v2507_v38 = vadd.f32 -2.0, %v3512_v21 }
  0xa9   : > { %v339_v27 = vmul.f32 %v331_v13, %v331_v13  ;;  %v359_v61 = vmax.f32 %v2503_v5, 0.0  ;;  %v2511_v53 = vadd.f32 -3.0, %v3507_v55  ;;  %v2515_v4 = vadd.f32 -3.0, %v3512_v21 }
  0xaa   : > { %2668 = vmatpush3.bf16.msra.mxu1 %v1409_v35  ;;  %2648 = vmatpush3.bf16.msra.mxu0 %v1394_v14  ;;  %v1118_v12 = vmul.f32 0.00064378115, %v730_v22  ;;  %v1122_v6 = vmul.f32 0.00064378115, %v734_v59  ;;  %v3749_v15 = vmul.f32 %v335_v8, %v327_v20  ;;  %v363_v11 = vmax.f32 %v2507_v38, 0.0 }
  0xab   : > { %2669 = vmatprep.subr.bf16.mxu1 %v1418_v60  ;;  %v3751_v63 = vmul.f32 %v339_v27, %v331_v13  ;;  %v367_v25 = vmul.f32 %v359_v61, %v359_v61  ;;  %v391_v9 = vmax.f32 %v2511_v53, 0.0  ;;  %v395_v19 = vmax.f32 %v2515_v4, 0.0 }
  0xac   : > { %v1126_v54 = vpack.c.bf16 %v1122_v6, %v1118_v12  ;;  %v371_v35 = vmul.f32 %v363_v11, %v363_v11  ;;  %v2519_v14 = vadd.f32 -4.0, %v3507_v55  ;;  %v2523_v62 = vadd.f32 -4.0, %v3512_v21 }
  0xad   : > { %v3755_v18 = vmul.f32 %v367_v25, %v359_v61  ;;  %v399_v60 = vmul.f32 %v391_v9, %v391_v9  ;;  %v403_v5 = vmul.f32 %v395_v19, %v395_v19  ;;  %v2527_v20 = vadd.f32 -5.0, %v3507_v55 }
  0xae   : > { %2670 = vmatpush3.bf16.msra.mxu1 %v1410_v0  ;;  %1800 = vmatprep.mubr.bf16.mxu1 %v1126_v54  ;;  %v3758_v22 = vmul.f32 %v371_v35, %v363_v11  ;;  %v423_v13 = vmax.f32 %v2519_v14, 0.0  ;;  %v427_v59 = vmax.f32 %v2523_v62, 0.0  ;;  %v2531_v8 = vadd.f32 -5.0, %v3512_v21 }
  0xaf   : > { %v3761_v38 = vmul.f32 %v399_v60, %v391_v9  ;;  %v3763_v27 = vmul.f32 %v403_v5, %v395_v19  ;;  %v455_v53 = vmax.f32 %v2527_v20, 0.0  ;;  %v671_v4 = vmul.f32 0.16666667, %v311_v58 }
  0xb0   : > { %v431_v0 = vmul.f32 %v423_v13, %v423_v13  ;;  %v435_v61 = vmul.f32 %v427_v59, %v427_v59  ;;  %v459_v12 = vmax.f32 %v2531_v8, 0.0  ;;  %v675_v6 = vmul.f32 0.16666667, %v315_v30 }
  0xb1   : > { %5233 = vst [vmem:[#allocation27_spill] sm:$0xff] %v3761_v38  ;;  %5234 = vst [vmem:[#allocation28_spill] sm:$0xff] %v3763_v27  ;;  %v463_v25 = vmul.f32 %v455_v53, %v455_v53  ;;  %v679_v36 = vmul.f32 -0.6666667, %v3749_v15  ;;  %v683_v11 = vmul.f32 -0.6666667, %v3751_v63 }
  0xb2   : > { %v3768_v54 = vmul.f32 -0.6666667, %v3761_v38  ;;  %v3770_v35 = vmul.f32 %v431_v0, %v423_v13  ;;  %v3772_v9 = vmul.f32 %v435_v61, %v427_v59  ;;  %v467_v19 = vmul.f32 %v459_v12, %v459_v12 }
  0xb3   : > { %v3775_v14 = vmul.f32 -0.6666667, %v3763_v27  ;;  %v3777_v58 = vmul.f32 %v463_v25, %v455_v53  ;;  %v687_v62 = vadd.f32 %v679_v36, %v671_v4  ;;  %v691_v30 = vadd.f32 %v683_v11, %v675_v6 }
  0xb4   : > { %5235 = vst [vmem:[#allocation29_spill] sm:$0xff] %v3768_v54  ;;  %v297_v60 = vmax.f32 %v3546_v2, 0.0  ;;  %v3780_v5 = vmul.f32 %v467_v19, %v459_v12  ;;  %v719_v20 = vmul.f32 0.16666667, %v3770_v35  ;;  %v723_v8 = vmul.f32 0.16666667, %v3772_v9 }
  0xb5   : > { %5236 = vst [vmem:[#allocation30_spill] sm:$0xff] %v3775_v14  ;;  %5237 = vst [vmem:[#allocation31_spill] sm:$0xff] %v3777_v58  ;;  %v301_v13 = vmax.f32 %v3556_v43, 0.0  ;;  %v695_v59 = vadd.f32 %v687_v62, %v3755_v18  ;;  %v699_v0 = vadd.f32 %v691_v30, %v3758_v22  ;;  %v3788_v61 = vmul.f32 -0.6666667, %v3777_v58 }
  0xb6   : > { %5238 = vst [vmem:[#allocation32_spill] sm:$0xff] %v3780_v5  ;;  %v305_v53 = vmul.f32 %v297_v60, %v297_v60  ;;  %v2530_v36 = vadd.f32 -5.0, %v3497_v46  ;;  %v3792_v4 = vmul.f32 -0.6666667, %v3780_v5  ;;  %v2497_v12 = vadd.f32 -1.0, %v3546_v2 }
  0xb7   : > { %5239 = vst [vmem:[#allocation33_spill] sm:$0xff] %v3788_v61  ;;  %v2501_v6 = vadd.f32 -1.0, %v3556_v43  ;;  %v711_v25 = vadd.f32 %v3768_v54, %v695_v59  ;;  %v715_v11 = vadd.f32 %v3775_v14, %v699_v0  ;;  %v3799_v19 = vadd.f32 %v3788_v61, %v719_v20 }
  0xb8   : > { %5240 = vst [vmem:[#allocation34_spill] sm:$0xff] %v3792_v4  ;;  %v309_v62 = vmul.f32 %v301_v13, %v301_v13  ;;  %v3802_v30 = vadd.f32 %v3792_v4, %v723_v8  ;;  %v313_v56 = vmul.f32 %v305_v53, %v297_v60  ;;  %v329_v29 = vmax.f32 %v2497_v12, 0.0 }
  0xb9   : > { %5241 = vst [vmem:[#allocation35_spill] sm:$0xff] %v3799_v19  ;;  %v333_v44 = vmax.f32 %v2501_v6, 0.0  ;;  %v727_v39 = vadd.f32 %v719_v20, %v711_v25  ;;  %v731_v52 = vadd.f32 %v723_v8, %v715_v11  ;;  %v2505_v7 = vadd.f32 -2.0, %v3546_v2 }
  0xba   : > { %5242 = vst [vmem:[#allocation36_spill] sm:$0xff] %v3802_v30  ;;  %v2509_v42 = vadd.f32 -2.0, %v3556_v43  ;;  %v337_v5 = vmul.f32 %v329_v29, %v329_v29  ;;  %v2513_v0 = vadd.f32 -3.0, %v3546_v2  ;;  %v2517_v61 = vadd.f32 -3.0, %v3556_v43 }
  0xbb   : > { %v341_v59 = vmul.f32 %v333_v44, %v333_v44  ;;  %v1115_v19 = vmul.f32 0.00064378115, %v727_v39  ;;  %v1119_v14 = vmul.f32 0.00064378115, %v731_v52  ;;  %v361_v54 = vmax.f32 %v2505_v7, 0.0 }
  0xbc   : > { %v365_v4 = vmax.f32 %v2509_v42, 0.0  ;;  %v317_v30 = vmul.f32 %v309_v62, %v301_v13  ;;  %v3808_v60 = vmul.f32 %v337_v5, %v329_v29  ;;  %v393_v53 = vmax.f32 %v2513_v0, 0.0 }
  0xbd   : > { %v397_v20 = vmax.f32 %v2517_v61, 0.0  ;;  %v1123_v8 = vpack.c.bf16 %v1119_v14, %v1115_v19  ;;  %v3810_v12 = vmul.f32 %v341_v59, %v333_v44  ;;  %v369_v6 = vmul.f32 %v361_v54, %v361_v54 }
  0xbe   : > { %v2521_v25 = vadd.f32 -4.0, %v3546_v2  ;;  %v373_v11 = vmul.f32 %v365_v4, %v365_v4  ;;  %v401_v27 = vmul.f32 %v393_v53, %v393_v53  ;;  %v2525_v58 = vadd.f32 -4.0, %v3556_v43 }
  0xbf   : > { %5243 = vst [vmem:[#allocation37_spill] sm:$0xff] %v3810_v12  ;;  %v405_v21 = vmul.f32 %v397_v20, %v397_v20  ;;  %v2534_v39 = vadd.f32 -5.0, %v3499_v17  ;;  %v458_v7 = vmax.f32 %v2530_v36, 0.0  ;;  %1760 = vmatmul.mubr.bf16.vlgmr.msra.gmra.mrb[4].mxu0 %v1123_v8  ;;  %v2529_v52 = vadd.f32 -5.0, %v3546_v2 }
  0xc0   : > { %v425_v42 = vmax.f32 %v2521_v25, 0.0  ;;  %v3816_v29 = vmul.f32 %v369_v6, %v361_v54  ;;  %v3818_v44 = vmul.f32 %v401_v27, %v393_v53  ;;  %v429_v5 = vmax.f32 %v2525_v58, 0.0  ;;  %v1247_v54 = vld [vmem:[%s3368_s19 + $0x120] sm:$0xff] }
  0xc1   : > { %v3820_v14 = vmul.f32 %v405_v21, %v397_v20  ;;  %v2533_v61 = vadd.f32 -5.0, %v3556_v43  ;;  %v673_v19 = vmul.f32 0.16666667, %v313_v56  ;;  %v677_v62 = vmul.f32 0.16666667, %v317_v30  ;;  %v3829_v6 = vld [vmem:[%s3368_s19 + $0x160] sm:$0xff] }
  0xc2   : > { %5244 = vst [vmem:[#allocation38_spill] sm:$0xff] %v3816_v29  ;;  %5245 = vst [vmem:[#allocation39_spill] sm:$0xff] %v3818_v44  ;;  %v433_v13 = vmul.f32 %v425_v42, %v425_v42  ;;  %v3823_v36 = vmul.f32 %v373_v11, %v365_v4  ;;  %v437_v59 = vmul.f32 %v429_v5, %v429_v5  ;;  %v681_v0 = vmul.f32 -0.6666667, %v3808_v60  ;;  %v1243_v25 = vld [vmem:[%s3368_s19 + $0x100] sm:$0xff] }
  0xc3   : > { %5246 = vst [vmem:[#allocation40_spill] sm:$0xff] %v3820_v14  ;;  %v685_v8 = vmul.f32 -0.6666667, %v3810_v12  ;;  %v462_v27 = vmax.f32 %v2534_v39, 0.0  ;;  %v457_v58 = vmax.f32 %v2529_v52, 0.0  ;;  %v466_v11 = vmul.f32 %v458_v7, %v458_v7 }
  0xc4   : > { %5247 = vst [vmem:[#allocation41_spill] sm:$0xff] %v3823_v36  ;;  %v3831_v21 = vmul.f32 %v433_v13, %v425_v42  ;;  %v3834_v53 = vmul.f32 -0.6666667, %v3818_v44  ;;  %v3836_v56 = vmul.f32 %v437_v59, %v429_v5  ;;  %v689_v30 = vadd.f32 %v681_v0, %v673_v19  ;;  %v1248_v0 = vld [vmem:[%s3368_s19 + $0x128] sm:$0xff] }
  0xc5   : > { %v693_v4 = vadd.f32 %v685_v8, %v677_v62  ;;  %v3839_v20 = vmul.f32 -0.6666667, %v3820_v14  ;;  %v461_v43 = vmax.f32 %v2533_v61, 0.0  ;;  %v1427_v12 = vunpack.c.l.s8.bf16 %v1247_v54 }
  0xc6   : > { %5248 = vst [vmem:[#allocation42_spill] sm:$0xff] %v3831_v21  ;;  %5249 = vst [vmem:[#allocation43_spill] sm:$0xff] %v3834_v53  ;;  %v1443_v39 = vunpack.c.l.s8.bf16 %v3829_v6  ;;  %v697_v42 = vadd.f32 %v689_v30, %v3816_v29  ;;  %v721_v13 = vmul.f32 0.16666667, %v3831_v21  ;;  %v725_v5 = vmul.f32 0.16666667, %v3836_v56 }
  0xc7   : > { %5250 = vst [vmem:[#allocation44_spill] sm:$0xff] %v3836_v56  ;;  %5251 = vst [vmem:[#allocation45_spill] sm:$0xff] %v3839_v20  ;;  %v701_v52 = vadd.f32 %v693_v4, %v3823_v36  ;;  %v470_v19 = vmul.f32 %v462_v27, %v462_v27  ;;  %2677 = vmatprep.subr.bf16.mxu0 %v1427_v12  ;;  %v1419_v62 = vunpack.c.l.s8.bf16 %v1243_v25  ;;  %v1428_v59 = vunpack.c.h.s8.bf16 %v1247_v54  ;;  %v1251_v36 = vld [vmem:[%s3368_s19 + $0x140] sm:$0xff] }
  0xc8   : > { %2699 = vmatprep.subr.bf16.mxu1 %v1443_v39  ;;  %v465_v61 = vmul.f32 %v457_v58, %v457_v58  ;;  %v713_v8 = vadd.f32 %v3834_v53, %v697_v42  ;;  %v469_v30 = vmul.f32 %v461_v43, %v461_v43  ;;  %v1420_v4 = vunpack.c.h.s8.bf16 %v1243_v25  ;;  %v1244_v39 = vld [vmem:[%s3368_s19 + $0x108] sm:$0xff] }
  0xc9   : > { %v717_v14 = vadd.f32 %v3839_v20, %v701_v52  ;;  %2678 = vmatpush3.bf16.msra.mxu0 %v1419_v62  ;;  %v3850_v44 = vmul.f32 %v466_v11, %v458_v7  ;;  %v1429_v12 = vunpack.c.l.s8.bf16 %v1248_v0  ;;  %v3854_v29 = vmul.f32 %v470_v19, %v462_v27 }
  0xca   : > { %v729_v21 = vadd.f32 %v721_v13, %v713_v8  ;;  %2679 = vmatprep.subr.bf16.mxu0 %v1428_v59  ;;  %v3859_v42 = vmul.f32 %v465_v61, %v457_v58  ;;  %v3864_v25 = vmul.f32 %v469_v30, %v461_v43  ;;  %v1421_v11 = vunpack.c.l.s8.bf16 %v1244_v39  ;;  %v1256_v61 = vld [vmem:[%s3368_s19 + $0x168] sm:$0xff] }
  0xcb   : > { %5252 = vst [vmem:[#allocation46_spill] sm:$0xff] %v3850_v44  ;;  %v733_v56 = vadd.f32 %v725_v5, %v717_v14  ;;  %5253 = vst [vmem:[#allocation47_spill] sm:$0xff] %v3854_v29  ;;  %v3857_v54 = vmul.f32 -0.6666667, %v3850_v44  ;;  %v3862_v7 = vmul.f32 -0.6666667, %v3854_v29  ;;  %v1435_v14 = vunpack.c.l.s8.bf16 %v1251_v36 }
  0xcc   : > { %5254 = vst [vmem:[#allocation48_spill] sm:$0xff] %v3859_v42  ;;  %v1117_v52 = vmul.f32 0.00064378115, %v729_v21  ;;  %5255 = vst [vmem:[#allocation49_spill] sm:$0xff] %v3864_v25  ;;  %v3867_v27 = vmul.f32 -0.6666667, %v3859_v42  ;;  %v1444_v59 = vunpack.c.h.s8.bf16 %v3829_v6  ;;  %v1430_v58 = vunpack.c.h.s8.bf16 %v1248_v0 }
  0xcd   : > { %v1121_v62 = vmul.f32 0.00064378115, %v733_v56  ;;  %2680 = vmatpush3.bf16.msra.mxu0 %v1420_v4  ;;  %v1249_v21 = vld [vmem:[%s3368_s19 + $0x130] sm:$0xff]  ;;  %v3874_v56 = vadd.f32 %v3857_v54, %v3729_v23  ;;  %v3878_v43 = vadd.f32 %v3862_v7, %v3732_v10  ;;  %v3881_v8 = vmul.f32 -0.6666667, %v3864_v25  ;;  %v3887_v6 = vld [vmem:[%s3368_s19 + $0x148] sm:$0xff] }
  0xce   : > { %5256 = vst [vmem:[#allocation50_spill] sm:$0xff] %v3867_v27  ;;  %2681 = vmatprep.subr.bf16.mxu0 %v1429_v12  ;;  %v3884_v30 = vadd.f32 %v3867_v27, %v721_v13  ;;  %v1436_v0 = vunpack.c.h.s8.bf16 %v1251_v36  ;;  %v1422_v23 = vunpack.c.h.s8.bf16 %v1244_v39  ;;  %v736_v4 = vmul.f32 0.16666667, %v3585_v26  ;;  %v1245_v13 = vld [vmem:[%s3368_s19 + $0x110] sm:$0xff]  ;;  %v5278_v20 = vld [vmem:[#allocation44_spill] sm:$0xff] }
  0xcf   : > { %v1125_v19 = vpack.c.bf16 %v1121_v62, %v1117_v52  ;;  %5257 = vst [vmem:[#allocation51_spill] sm:$0xff] %v3874_v56  ;;  %5258 = vst [vmem:[#allocation52_spill] sm:$0xff] %v3878_v43  ;;  %v740_v10 = vmul.f32 0.16666667, %v3588_v31  ;;  %v1445_v12 = vunpack.c.l.s8.bf16 %v1256_v61  ;;  %v1431_v52 = vunpack.c.l.s8.bf16 %v1249_v21  ;;  %v3892_v62 = vld [vmem:[%s3368_s19 + $0x170] sm:$0xff] }
  0xd0   : > { %5259 = vst [vmem:[#allocation53_spill] sm:$0xff] %v3881_v8  ;;  %5260 = vst [vmem:[#allocation54_spill] sm:$0xff] %v3884_v30  ;;  %v748_v30 = vmul.f32 -0.6666667, %v3592_v28  ;;  %v3898_v36 = vadd.f32 %v3881_v8, %v725_v5  ;;  %v1437_v39 = vunpack.c.l.s8.bf16 %v3887_v6  ;;  %v1446_v26 = vunpack.c.h.s8.bf16 %v1256_v61 }
  0xd1   : > { %1801 = vmatmul.mubr.bf16.vlgmr.msra.gmra.mrb[4].mxu1 %v1125_v19  ;;  %2682 = vmatpush3.bf16.msra.mxu0 %v1421_v11  ;;  %v744_v19 = vmul.f32 -0.6666667, %v3590_v3  ;;  %v1438_v31 = vunpack.c.h.s8.bf16 %v3887_v6  ;;  %v3909_v43 = vmul.f32 -0.6666667, %v3611_v49  ;;  %v1447_v5 = vunpack.c.l.s8.bf16 %v3892_v62 }
  0xd2   : > { %2700 = vmatpush3.bf16.msra.mxu1 %v1435_v14  ;;  %2683 = vmatprep.subr.bf16.mxu0 %v1430_v58  ;;  %5261 = vst [vmem:[#allocation55_spill] sm:$0xff] %v3898_v36  ;;  %v3903_v14 = vld [vmem:[%s3368_s19 + $0x150] sm:$0xff]  ;;  %v3906_v58 = vmul.f32 -0.6666667, %v3609_v48  ;;  %v1423_v36 = vunpack.c.l.s8.bf16 %v1245_v13  ;;  %v1432_v61 = vunpack.c.h.s8.bf16 %v1249_v21  ;;  %v738_v6 = vmul.f32 0.16666667, %v3680_v50 }
  0xd3   : > { %2701 = vmatprep.subr.bf16.mxu1 %v1444_v59  ;;  %v752_v11 = vadd.f32 %v744_v19, %v736_v4  ;;  %v756_v59 = vadd.f32 %v748_v30, %v740_v10  ;;  %5263 = vst [vmem:[#allocation57_spill] sm:$0xff] %v3909_v43  ;;  %v3914_v4 = vld [vmem:[%s3368_s19 + $0x138] sm:$0xff]  ;;  %v3919_v19 = vmul.f32 0.16666667, %v3615_v37  ;;  %v2536_v21 = vadd.f32 -6.0, %v3492_v34 }
  0xd4   : > { %5262 = vst [vmem:[#allocation56_spill] sm:$0xff] %v3906_v58  ;;  %v742_v50 = vmul.f32 0.16666667, %v3683_v41  ;;  %v750_v37 = vmul.f32 -0.6666667, %v3709_v40  ;;  %v1440_v41 = vunpack.c.h.s8.bf16 %v3903_v14  ;;  %v2540_v27 = vadd.f32 -6.0, %v3495_v45 }
  0xd5   : > { %2684 = vmatpush3.bf16.msra.mxu0 %v1422_v23  ;;  %v760_v30 = vadd.f32 %v752_v11, %v3601_v24  ;;  %v764_v10 = vadd.f32 %v756_v59, %v3605_v57  ;;  %v1439_v23 = vunpack.c.l.s8.bf16 %v3903_v14  ;;  %v3930_v11 = vld [vmem:[%s3368_s19 + $0x178] sm:$0xff]  ;;  %v1424_v57 = vunpack.c.h.s8.bf16 %v1245_v13 }
  0xd6   : > { %2702 = vmatpush3.bf16.msra.mxu1 %v1436_v0  ;;  %2685 = vmatprep.subr.bf16.mxu0 %v1431_v52  ;;  %v3922_v0 = vmul.f32 0.16666667, %v3628_v47  ;;  %v1448_v52 = vunpack.c.h.s8.bf16 %v3892_v62  ;;  %v3933_v59 = vld [vmem:[%s3368_s19 + $0x118] sm:$0xff]  ;;  %v1433_v24 = vunpack.c.l.s8.bf16 %v3914_v4  ;;  %v1449_v13 = vunpack.c.l.s8.bf16 %v3930_v11 }
  0xd7   : > { %2703 = vmatprep.subr.bf16.mxu1 %v1445_v12  ;;  %v746_v12 = vmul.f32 -0.6666667, %v3704_v33  ;;  %v776_v56 = vadd.f32 %v3906_v58, %v760_v30  ;;  %v780_v47 = vadd.f32 %v3909_v43, %v764_v10  ;;  %v3941_v62 = vld [vmem:[%s3368_s19 + $0x158] sm:$0xff]  ;;  %v3947_v43 = vmul.f32 -0.6666667, %v3711_v16 }
  0xd8   : > { %v758_v14 = vadd.f32 %v750_v37, %v742_v50  ;;  %v3958_v58 = vmul.f32 0.16666667, %v3850_v44  ;;  %v1434_v37 = vunpack.c.h.s8.bf16 %v3914_v4  ;;  %v3970_v44 = vld [vmem:[%s3368_s19 + $0x1a0] sm:$0xff]  ;;  %v1426_v4 = vunpack.c.h.s8.bf16 %v3933_v59 }
  0xd9   : > { %2686 = vmatpush3.bf16.msra.mxu0 %v1423_v36  ;;  %v754_v8 = vadd.f32 %v746_v12, %v738_v6  ;;  %v792_v30 = vadd.f32 %v3919_v19, %v776_v56  ;;  %v796_v10 = vadd.f32 %v3922_v0, %v780_v47  ;;  %5264 = vst [vmem:[#allocation58_spill] sm:$0xff] %v3947_v43  ;;  %v1425_v36 = vunpack.c.l.s8.bf16 %v3933_v59 }
  0xda   : > { %2704 = vmatpush3.bf16.msra.mxu1 %v1437_v39  ;;  %2687 = vmatprep.subr.bf16.mxu0 %v1432_v61  ;;  %v488_v39 = vmax.f32 %v2536_v21, 0.0  ;;  %v3953_v12 = vmul.f32 -0.6666667, %v3718_v51  ;;  %v1441_v47 = vunpack.c.l.s8.bf16 %v3941_v62  ;;  %v766_v56 = vadd.f32 %v758_v14, %v3701_v1 }
  0xdb   : > { %2705 = vmatprep.subr.bf16.mxu1 %v1446_v26  ;;  %v1128_v6 = vmul.f32 0.00055335514, %v792_v30  ;;  %v1132_v26 = vmul.f32 0.00055335514, %v796_v10  ;;  %v762_v61 = vadd.f32 %v754_v8, %v3699_v32  ;;  %v3961_v21 = vmul.f32 0.16666667, %v3854_v29 }
  0xdc   : > { %5265 = vst [vmem:[#allocation59_spill] sm:$0xff] %v3953_v12  ;;  %v492_v8 = vmax.f32 %v2540_v27, 0.0  ;;  %v2538_v30 = vadd.f32 -6.0, %v3497_v46  ;;  %v782_v10 = vadd.f32 %v3953_v12, %v766_v56  ;;  %v735_v14 = vmul.f32 0.16666667, %v3749_v15 }
  0xdd   : > { %2688 = vmatpush3.bf16.msra.mxu0 %v1424_v57  ;;  %v1136_v50 = vpack.c.bf16 %v1132_v26, %v1128_v6  ;;  %v1450_v57 = vunpack.c.h.s8.bf16 %v3930_v11  ;;  %v496_v29 = vmul.f32 %v488_v39, %v488_v39  ;;  %v739_v27 = vmul.f32 0.16666667, %v3751_v63 }
  0xde   : > { %2706 = vmatpush3.bf16.msra.mxu1 %v1438_v31  ;;  %2689 = vmatprep.subr.bf16.mxu0 %v1433_v24  ;;  %v778_v31 = vadd.f32 %v3947_v43, %v762_v61  ;;  %v2542_v24 = vadd.f32 -6.0, %v3499_v17  ;;  %v798_v11 = vadd.f32 %v3961_v21, %v782_v10  ;;  %v743_v6 = vmul.f32 -0.6666667, %v3755_v18  ;;  %v4019_v43 = vld [vmem:[%s3368_s19 + $0x1e0] sm:$0xff] }
  0xdf   : > { %2707 = vmatprep.subr.bf16.mxu1 %v1447_v5  ;;  %1841 = vmatprep.mubr.bf16.mxu0 %v1136_v50  ;;  %v747_v15 = vmul.f32 -0.6666667, %v3758_v22  ;;  %v1442_v26 = vunpack.c.h.s8.bf16 %v3941_v62  ;;  %v500_v61 = vmul.f32 %v492_v8, %v492_v8  ;;  %v1459_v50 = vunpack.c.l.s8.bf16 %v3970_v44 }
  0xe0   : > { %v794_v5 = vadd.f32 %v3958_v58, %v778_v31  ;;  %v1134_v31 = vmul.f32 0.00055335514, %v798_v11  ;;  %v751_v63 = vadd.f32 %v743_v6, %v735_v14  ;;  %v3984_v59 = vmul.f32 %v496_v29, %v488_v39  ;;  %v5268_v14 = vld [vmem:[#allocation31_spill] sm:$0xff]  ;;  %v5270_v39 = vld [vmem:[#allocation28_spill] sm:$0xff] }
  0xe1   : > { %2690 = vmatpush3.bf16.msra.mxu0 %v1425_v36  ;;  %v3982_v36 = vmul.f32 -0.6666667, %v3770_v35  ;;  %v490_v10 = vmax.f32 %v2538_v30, 0.0  ;;  %v3986_v12 = vmax.f32 %v2542_v24, 0.0  ;;  %v5269_v11 = vld [vmem:[#allocation11_spill] sm:$0xff]  ;;  %v5271_v24 = vld [vmem:[#allocation32_spill] sm:$0xff] }
  0xe2   : > { %2708 = vmatpush3.bf16.msra.mxu1 %v1439_v23  ;;  %2691 = vmatprep.subr.bf16.mxu0 %v1434_v37  ;;  %v1130_v56 = vmul.f32 0.00055335514, %v794_v5  ;;  %v755_v23 = vadd.f32 %v747_v15, %v739_v27  ;;  %v2535_v37 = vadd.f32 -6.0, %v3507_v55  ;;  %v759_v5 = vadd.f32 %v751_v63, %v3761_v38 }
  0xe3   : > { %2709 = vmatprep.subr.bf16.mxu1 %v1448_v52  ;;  %5266 = vst [vmem:[#allocation60_spill] sm:$0xff] %v3982_v36  ;;  %v3989_v52 = vmul.f32 -0.6666667, %v3772_v9  ;;  %v3994_v27 = vmul.f32 0.16666667, %v5268_v14  ;;  %v2539_v29 = vadd.f32 -6.0, %v5269_v11  ;;  %v498_v63 = vmul.f32 %v490_v10, %v490_v10 }
  0xe4   : > { %v1138_v62 = vpack.c.bf16 %v1134_v31, %v1130_v56  ;;  %v763_v30 = vadd.f32 %v755_v23, %v5270_v39  ;;  %v3999_v6 = vmul.f32 0.16666667, %v5271_v24  ;;  %v737_v15 = vmul.f32 0.16666667, %v3808_v60  ;;  %v5272_v31 = vld [vmem:[#allocation37_spill] sm:$0xff]  ;;  %v5273_v23 = vld [vmem:[#allocation12_spill] sm:$0xff] }
  0xe5   : > { %5267 = vst [vmem:[#allocation61_spill] sm:$0xff] %v3989_v52  ;;  %2692 = vmatpush3.bf16.msra.mxu0 %v1426_v4  ;;  %v775_v4 = vadd.f32 %v3982_v36, %v759_v5  ;;  %v2537_v56 = vadd.f32 -6.0, %v3546_v2  ;;  %v2541_v39 = vadd.f32 -6.0, %v5273_v23  ;;  %v5274_v24 = vld [vmem:[#allocation38_spill] sm:$0xff]  ;;  %v502_v60 = vmul.f32 %v3986_v12, %v3986_v12 }
  0xe6   : > { %2710 = vmatpush3.bf16.msra.mxu1 %v1440_v41  ;;  %2721 = vmatprep.subr.bf16.mxu0 %v1459_v50  ;;  %v4002_v41 = vmul.f32 %v500_v61, %v492_v8  ;;  %v779_v14 = vadd.f32 %v3989_v52, %v763_v30  ;;  %v745_v38 = vmul.f32 -0.6666667, %v5274_v24  ;;  %v487_v8 = vmax.f32 %v2535_v37, 0.0  ;;  %v5275_v50 = vld [vmem:[#allocation41_spill] sm:$0xff]  ;;  %v5276_v30 = vld [vmem:[#allocation42_spill] sm:$0xff] }
  0xe7   : > { %2711 = vmatprep.subr.bf16.mxu1 %v1449_v13  ;;  %1882 = vmatprep.mubr.bf16.mxu1 %v1138_v62  ;;  %v741_v13 = vmul.f32 0.16666667, %v5272_v31  ;;  %v791_v61 = vadd.f32 %v3994_v27, %v775_v4  ;;  %v749_v62 = vmul.f32 -0.6666667, %v5275_v50  ;;  %v491_v5 = vmax.f32 %v2539_v29, 0.0  ;;  %v1259_v37 = vld [vmem:[%s3368_s19 + $0x180] sm:$0xff] }
  0xe8   : > { %v795_v31 = vadd.f32 %v3999_v6, %v779_v14  ;;  %v753_v36 = vadd.f32 %v745_v38, %v737_v15  ;;  %v4016_v52 = vmul.f32 -0.6666667, %v5276_v30  ;;  %v4022_v23 = vmul.f32 -0.6666667, %v5278_v20  ;;  %v5280_v50 = vld [vmem:[#allocation39_spill] sm:$0xff]  ;;  %v5281_v29 = vld [vmem:[#allocation40_spill] sm:$0xff] }
  0xe9   : > { %v1127_v1 = vmul.f32 0.00055335514, %v791_v61  ;;  %v757_v32 = vadd.f32 %v749_v62, %v741_v13  ;;  %v493_v53 = vmax.f32 %v2541_v39, 0.0  ;;  %v785_v14 = vmul.f32 0.16666667, %v3859_v42 }
  0xea   : > { %2712 = vmatpush3.bf16.msra.mxu1 %v1441_v47  ;;  %5277 = vst [vmem:[#allocation11_spill] sm:$0xff] %v4016_v52  ;;  %v489_v47 = vmax.f32 %v2537_v56, 0.0  ;;  %5279 = vst [vmem:[#allocation37_spill] sm:$0xff] %v4022_v23  ;;  %v1131_v4 = vmul.f32 0.00055335514, %v795_v31  ;;  %v495_v38 = vmul.f32 %v487_v8, %v487_v8  ;;  %v1475_v56 = vunpack.c.l.s8.bf16 %v4019_v43 }
  0xeb   : > { %2713 = vmatprep.subr.bf16.mxu1 %v1450_v57  ;;  %v761_v57 = vadd.f32 %v753_v36, %v5280_v50  ;;  %v765_v15 = vadd.f32 %v757_v32, %v5281_v29  ;;  %v789_v30 = vmul.f32 0.16666667, %v3864_v25  ;;  %v499_v13 = vmul.f32 %v491_v5, %v491_v5  ;;  %v1264_v32 = vld [vmem:[%s3368_s19 + $0x1a8] sm:$0xff] }
  0xec   : > { %v1135_v61 = vpack.c.bf16 %v1131_v4, %v1127_v1  ;;  %v1451_v20 = vunpack.c.l.s8.bf16 %v1259_v37  ;;  %v4032_v39 = vmul.f32 -0.6666667, %v3984_v59  ;;  %v497_v36 = vmul.f32 %v489_v47, %v489_v47 }
  0xed   : > { %v777_v62 = vadd.f32 %v4016_v52, %v761_v57  ;;  %v781_v31 = vadd.f32 %v4022_v23, %v765_v15  ;;  %v4038_v25 = vmul.f32 -0.6666667, %v4002_v41  ;;  %v4040_v42 = vmul.f32 %v498_v63, %v490_v10 }
  0xee   : > { %2714 = vmatpush3.bf16.msra.mxu1 %v1442_v26  ;;  %v1460_v26 = vunpack.c.h.s8.bf16 %v3970_v44  ;;  %1842 = vmatmul.mubr.bf16.vlgmr.msra.gmra.mrb[8].mxu0 %v1135_v61  ;;  %v501_v1 = vmul.f32 %v493_v53, %v493_v53  ;;  %v4044_v57 = vadd.f32 %v4032_v39, %v3919_v19  ;;  %v4047_v52 = vmul.f32 %v502_v60, %v3986_v12  ;;  %v1267_v44 = vld [vmem:[%s3368_s19 + $0x1c0] sm:$0xff]  ;;  %v1260_v61 = vld [vmem:[%s3368_s19 + $0x188] sm:$0xff] }
  0xef   : > { %2743 = vmatprep.subr.bf16.mxu1 %v1475_v56  ;;  %5282 = vst [vmem:[#allocation38_spill] sm:$0xff] %v4040_v42  ;;  %v793_v4 = vadd.f32 %v785_v14, %v777_v62  ;;  %v797_v15 = vadd.f32 %v789_v30, %v781_v31  ;;  %2722 = vmatpush3.bf16.msra.mxu0 %v1451_v20  ;;  %v1452_v56 = vunpack.c.h.s8.bf16 %v1259_v37  ;;  %v1461_v63 = vunpack.c.l.s8.bf16 %v1264_v32 }
  0xf0   : > { %5283 = vst [vmem:[#allocation39_spill] sm:$0xff] %v4044_v57  ;;  %v4050_v23 = vmul.f32 %v495_v38, %v487_v8  ;;  %v4052_v29 = vmul.f32 %v499_v13, %v491_v5  ;;  %2723 = vmatprep.subr.bf16.mxu0 %v1460_v26  ;;  %v4056_v62 = vmul.f32 -0.6666667, %v4040_v42  ;;  %v4059_v19 = vmul.f32 -0.6666667, %v4047_v52 }
  0xf1   : > { %v1129_v10 = vmul.f32 0.00055335514, %v793_v4  ;;  %v4061_v12 = vmul.f32 %v497_v36, %v489_v47  ;;  %v1133_v20 = vmul.f32 0.00055335514, %v797_v15  ;;  %v4069_v5 = vmul.f32 %v501_v1, %v493_v53  ;;  %v1272_v1 = vld [vmem:[%s3368_s19 + $0x1e8] sm:$0xff] }
  0xf2   : > { %5284 = vst [vmem:[#allocation62_spill] sm:$0xff] %v4052_v29  ;;  %v4064_v60 = vmul.f32 -0.6666667, %v4050_v23  ;;  %v4067_v8 = vmul.f32 -0.6666667, %v4052_v29  ;;  %v1467_v37 = vunpack.c.l.s8.bf16 %v1267_v44  ;;  %v1476_v31 = vunpack.c.h.s8.bf16 %v4019_v43  ;;  %v4088_v4 = vld [vmem:[%s3368_s19 + $0x1c8] sm:$0xff] }
  0xf3   : > { %5285 = vst [vmem:[#allocation63_spill] sm:$0xff] %v4061_v12  ;;  %5286 = vst [vmem:[#allocation64_spill] sm:$0xff] %v4069_v5  ;;  %v4072_v38 = vmul.f32 -0.6666667, %v4061_v12  ;;  %v1137_v13 = vpack.c.bf16 %v1133_v20, %v1129_v10  ;;  %2724 = vmatpush3.bf16.msra.mxu0 %v1452_v56  ;;  %v1453_v47 = vunpack.c.l.s8.bf16 %v1260_v61  ;;  %v4077_v36 = vadd.f32 %v4038_v25, %v3922_v0  ;;  %v1265_v10 = vld [vmem:[%s3368_s19 + $0x1b0] sm:$0xff] }
  0xf4   : > { %v4081_v26 = vadd.f32 %v4056_v62, %v3958_v58  ;;  %v4084_v53 = vmul.f32 -0.6666667, %v4069_v5  ;;  %2725 = vmatprep.subr.bf16.mxu0 %v1461_v63  ;;  %v1462_v43 = vunpack.c.h.s8.bf16 %v1264_v32  ;;  %v4092_v15 = vadd.f32 %v4059_v19, %v3961_v21  ;;  %v4110_v32 = vld [vmem:[%s3368_s19 + $0x1f0] sm:$0xff] }
  0xf5   : > { %5287 = vst [vmem:[#allocation65_spill] sm:$0xff] %v4077_v36  ;;  %v4096_v0 = vadd.f32 %v4064_v60, %v3994_v27  ;;  %v4100_v58 = vadd.f32 %v4067_v8, %v3999_v6  ;;  %v4103_v56 = vadd.f32 %v4072_v38, %v785_v14  ;;  %1883 = vmatmul.mubr.bf16.vlgmr.msra.gmra.mrb[8].mxu1 %v1137_v13  ;;  %v1468_v21 = vunpack.c.h.s8.bf16 %v1267_v44  ;;  %v4113_v20 = vld [vmem:[%s3368_s19 + $0x190] sm:$0xff]  ;;  %v4150_v36 = vld [vmem:[%s3368_s19 + $0x198] sm:$0xff] }
  0xf6   : > { %5288 = vst [vmem:[#allocation66_spill] sm:$0xff] %v4081_v26  ;;  %5289 = vst [vmem:[#allocation67_spill] sm:$0xff] %v4092_v15  ;;  %v4107_v63 = vadd.f32 %v4084_v53, %v789_v30  ;;  %2744 = vmatpush3.bf16.msra.mxu1 %v1467_v37  ;;  %v800_v27 = vmul.f32 0.16666667, %v3590_v3  ;;  %v804_v6 = vmul.f32 0.16666667, %v3592_v28  ;;  %v1469_v14 = vunpack.c.l.s8.bf16 %v4088_v4 }
  0xf7   : > { %5290 = vst [vmem:[#allocation68_spill] sm:$0xff] %v4096_v0  ;;  %5291 = vst [vmem:[#allocation69_spill] sm:$0xff] %v4100_v58  ;;  %2745 = vmatprep.subr.bf16.mxu1 %v1476_v31  ;;  %v1477_v58 = vunpack.c.l.s8.bf16 %v1272_v1  ;;  %2726 = vmatpush3.bf16.msra.mxu0 %v1453_v47  ;;  %v1478_v13 = vunpack.c.h.s8.bf16 %v1272_v1  ;;  %v1470_v30 = vunpack.c.h.s8.bf16 %v4088_v4  ;;  %v1463_v37 = vunpack.c.l.s8.bf16 %v1265_v10  ;;  %v4120_v44 = vld [vmem:[%s3368_s19 + $0x1d0] sm:$0xff]  ;;  %v5295_v15 = vld [vmem:[#allocation17_spill] sm:$0xff] }
  0xf8   : > { %5292 = vst [vmem:[#allocation70_spill] sm:$0xff] %v4103_v56  ;;  %5293 = vst [vmem:[#allocation71_spill] sm:$0xff] %v4107_v63  ;;  %v1454_v56 = vunpack.c.h.s8.bf16 %v1260_v61  ;;  %2727 = vmatprep.subr.bf16.mxu0 %v1462_v43  ;;  %v5294_v63 = vld [vmem:[#allocation16_spill] sm:$0xff]  ;;  %v812_v3 = vadd.f32 %v804_v6, %v5295_v15  ;;  %v1479_v28 = vunpack.c.l.s8.bf16 %v4110_v32  ;;  %v1455_v31 = vunpack.c.l.s8.bf16 %v4113_v20 }
  0xf9   : > { %v808_v0 = vadd.f32 %v800_v27, %v5294_v63  ;;  %v802_v47 = vmul.f32 0.16666667, %v3704_v33  ;;  %v806_v1 = vmul.f32 0.16666667, %v3709_v40  ;;  %v4131_v43 = vmul.f32 0.16666667, %v3984_v59 }
  0xfa   : > { %2746 = vmatpush3.bf16.msra.mxu1 %v1468_v21  ;;  %v820_v4 = vadd.f32 %v812_v3, %v3611_v49  ;;  %v4134_v15 = vmul.f32 0.16666667, %v4002_v41  ;;  %v1471_v63 = vunpack.c.l.s8.bf16 %v4120_v44  ;;  %v1464_v33 = vunpack.c.h.s8.bf16 %v1265_v10  ;;  %v4139_v27 = vld [vmem:[%s3368_s19 + $0x1b8] sm:$0xff]  ;;  %v5296_v21 = vld [vmem:[#allocation25_spill] sm:$0xff]  ;;  %v5297_v3 = vld [vmem:[#allocation19_spill] sm:$0xff] }
  0xfb   : > { %v816_v61 = vadd.f32 %v808_v0, %v3609_v48  ;;  %2747 = vmatprep.subr.bf16.mxu1 %v1477_v58  ;;  %2728 = vmatpush3.bf16.msra.mxu0 %v1454_v56  ;;  %v1480_v40 = vunpack.c.h.s8.bf16 %v4110_v32  ;;  %v810_v48 = vadd.f32 %v802_v47, %v5296_v21  ;;  %v1456_v49 = vunpack.c.h.s8.bf16 %v4113_v20  ;;  %v4145_v6 = vld [vmem:[%s3368_s19 + $0x1f8] sm:$0xff]  ;;  %v5299_v32 = vld [vmem:[#allocation26_spill] sm:$0xff] }
  0xfc   : > { %2729 = vmatprep.subr.bf16.mxu0 %v1463_v37  ;;  %v5298_v56 = vld [vmem:[#allocation20_spill] sm:$0xff]  ;;  %v2544_v10 = vadd.f32 -7.0, %v3492_v34  ;;  %v814_v57 = vadd.f32 %v806_v1, %v5299_v32  ;;  %v4156_v37 = vmul.f32 0.16666667, %v4040_v42  ;;  %v1465_v20 = vunpack.c.l.s8.bf16 %v4139_v27 }
  0xfd   : > { %v832_v58 = vadd.f32 %v5297_v3, %v816_v61  ;;  %v836_v26 = vadd.f32 %v5298_v56, %v820_v4  ;;  %v818_v47 = vadd.f32 %v810_v48, %v3711_v16  ;;  %v2548_v21 = vadd.f32 -7.0, %v3495_v45  ;;  %v4164_v56 = vld [vmem:[%s3368_s19 + $0x1d8] sm:$0xff] }
  0xfe   : > { %2748 = vmatpush3.bf16.msra.mxu1 %v1469_v14  ;;  %v1481_v3 = vunpack.c.l.s8.bf16 %v4145_v6  ;;  %v822_v16 = vadd.f32 %v814_v57, %v3718_v51  ;;  %v4169_v14 = vmul.f32 0.16666667, %v4047_v52  ;;  %v1457_v48 = vunpack.c.l.s8.bf16 %v4150_v36 }
  0xff   : > { %v848_v61 = vadd.f32 %v4131_v43, %v832_v58  ;;  %v852_v4 = vadd.f32 %v4134_v15, %v836_v26  ;;  %2749 = vmatprep.subr.bf16.mxu1 %v1478_v13  ;;  %2730 = vmatpush3.bf16.msra.mxu0 %v1455_v31  ;;  %v834_v1 = vadd.f32 %v3857_v54, %v818_v47  ;;  %v2546_v26 = vadd.f32 -7.0, %v3497_v46 }
 0x100   : > { %2731 = vmatprep.subr.bf16.mxu0 %v1464_v33  ;;  %v520_v13 = vmax.f32 %v2544_v10, 0.0  ;;  %v2550_v31 = vadd.f32 -7.0, %v3499_v17  ;;  %v838_v0 = vadd.f32 %v3862_v7, %v822_v16  ;;  %v1473_v51 = vunpack.c.l.s8.bf16 %v4164_v56 }
 0x101   : > { %v1140_v32 = vmul.f32 0.00049318845, %v848_v61  ;;  %v1144_v58 = vmul.f32 0.00049318845, %v852_v4  ;;  %v850_v42 = vadd.f32 %v4156_v37, %v834_v1  ;;  %v524_v54 = vmax.f32 %v2548_v21, 0.0  ;;  %v5300_v21 = vld [vmem:[#allocation29_spill] sm:$0xff] }
 0x102   : > { %2750 = vmatpush3.bf16.msra.mxu1 %v1470_v30  ;;  %v799_v33 = vmul.f32 0.16666667, %v3755_v18  ;;  %v1466_v47 = vunpack.c.h.s8.bf16 %v4139_v27  ;;  %v854_v61 = vadd.f32 %v4169_v14, %v838_v0  ;;  %v803_v4 = vmul.f32 0.16666667, %v3758_v22 }
 0x103   : > { %v1148_v57 = vpack.c.bf16 %v1144_v58, %v1140_v32  ;;  %2751 = vmatprep.subr.bf16.mxu1 %v1479_v28  ;;  %2732 = vmatpush3.bf16.msra.mxu0 %v1456_v49  ;;  %v1142_v10 = vmul.f32 0.00049318845, %v850_v42  ;;  %v1482_v7 = vunpack.c.h.s8.bf16 %v4145_v6  ;;  %v1458_v30 = vunpack.c.h.s8.bf16 %v4150_v36  ;;  %v5301_v49 = vld [vmem:[#allocation30_spill] sm:$0xff] }
 0x104   : > { %2733 = vmatprep.subr.bf16.mxu0 %v1465_v20  ;;  %v522_v16 = vmax.f32 %v2546_v26, 0.0  ;;  %v807_v1 = vadd.f32 %v799_v33, %v5300_v21  ;;  %v528_v32 = vmul.f32 %v520_v13, %v520_v13  ;;  %v526_v18 = vmax.f32 %v2550_v31, 0.0 }
 0x105   : > { %1923 = vmatprep.mubr.bf16.mxu0 %v1148_v57  ;;  %v1146_v28 = vmul.f32 0.00049318845, %v854_v61  ;;  %v811_v58 = vadd.f32 %v803_v4, %v5301_v49  ;;  %v532_v27 = vmul.f32 %v524_v54, %v524_v54  ;;  %v2543_v42 = vadd.f32 -7.0, %v3507_v55  ;;  %v5302_v57 = vld [vmem:[#allocation33_spill] sm:$0xff]  ;;  %v5305_v4 = vld [vmem:[#allocation43_spill] sm:$0xff] }
 0x106   : > { %2752 = vmatpush3.bf16.msra.mxu1 %v1471_v63  ;;  %v815_v22 = vadd.f32 %v807_v1, %v3770_v35  ;;  %v4188_v0 = vmul.f32 0.16666667, %v4050_v23  ;;  %v4192_v20 = vmul.f32 0.16666667, %v4052_v29  ;;  %v801_v26 = vmul.f32 0.16666667, %v5274_v24 }
 0x107   : > { %2753 = vmatprep.subr.bf16.mxu1 %v1480_v40  ;;  %2734 = vmatpush3.bf16.msra.mxu0 %v1457_v48  ;;  %v1150_v36 = vpack.c.bf16 %v1146_v28, %v1142_v10  ;;  %v819_v6 = vadd.f32 %v811_v58, %v3772_v9  ;;  %v1474_v63 = vunpack.c.h.s8.bf16 %v4164_v56  ;;  %v2547_v31 = vadd.f32 -7.0, %v5269_v11  ;;  %v5303_v40 = vld [vmem:[#allocation34_spill] sm:$0xff]  ;;  %v5304_v48 = vld [vmem:[#allocation41_spill] sm:$0xff]  ;;  %v5307_v28 = vld [vmem:[#allocation12_spill] sm:$0xff] }
 0x108   : > { %2735 = vmatprep.subr.bf16.mxu0 %v1466_v47  ;;  %v831_v35 = vadd.f32 %v5302_v57, %v815_v22  ;;  %v2545_v33 = vadd.f32 -7.0, %v3546_v2  ;;  %v530_v61 = vmul.f32 %v522_v16, %v522_v16  ;;  %v805_v10 = vmul.f32 0.16666667, %v5304_v48 }
 0x109   : > { %1964 = vmatprep.mubr.bf16.mxu1 %v1150_v36  ;;  %v835_v9 = vadd.f32 %v5303_v40, %v819_v6  ;;  %v809_v24 = vadd.f32 %v801_v26, %v5305_v4  ;;  %v5306_v47 = vunpack.c.h.s8.bf16 %v4120_v44  ;;  %v4204_v56 = vmul.f32 %v528_v32, %v520_v13  ;;  %v5308_v6 = vld [vmem:[#allocation45_spill] sm:$0xff] }
 0x10a   : > { %v534_v21 = vmul.f32 %v526_v18, %v526_v18  ;;  %v847_v1 = vadd.f32 %v4188_v0, %v831_v35  ;;  %v2549_v49 = vadd.f32 -7.0, %v5307_v28  ;;  %v4208_v58 = vmul.f32 %v532_v27, %v524_v54  ;;  %v1279_v26 = vld [vmem:[%s3368_s19 + $0x220] sm:$0xff]  ;;  %v5310_v54 = vld [vmem:[#allocation44_spill] sm:$0xff] }
 0x10b   : > { %2754 = vmatpush3.bf16.msra.mxu1 %v5306_v47  ;;  %2736 = vmatpush3.bf16.msra.mxu0 %v1458_v30  ;;  %v519_v22 = vmax.f32 %v2543_v42, 0.0  ;;  %v851_v36 = vadd.f32 %v4192_v20, %v835_v9  ;;  %v813_v57 = vadd.f32 %v805_v10, %v5308_v6  ;;  %v4214_v40 = vld [vmem:[%s3368_s19 + $0x260] sm:$0xff]  ;;  %v523_v13 = vmax.f32 %v2547_v31, 0.0 }
 0x10c   : > { %2755 = vmatprep.subr.bf16.mxu1 %v1481_v3  ;;  %v1275_v44 = vld [vmem:[%s3368_s19 + $0x200] sm:$0xff]  ;;  %v1139_v32 = vmul.f32 0.00049318845, %v847_v1  ;;  %v521_v48 = vmax.f32 %v2545_v33, 0.0  ;;  %v4218_v35 = vmul.f32 0.16666667, %v4061_v12  ;;  %v4225_v9 = vmul.f32 %v530_v61, %v522_v16 }
 0x10d   : > { %v1143_v4 = vmul.f32 0.00049318845, %v851_v36  ;;  %v5309_v3 = vld [vmem:[#allocation42_spill] sm:$0xff]  ;;  %v821_v27 = vadd.f32 %v813_v57, %v5310_v54  ;;  %v4223_v42 = vmul.f32 0.16666667, %v4069_v5  ;;  %v525_v10 = vmax.f32 %v2549_v49, 0.0 }
 0x10e   : > { %v817_v30 = vadd.f32 %v809_v24, %v5309_v3  ;;  %5311 = vst [vmem:[#allocation16_spill] sm:$0xff] %v4225_v9  ;;  %v1491_v47 = vunpack.c.l.s8.bf16 %v1279_v26  ;;  %v1507_v31 = vunpack.c.l.s8.bf16 %v4214_v40  ;;  %v5312_v1 = vld [vmem:[#allocation50_spill] sm:$0xff]  ;;  %v5313_v6 = vld [vmem:[#allocation53_spill] sm:$0xff]  ;;  %v1483_v3 = vunpack.c.l.s8.bf16 %v1275_v44 }
 0x10f   : > { %2756 = vmatpush3.bf16.msra.mxu1 %v1473_v51  ;;  %v1147_v33 = vpack.c.bf16 %v1143_v4, %v1139_v32  ;;  %v837_v24 = vadd.f32 %v5313_v6, %v821_v27  ;;  %v4230_v57 = vmul.f32 %v534_v21, %v526_v18  ;;  %v527_v54 = vmul.f32 %v519_v22, %v519_v22  ;;  %v1280_v16 = vld [vmem:[%s3368_s19 + $0x228] sm:$0xff]  ;;  %v1283_v4 = vld [vmem:[%s3368_s19 + $0x240] sm:$0xff] }
 0x110   : > { %2757 = vmatprep.subr.bf16.mxu1 %v1482_v7  ;;  %v833_v36 = vadd.f32 %v5312_v1, %v817_v30  ;;  %v531_v5 = vmul.f32 %v523_v13, %v523_v13  ;;  %2765 = vmatprep.subr.bf16.mxu0 %v1491_v47  ;;  %v1492_v51 = vunpack.c.h.s8.bf16 %v1279_v26  ;;  %v4234_v61 = vmul.f32 -0.6666667, %v4204_v56 }
 0x111   : > { %5314 = vst [vmem:[#allocation17_spill] sm:$0xff] %v4230_v57  ;;  %1924 = vmatmul.mubr.bf16.vlgmr.msra.gmra.mrb[12].mxu0 %v1147_v33  ;;  %v529_v49 = vmul.f32 %v521_v48, %v521_v48  ;;  %v853_v32 = vadd.f32 %v4223_v42, %v837_v24  ;;  %v4240_v18 = vmul.f32 -0.6666667, %v4208_v58  ;;  %v4243_v21 = vmul.f32 -0.6666667, %v4225_v9 }
 0x112   : > { %v849_v7 = vadd.f32 %v4218_v35, %v833_v36  ;;  %v533_v26 = vmul.f32 %v525_v10, %v525_v10  ;;  %2766 = vmatpush3.bf16.msra.mxu0 %v1483_v3  ;;  %v1484_v30 = vunpack.c.h.s8.bf16 %v1275_v44  ;;  %v4247_v27 = vadd.f32 %v4234_v61, %v4131_v43 }
 0x113   : > { %2758 = vmatpush3.bf16.msra.mxu1 %v1474_v63  ;;  %v1145_v33 = vmul.f32 0.00049318845, %v853_v32  ;;  %2767 = vmatprep.subr.bf16.mxu0 %v1492_v51  ;;  %v1493_v1 = vunpack.c.l.s8.bf16 %v1280_v16  ;;  %v1276_v63 = vld [vmem:[%s3368_s19 + $0x208] sm:$0xff]  ;;  %v4252_v36 = vadd.f32 %v4240_v18, %v4134_v15  ;;  %v4254_v6 = vmul.f32 %v527_v54, %v519_v22 }
 0x114   : > { %5315 = vst [vmem:[#allocation25_spill] sm:$0xff] %v4247_v27  ;;  %v1141_v47 = vmul.f32 0.00049318845, %v849_v7  ;;  %2787 = vmatprep.subr.bf16.mxu1 %v1507_v31  ;;  %v4256_v24 = vmul.f32 %v531_v5, %v523_v13  ;;  %v1499_v44 = vunpack.c.l.s8.bf16 %v1283_v4  ;;  %v4259_v43 = vmul.f32 -0.6666667, %v4230_v57  ;;  %v1288_v5 = vld [vmem:[%s3368_s19 + $0x268] sm:$0xff] }
 0x115   : > { %5316 = vst [vmem:[#allocation19_spill] sm:$0xff] %v4252_v36  ;;  %v4261_v3 = vmul.f32 %v529_v49, %v521_v48  ;;  %v1508_v51 = vunpack.c.h.s8.bf16 %v4214_v40  ;;  %v4265_v7 = vmul.f32 -0.6666667, %v4254_v6  ;;  %v4270_v22 = vmul.f32 %v533_v26, %v525_v10  ;;  %v4285_v10 = vld [vmem:[%s3368_s19 + $0x248] sm:$0xff]  ;;  %v5328_v27 = vld [vmem:[#allocation57_spill] sm:$0xff] }
 0x116   : > { %v1149_v31 = vpack.c.bf16 %v1145_v33, %v1141_v47  ;;  %v4268_v15 = vmul.f32 -0.6666667, %v4256_v24  ;;  %2768 = vmatpush3.bf16.msra.mxu0 %v1484_v30  ;;  %v1485_v13 = vunpack.c.l.s8.bf16 %v1276_v63  ;;  %v4275_v48 = vadd.f32 %v4243_v21, %v4156_v37  ;;  %v1281_v30 = vld [vmem:[%s3368_s19 + $0x230] sm:$0xff] }
 0x117   : > { %5317 = vst [vmem:[#allocation20_spill] sm:$0xff] %v4265_v7  ;;  %v4279_v40 = vadd.f32 %v4259_v43, %v4169_v14  ;;  %v4282_v54 = vmul.f32 -0.6666667, %v4261_v3  ;;  %2769 = vmatprep.subr.bf16.mxu0 %v1493_v1  ;;  %v1494_v49 = vunpack.c.h.s8.bf16 %v1280_v16  ;;  %v4289_v32 = vadd.f32 %v4265_v7, %v4188_v0  ;;  %v4300_v47 = vld [vmem:[%s3368_s19 + $0x270] sm:$0xff]  ;;  %v5332_v7 = vld [vmem:[#allocation18_spill] sm:$0xff] }
 0x118   : > { %5318 = vst [vmem:[#allocation26_spill] sm:$0xff] %v4268_v15  ;;  %5319 = vst [vmem:[#allocation29_spill] sm:$0xff] %v4275_v48  ;;  %1965 = vmatmul.mubr.bf16.vlgmr.msra.gmra.mrb[12].mxu1 %v1149_v31  ;;  %v4293_v37 = vadd.f32 %v4268_v15, %v4192_v20  ;;  %v4296_v14 = vmul.f32 -0.6666667, %v4270_v22  ;;  %v1500_v26 = vunpack.c.h.s8.bf16 %v1283_v4  ;;  %v1509_v16 = vunpack.c.l.s8.bf16 %v1288_v5  ;;  %v4307_v0 = vld [vmem:[%s3368_s19 + $0x210] sm:$0xff]  ;;  %v5325_v20 = vld [vmem:[#allocation13_spill] sm:$0xff] }
 0x119   : > { %5320 = vst [vmem:[#allocation30_spill] sm:$0xff] %v4279_v40  ;;  %5321 = vst [vmem:[#allocation33_spill] sm:$0xff] %v4282_v54  ;;  %2788 = vmatpush3.bf16.msra.mxu1 %v1499_v44  ;;  %v4304_v33 = vadd.f32 %v4282_v54, %v4218_v35  ;;  %v4310_v1 = vld [vmem:[%s3368_s19 + $0x250] sm:$0xff]  ;;  %v856_v31 = vmul.f32 0.16666667, %v5325_v20  ;;  %v1501_v4 = vunpack.c.l.s8.bf16 %v4285_v10  ;;  %v1510_v44 = vunpack.c.h.s8.bf16 %v1288_v5  ;;  %v5330_v5 = vld [vmem:[#allocation24_spill] sm:$0xff] }
 0x11a   : > { %5322 = vst [vmem:[#allocation34_spill] sm:$0xff] %v4289_v32  ;;  %5323 = vst [vmem:[#allocation41_spill] sm:$0xff] %v4293_v37  ;;  %2789 = vmatprep.subr.bf16.mxu1 %v1508_v51  ;;  %v5326_v37 = vld [vmem:[#allocation14_spill] sm:$0xff]  ;;  %2770 = vmatpush3.bf16.msra.mxu0 %v1485_v13  ;;  %v1486_v40 = vunpack.c.h.s8.bf16 %v1276_v63  ;;  %v1502_v48 = vunpack.c.h.s8.bf16 %v4285_v10  ;;  %v1495_v35 = vunpack.c.l.s8.bf16 %v1281_v30  ;;  %v1511_v51 = vunpack.c.l.s8.bf16 %v4300_v47  ;;  %v5329_v20 = vld [vmem:[#allocation23_spill] sm:$0xff] }
 0x11b   : > { %5324 = vst [vmem:[#allocation43_spill] sm:$0xff] %v4304_v33  ;;  %v860_v32 = vmul.f32 0.16666667, %v5326_v37  ;;  %2771 = vmatprep.subr.bf16.mxu0 %v1494_v49  ;;  %v5327_v33 = vld [vmem:[#allocation56_spill] sm:$0xff]  ;;  %v1487_v37 = vunpack.c.l.s8.bf16 %v4307_v0  ;;  %v858_v15 = vmul.f32 0.16666667, %v5329_v20 }
 0x11c   : > { %v864_v36 = vadd.f32 %v856_v31, %v5327_v33  ;;  %v862_v63 = vmul.f32 0.16666667, %v5330_v5  ;;  %v4324_v10 = vld [vmem:[%s3368_s19 + $0x238] sm:$0xff]  ;;  %v5331_v49 = vld [vmem:[#allocation15_spill] sm:$0xff]  ;;  %v4329_v33 = vmul.f32 0.16666667, %v4204_v56 }
 0x11d   : > { %v868_v54 = vadd.f32 %v860_v32, %v5328_v27  ;;  %2790 = vmatpush3.bf16.msra.mxu1 %v1500_v26  ;;  %v4332_v27 = vmul.f32 0.16666667, %v4208_v58  ;;  %v1496_v32 = vunpack.c.h.s8.bf16 %v1281_v30  ;;  %v1512_v26 = vunpack.c.h.s8.bf16 %v4300_v47  ;;  %v4336_v31 = vld [vmem:[%s3368_s19 + $0x278] sm:$0xff]  ;;  %v5334_v5 = vld [vmem:[#allocation59_spill] sm:$0xff] }
 0x11e   : > { %2791 = vmatprep.subr.bf16.mxu1 %v1509_v16  ;;  %v872_v12 = vadd.f32 %v864_v36, %v5331_v49  ;;  %2772 = vmatpush3.bf16.msra.mxu0 %v1486_v40  ;;  %v5333_v16 = vld [vmem:[#allocation58_spill] sm:$0xff]  ;;  %v870_v13 = vadd.f32 %v862_v63, %v5334_v5  ;;  %v1488_v36 = vunpack.c.h.s8.bf16 %v4307_v0  ;;  %v1497_v40 = vunpack.c.l.s8.bf16 %v4324_v10  ;;  %v4346_v30 = vld [vmem:[%s3368_s19 + $0x218] sm:$0xff]  ;;  %v5336_v63 = vld [vmem:[#allocation47_spill] sm:$0xff] }
 0x11f   : > { %v876_v29 = vadd.f32 %v868_v54, %v5332_v7  ;;  %v866_v20 = vadd.f32 %v858_v15, %v5333_v16  ;;  %2773 = vmatprep.subr.bf16.mxu0 %v1495_v35  ;;  %v2552_v47 = vadd.f32 -8.0, %v3492_v34  ;;  %v5335_v15 = vld [vmem:[#allocation46_spill] sm:$0xff]  ;;  %v1513_v0 = vunpack.c.l.s8.bf16 %v4336_v31 }
 0x120   : > { %v888_v54 = vadd.f32 %v4032_v39, %v872_v12  ;;  %v878_v35 = vadd.f32 %v870_v13, %v5336_v63  ;;  %v2556_v5 = vadd.f32 -8.0, %v3495_v45  ;;  %v1489_v13 = vunpack.c.l.s8.bf16 %v4346_v30 }
 0x121   : > { %v892_v49 = vadd.f32 %v4038_v25, %v876_v29  ;;  %2792 = vmatpush3.bf16.msra.mxu1 %v1501_v4  ;;  %v874_v16 = vadd.f32 %v866_v20, %v5335_v15  ;;  %v4356_v29 = vld [vmem:[%s3368_s19 + $0x258] sm:$0xff]  ;;  %v4361_v20 = vmul.f32 0.16666667, %v4225_v9  ;;  %v2558_v63 = vadd.f32 -8.0, %v3499_v17 }
 0x122   : > { %2793 = vmatprep.subr.bf16.mxu1 %v1510_v44  ;;  %v904_v39 = vadd.f32 %v4329_v33, %v888_v54  ;;  %2774 = vmatpush3.bf16.msra.mxu0 %v1487_v37  ;;  %v894_v4 = vadd.f32 %v4059_v19, %v878_v35  ;;  %v4364_v44 = vmul.f32 0.16666667, %v4230_v57  ;;  %v552_v37 = vmax.f32 %v2552_v47, 0.0 }
 0x123   : > { %v908_v25 = vadd.f32 %v4332_v27, %v892_v49  ;;  %v890_v12 = vadd.f32 %v4056_v62, %v874_v16  ;;  %5337 = vst [vmem:[#allocation45_spill] sm:$0xff] %v4361_v20  ;;  %2775 = vmatprep.subr.bf16.mxu0 %v1496_v32  ;;  %v2554_v49 = vadd.f32 -8.0, %v3497_v46  ;;  %v1505_v16 = vunpack.c.l.s8.bf16 %v4356_v29  ;;  %v5339_v32 = vld [vmem:[#allocation27_spill] sm:$0xff] }
 0x124   : > { %5338 = vst [vmem:[#allocation42_spill] sm:$0xff] %v4364_v44  ;;  %v1152_v15 = vmul.f32 0.0004723717, %v904_v39  ;;  %v910_v19 = vadd.f32 %v4364_v44, %v894_v4  ;;  %v556_v35 = vmax.f32 %v2556_v5, 0.0  ;;  %v855_v57 = vmul.f32 0.16666667, %v5339_v32 }
 0x125   : > { %v1156_v54 = vmul.f32 0.0004723717, %v908_v25  ;;  %2794 = vmatpush3.bf16.msra.mxu1 %v1502_v48  ;;  %v906_v62 = vadd.f32 %v4361_v20, %v890_v12  ;;  %v1498_v39 = vunpack.c.h.s8.bf16 %v4324_v10  ;;  %v1514_v25 = vunpack.c.h.s8.bf16 %v4336_v31  ;;  %v5341_v44 = vld [vmem:[#allocation60_spill] sm:$0xff]  ;;  %v4416_v20 = vld [vmem:[%s3368_s19 + $0x2e0] sm:$0xff] }
 0x126   : > { %2795 = vmatprep.subr.bf16.mxu1 %v1511_v51  ;;  %2776 = vmatpush3.bf16.msra.mxu0 %v1488_v36  ;;  %v1158_v47 = vmul.f32 0.0004723717, %v910_v19  ;;  %v1490_v9 = vunpack.c.h.s8.bf16 %v4346_v30  ;;  %v5340_v51 = vld [vmem:[#allocation28_spill] sm:$0xff]  ;;  %v863_v5 = vadd.f32 %v855_v57, %v5341_v44  ;;  %v560_v36 = vmul.f32 %v552_v37, %v552_v37  ;;  %v5344_v30 = vld [vmem:[#allocation31_spill] sm:$0xff] }
 0x127   : > { %v1160_v7 = vpack.c.bf16 %v1156_v54, %v1152_v15  ;;  %v1154_v48 = vmul.f32 0.0004723717, %v906_v62  ;;  %2777 = vmatprep.subr.bf16.mxu0 %v1497_v40  ;;  %v859_v4 = vmul.f32 0.16666667, %v5340_v51  ;;  %v5342_v15 = vunpack.c.l.s8.bf16 %v4310_v1  ;;  %v5343_v40 = vld [vmem:[#allocation61_spill] sm:$0xff] }
 0x128   : > { %v554_v54 = vmax.f32 %v2554_v49, 0.0  ;;  %v4381_v10 = vmax.f32 %v2558_v63, 0.0  ;;  %v564_v62 = vmul.f32 %v556_v35, %v556_v35  ;;  %v871_v32 = vadd.f32 %v863_v5, %v5344_v30  ;;  %v5345_v63 = vld [vmem:[#allocation40_spill] sm:$0xff]  ;;  %v5350_v30 = vld [vmem:[#allocation37_spill] sm:$0xff] }
 0x129   : > { %2005 = vmatprep.mubr.bf16.mxu0 %v1160_v7  ;;  %2796 = vmatpush3.bf16.msra.mxu1 %v5342_v15  ;;  %v1162_v31 = vpack.c.bf16 %v1158_v47, %v1154_v48  ;;  %v867_v19 = vadd.f32 %v859_v4, %v5343_v40  ;;  %v4386_v7 = vmul.f32 0.16666667, %v4254_v6  ;;  %v2551_v57 = vadd.f32 -8.0, %v3507_v55 }
 0x12a   : > { %2797 = vmatprep.subr.bf16.mxu1 %v1512_v26  ;;  %2778 = vmatpush3.bf16.msra.mxu0 %v1489_v13  ;;  %v2555_v44 = vadd.f32 -8.0, %v5269_v11  ;;  %v857_v49 = vmul.f32 0.16666667, %v5280_v50  ;;  %v861_v51 = vmul.f32 0.16666667, %v5345_v63  ;;  %v5346_v26 = vld [vmem:[#allocation32_spill] sm:$0xff]  ;;  %v887_v47 = vadd.f32 %v4064_v60, %v871_v32 }
 0x12b   : > { %2046 = vmatprep.mubr.bf16.mxu1 %v1162_v31  ;;  %2779 = vmatprep.subr.bf16.mxu0 %v1498_v39  ;;  %v875_v48 = vadd.f32 %v867_v19, %v5346_v26  ;;  %v4395_v4 = vmul.f32 0.16666667, %v4256_v24  ;;  %v2553_v5 = vadd.f32 -8.0, %v3546_v2  ;;  %v5348_v13 = vunpack.c.h.s8.bf16 %v4310_v1  ;;  %v5349_v50 = vld [vmem:[#allocation11_spill] sm:$0xff] }
 0x12c   : > { %v562_v15 = vmul.f32 %v554_v54, %v554_v54  ;;  %v2557_v31 = vadd.f32 -8.0, %v5307_v28  ;;  %v865_v40 = vadd.f32 %v857_v49, %v5349_v50  ;;  %v869_v39 = vadd.f32 %v861_v51, %v5350_v30  ;;  %v5352_v50 = vld [vmem:[#allocation49_spill] sm:$0xff] }
 0x12d   : > { %5347 = vst [vmem:[#allocation44_spill] sm:$0xff] %v4395_v4  ;;  %2798 = vmatpush3.bf16.msra.mxu1 %v5348_v13  ;;  %v4403_v60 = vmul.f32 %v560_v36, %v552_v37  ;;  %v566_v19 = vmul.f32 %v4381_v10, %v4381_v10  ;;  %v891_v32 = vadd.f32 %v4067_v8, %v875_v48  ;;  %v551_v26 = vmax.f32 %v2551_v57, 0.0  ;;  %v5351_v13 = vld [vmem:[#allocation48_spill] sm:$0xff]  ;;  %v1295_v30 = vld [vmem:[%s3368_s19 + $0x2a0] sm:$0xff] }
 0x12e   : > { %2799 = vmatprep.subr.bf16.mxu1 %v1513_v0  ;;  %v903_v1 = vadd.f32 %v4386_v7, %v887_v47  ;;  %2780 = vmatpush3.bf16.msra.mxu0 %v1490_v9  ;;  %v4409_v63 = vmul.f32 %v564_v62, %v556_v35  ;;  %v873_v49 = vadd.f32 %v865_v40, %v5351_v13  ;;  %v555_v0 = vmax.f32 %v2555_v44, 0.0  ;;  %v1291_v28 = vld [vmem:[%s3368_s19 + $0x280] sm:$0xff] }
 0x12f   : > { %v877_v51 = vadd.f32 %v869_v39, %v5352_v50  ;;  %v907_v37 = vadd.f32 %v4395_v4, %v891_v32  ;;  %v553_v12 = vmax.f32 %v2553_v5, 0.0  ;;  %v557_v8 = vmax.f32 %v2557_v31, 0.0  ;;  %v1296_v50 = vld [vmem:[%s3368_s19 + $0x2a8] sm:$0xff] }
 0x130   : > { %v1151_v36 = vmul.f32 0.0004723717, %v903_v1  ;;  %v889_v9 = vadd.f32 %v4072_v38, %v873_v49  ;;  %v4422_v62 = vmul.f32 0.16666667, %v4261_v3  ;;  %v4424_v57 = vmul.f32 %v562_v15, %v554_v54  ;;  %v1299_v54 = vld [vmem:[%s3368_s19 + $0x2c0] sm:$0xff] }
 0x131   : > { %2800 = vmatpush3.bf16.msra.mxu1 %v1505_v16  ;;  %v893_v35 = vadd.f32 %v4084_v53, %v877_v51  ;;  %v1155_v44 = vmul.f32 0.0004723717, %v907_v37  ;;  %v4427_v48 = vmul.f32 0.16666667, %v4270_v22  ;;  %v1523_v47 = vunpack.c.l.s8.bf16 %v1295_v30 }
 0x132   : > { %5353 = vst [vmem:[#allocation50_spill] sm:$0xff] %v4422_v62  ;;  %2801 = vmatprep.subr.bf16.mxu1 %v1514_v25  ;;  %5354 = vst [vmem:[#allocation53_spill] sm:$0xff] %v4424_v57  ;;  %v4430_v16 = vmul.f32 -0.6666667, %v4403_v60  ;;  %v905_v38 = vadd.f32 %v4422_v62, %v889_v9  ;;  %v1539_v53 = vunpack.c.l.s8.bf16 %v4416_v20  ;;  %v1515_v5 = vunpack.c.l.s8.bf16 %v1291_v28 }
 0x133   : > { %5355 = vst [vmem:[#allocation13_spill] sm:$0xff] %v4427_v48  ;;  %v559_v31 = vmul.f32 %v551_v26, %v551_v26  ;;  %v563_v40 = vmul.f32 %v555_v0, %v555_v0  ;;  %v1159_v39 = vpack.c.bf16 %v1155_v44, %v1151_v36  ;;  %v909_v25 = vadd.f32 %v4427_v48, %v893_v35  ;;  %v4457_v44 = vld [vmem:[%s3368_s19 + $0x2e8] sm:$0xff]  ;;  %v4482_v48 = vld [vmem:[%s3368_s19 + $0x290] sm:$0xff] }
 0x134   : > { %2809 = vmatprep.subr.bf16.mxu0 %v1523_v47  ;;  %v5356_v15 = vunpack.c.h.s8.bf16 %v4356_v29  ;;  %v561_v32 = vmul.f32 %v553_v12, %v553_v12  ;;  %v565_v1 = vmul.f32 %v557_v8, %v557_v8  ;;  %v1153_v13 = vmul.f32 0.0004723717, %v905_v38 }
 0x135   : > { %v1524_v49 = vunpack.c.h.s8.bf16 %v1295_v30  ;;  %v4441_v51 = vadd.f32 %v4296_v14, %v4223_v42  ;;  %v4444_v37 = vmul.f32 -0.6666667, %v4409_v63  ;;  %v4447_v36 = vmul.f32 %v566_v19, %v4381_v10  ;;  %2006 = vmatmul.mubr.bf16.vlgmr.msra.gmra.mrb[16].mxu0 %v1159_v39  ;;  %v1292_v10 = vld [vmem:[%s3368_s19 + $0x288] sm:$0xff] }
 0x136   : > { %2802 = vmatpush3.bf16.msra.mxu1 %v5356_v15  ;;  %v1157_v29 = vmul.f32 0.0004723717, %v909_v25  ;;  %v4451_v9 = vadd.f32 %v4430_v16, %v4329_v33  ;;  %v4454_v30 = vmul.f32 -0.6666667, %v4424_v57  ;;  %2810 = vmatpush3.bf16.msra.mxu0 %v1515_v5  ;;  %v1531_v42 = vunpack.c.l.s8.bf16 %v1299_v54  ;;  %v4461_v19 = vld [vmem:[%s3368_s19 + $0x2c8] sm:$0xff]  ;;  %v4476_v15 = vld [vmem:[%s3368_s19 + $0x2b0] sm:$0xff] }
 0x137   : > { %5357 = vst [vmem:[#allocation14_spill] sm:$0xff] %v4441_v51  ;;  %5358 = vst [vmem:[#allocation56_spill] sm:$0xff] %v4447_v36  ;;  %2831 = vmatprep.subr.bf16.mxu1 %v1539_v53  ;;  %v1516_v35 = vunpack.c.h.s8.bf16 %v1291_v28  ;;  %v4464_v47 = vmul.f32 -0.6666667, %v4447_v36  ;;  %2811 = vmatprep.subr.bf16.mxu0 %v1524_v49  ;;  %v1540_v33 = vunpack.c.h.s8.bf16 %v4416_v20  ;;  %v1525_v53 = vunpack.c.l.s8.bf16 %v1296_v50 }
 0x138   : > { %5359 = vst [vmem:[#allocation57_spill] sm:$0xff] %v4451_v9  ;;  %v1161_v38 = vpack.c.bf16 %v1157_v29, %v1153_v13  ;;  %v4467_v39 = vmul.f32 %v559_v31, %v551_v26  ;;  %v4469_v5 = vmul.f32 %v563_v40, %v555_v0  ;;  %v4471_v25 = vmul.f32 %v561_v32, %v553_v12  ;;  %v4479_v9 = vld [vmem:[%s3368_s19 + $0x2f0] sm:$0xff]  ;;  %v5361_v29 = vld [vmem:[#allocation21_spill] sm:$0xff] }
 0x139   : > { %v4473_v28 = vmul.f32 %v565_v1, %v557_v8  ;;  %v1532_v13 = vunpack.c.h.s8.bf16 %v1299_v54  ;;  %v1541_v49 = vunpack.c.l.s8.bf16 %v4457_v44  ;;  %v1517_v20 = vunpack.c.l.s8.bf16 %v1292_v10 }
 0x13a   : > { %2047 = vmatmul.mubr.bf16.vlgmr.msra.gmra.mrb[16].mxu1 %v1161_v38  ;;  %v1533_v26 = vunpack.c.l.s8.bf16 %v4461_v19  ;;  %2812 = vmatpush3.bf16.msra.mxu0 %v1516_v35  ;;  %v1526_v0 = vunpack.c.h.s8.bf16 %v1296_v50  ;;  %v1542_v12 = vunpack.c.h.s8.bf16 %v4457_v44  ;;  %v1518_v8 = vunpack.c.h.s8.bf16 %v1292_v10  ;;  %v5362_v50 = vld [vmem:[#allocation22_spill] sm:$0xff]  ;;  %v5364_v38 = vld [vmem:[#allocation51_spill] sm:$0xff] }
 0x13b   : > { %5360 = vst [vmem:[#allocation23_spill] sm:$0xff] %v4473_v28  ;;  %2832 = vmatpush3.bf16.msra.mxu1 %v1531_v42  ;;  %v1534_v31 = vunpack.c.h.s8.bf16 %v4461_v19  ;;  %2813 = vmatprep.subr.bf16.mxu0 %v1525_v53  ;;  %v1527_v40 = vunpack.c.l.s8.bf16 %v4476_v15  ;;  %v1543_v32 = vunpack.c.l.s8.bf16 %v4479_v9  ;;  %v1519_v54 = vunpack.c.l.s8.bf16 %v4482_v48  ;;  %v5363_v19 = vld [vmem:[#allocation38_spill] sm:$0xff]  ;;  %v5365_v53 = vld [vmem:[#allocation52_spill] sm:$0xff] }
 0x13c   : > { %2833 = vmatprep.subr.bf16.mxu1 %v1540_v33  ;;  %v1528_v1 = vunpack.c.h.s8.bf16 %v4476_v15  ;;  %v920_v42 = vadd.f32 %v5361_v29, %v3984_v59  ;;  %v924_v35 = vadd.f32 %v5362_v50, %v4002_v41  ;;  %v944_v44 = vmul.f32 0.16666667, %v4403_v60  ;;  %v5366_v29 = vld [vmem:[#allocation35_spill] sm:$0xff] }
 0x13d   : > { %v948_v10 = vmul.f32 0.16666667, %v4409_v63  ;;  %v922_v33 = vadd.f32 %v5364_v38, %v5363_v19  ;;  %v926_v62 = vadd.f32 %v5365_v53, %v4047_v52  ;;  %v946_v4 = vmul.f32 0.16666667, %v4424_v57  ;;  %v5367_v38 = vld [vmem:[#allocation62_spill] sm:$0xff]  ;;  %v5368_v53 = vld [vmem:[#allocation36_spill] sm:$0xff] }
 0x13e   : > { %v950_v15 = vmul.f32 0.16666667, %v4447_v36  ;;  %2814 = vmatpush3.bf16.msra.mxu0 %v1517_v20  ;;  %v936_v59 = vadd.f32 %v4234_v61, %v920_v42  ;;  %v940_v41 = vadd.f32 %v4240_v18, %v924_v35  ;;  %v919_v50 = vadd.f32 %v5366_v29, %v4050_v23  ;;  %v5369_v18 = vld [vmem:[#allocation20_spill] sm:$0xff]  ;;  %v5370_v23 = vld [vmem:[#allocation63_spill] sm:$0xff]  ;;  %v5371_v35 = vld [vmem:[#allocation54_spill] sm:$0xff] }
 0x13f   : > { %2834 = vmatpush3.bf16.msra.mxu1 %v1532_v13  ;;  %v943_v51 = vmul.f32 0.16666667, %v4467_v39  ;;  %2815 = vmatprep.subr.bf16.mxu0 %v1526_v0  ;;  %v938_v19 = vadd.f32 %v4243_v21, %v922_v33  ;;  %v942_v52 = vadd.f32 %v4259_v43, %v926_v62  ;;  %v923_v36 = vadd.f32 %v5368_v53, %v5367_v38  ;;  %v5372_v57 = vld [vmem:[#allocation26_spill] sm:$0xff]  ;;  %v5373_v33 = vld [vmem:[#allocation64_spill] sm:$0xff]  ;;  %v5374_v43 = vld [vmem:[#allocation55_spill] sm:$0xff] }
 0x140   : > { %2835 = vmatprep.subr.bf16.mxu1 %v1541_v49  ;;  %v947_v13 = vmul.f32 0.16666667, %v4469_v5  ;;  %v952_v20 = vadd.f32 %v944_v44, %v936_v59  ;;  %v956_v61 = vadd.f32 %v948_v10, %v940_v41  ;;  %v935_v42 = vadd.f32 %v5369_v18, %v919_v50  ;;  %v5375_v59 = vld [vmem:[#allocation33_spill] sm:$0xff]  ;;  %v4522_v41 = vld [vmem:[%s3368_s19 + $0x2d0] sm:$0xff]  ;;  %v4525_v50 = vld [vmem:[%s3368_s19 + $0x2b8] sm:$0xff] }
 0x141   : > { %v921_v29 = vadd.f32 %v5371_v35, %v5370_v23  ;;  %v954_v49 = vadd.f32 %v946_v4, %v938_v19  ;;  %v958_v0 = vadd.f32 %v950_v15, %v942_v52  ;;  %v939_v21 = vadd.f32 %v5372_v57, %v923_v36  ;;  %v4546_v18 = vld [vmem:[%s3368_s19 + $0x298] sm:$0xff] }
 0x142   : > { %v925_v62 = vadd.f32 %v5374_v43, %v5373_v33  ;;  %2816 = vmatpush3.bf16.msra.mxu0 %v1518_v8  ;;  %v1164_v38 = vmul.f32 0.00045815864, %v952_v20  ;;  %v1168_v53 = vmul.f32 0.00045815864, %v956_v61  ;;  %v951_v44 = vadd.f32 %v943_v51, %v935_v42  ;;  %v4543_v61 = vld [vmem:[%s3368_s19 + $0x2f8] sm:$0xff] }
 0x143   : > { %2836 = vmatpush3.bf16.msra.mxu1 %v1533_v26  ;;  %v937_v10 = vadd.f32 %v5375_v59, %v921_v29  ;;  %2817 = vmatprep.subr.bf16.mxu0 %v1527_v40  ;;  %v1166_v4 = vmul.f32 0.00045815864, %v954_v49  ;;  %v1170_v15 = vmul.f32 0.00045815864, %v958_v0  ;;  %v955_v57 = vadd.f32 %v947_v13, %v939_v21  ;;  %v4549_v42 = vld [vmem:[%s3368_s19 + $0x2d8] sm:$0xff]  ;;  %v4559_v49 = vld [vmem:[%s3368_s19 + $0x320] sm:$0xff] }
 0x144   : > { %2837 = vmatprep.subr.bf16.mxu1 %v1542_v12  ;;  %v941_v36 = vadd.f32 %v4296_v14, %v925_v62  ;;  %v1172_v26 = vpack.c.bf16 %v1168_v53, %v1164_v38  ;;  %v4528_v8 = vmul.f32 0.00045815864, %v951_v44  ;;  %v945_v51 = vmul.f32 0.16666667, %v4471_v25  ;;  %v4562_v0 = vld [vmem:[%s3368_s19 + $0x360] sm:$0xff] }
 0x145   : > { %v949_v12 = vmul.f32 0.16666667, %v4473_v28  ;;  %v4533_v40 = vmul.f32 -0.6666667, %v4467_v39  ;;  %v4536_v19 = vmul.f32 -0.6666667, %v4469_v5  ;;  %v1174_v52 = vpack.c.bf16 %v1170_v15, %v1166_v4 }
 0x146   : > { %v4538_v20 = vmul.f32 0.00045815864, %v955_v57  ;;  %2818 = vmatpush3.bf16.msra.mxu0 %v1519_v54  ;;  %v1535_v14 = vunpack.c.l.s8.bf16 %v4522_v41  ;;  %v1520_v13 = vunpack.c.h.s8.bf16 %v4482_v48  ;;  %v953_v23 = vadd.f32 %v945_v51, %v937_v10  ;;  %v4565_v21 = vld [vmem:[%s3368_s19 + $0x300] sm:$0xff]  ;;  %2087 = vmatprep.mubr.bf16.mxu0 %v1172_v26  ;;  %v4591_v4 = vld [vmem:[%s3368_s19 + $0x328] sm:$0xff] }
 0x147   : > { %2838 = vmatpush3.bf16.msra.mxu1 %v1534_v31  ;;  %v957_v35 = vadd.f32 %v949_v12, %v941_v36  ;;  %v4552_v29 = vmul.f32 -0.6666667, %v4471_v25  ;;  %2819 = vmatprep.subr.bf16.mxu0 %v1528_v1  ;;  %v1544_v31 = vunpack.c.h.s8.bf16 %v4479_v9  ;;  %v1529_v54 = vunpack.c.l.s8.bf16 %v4525_v50  ;;  %v4583_v53 = vld [vmem:[%s3368_s19 + $0x340] sm:$0xff]  ;;  %v4594_v15 = vld [vmem:[%s3368_s19 + $0x368] sm:$0xff] }
 0x148   : > { %2839 = vmatprep.subr.bf16.mxu1 %v1543_v32  ;;  %v4569_v33 = vadd.f32 %v4444_v37, %v4332_v27  ;;  %v4572_v32 = vmul.f32 -0.6666667, %v4473_v28  ;;  %2128 = vmatprep.mubr.bf16.mxu1 %v1174_v52  ;;  %v4574_v9 = vmul.f32 0.00045815864, %v953_v23  ;;  %v1536_v43 = vunpack.c.h.s8.bf16 %v4522_v41  ;;  %v4597_v57 = vld [vmem:[%s3368_s19 + $0x308] sm:$0xff]  ;;  %v5377_v23 = vld [vmem:[#allocation39_spill] sm:$0xff] }
 0x149   : > { %v4576_v1 = vmul.f32 0.00045815864, %v957_v35  ;;  %v1545_v62 = vunpack.c.l.s8.bf16 %v4543_v61  ;;  %v1521_v38 = vunpack.c.l.s8.bf16 %v4546_v18  ;;  %v1537_v27 = vunpack.c.l.s8.bf16 %v4549_v42  ;;  %v4604_v12 = vld [vmem:[%s3368_s19 + $0x348] sm:$0xff]  ;;  %v5379_v35 = vld [vmem:[#allocation16_spill] sm:$0xff] }
 0x14a   : > { %5376 = vst [vmem:[#allocation24_spill] sm:$0xff] %v4569_v33  ;;  %2820 = vmatpush3.bf16.msra.mxu0 %v1520_v13  ;;  %v1530_v44 = vunpack.c.h.s8.bf16 %v4525_v50  ;;  %v1546_v59 = vunpack.c.h.s8.bf16 %v4543_v61  ;;  %v1522_v10 = vunpack.c.h.s8.bf16 %v4546_v18  ;;  %v1538_v36 = vunpack.c.h.s8.bf16 %v4549_v42  ;;  %v5381_v13 = vld [vmem:[#allocation17_spill] sm:$0xff] }
 0x14b   : > { %2840 = vmatpush3.bf16.msra.mxu1 %v1535_v14  ;;  %2821 = vmatprep.subr.bf16.mxu0 %v1529_v54  ;;  %v1555_v26 = vunpack.c.l.s8.bf16 %v4559_v49  ;;  %v1571_v50 = vunpack.c.l.s8.bf16 %v4562_v0  ;;  %v1547_v51 = vunpack.c.l.s8.bf16 %v4565_v21  ;;  %v1556_v14 = vunpack.c.h.s8.bf16 %v4559_v49  ;;  %v5380_v49 = vld [vmem:[#allocation66_spill] sm:$0xff] }
 0x14c   : > { %2841 = vmatprep.subr.bf16.mxu1 %v1544_v31  ;;  %v2560_v18 = vadd.f32 -9.0, %v3492_v34  ;;  %v2564_v42 = vadd.f32 -9.0, %v3495_v45  ;;  %v968_v61 = vadd.f32 %v5377_v23, %v4204_v56  ;;  %v2562_v31 = vadd.f32 -9.0, %v3497_v46 }
 0x14d   : > { %v2566_v54 = vadd.f32 -9.0, %v3499_v17  ;;  %v970_v52 = vadd.f32 %v5380_v49, %v5379_v35 }
 0x14e   : > { %2822 = vmatpush3.bf16.msra.mxu0 %v1521_v38  ;;  %v584_v41 = vmax.f32 %v2560_v18, 0.0  ;;  %v588_v48 = vmax.f32 %v2564_v42, 0.0  ;;  %v984_v33 = vadd.f32 %v4430_v16, %v968_v61  ;;  %v586_v56 = vmax.f32 %v2562_v31, 0.0 }
 0x14f   : > { %2842 = vmatpush3.bf16.msra.mxu1 %v1536_v43  ;;  %2823 = vmatprep.subr.bf16.mxu0 %v1530_v44  ;;  %v5378_v43 = vld [vmem:[#allocation65_spill] sm:$0xff]  ;;  %v986_v23 = vadd.f32 %v4454_v30, %v970_v52  ;;  %v2563_v18 = vadd.f32 -9.0, %v5269_v11  ;;  %v5385_v52 = vpack.c.bf16 %v4538_v20, %v4528_v8 }
 0x150   : > { %2843 = vmatprep.subr.bf16.mxu1 %v1545_v62  ;;  %v972_v38 = vadd.f32 %v5378_v43, %v4208_v58  ;;  %v5382_v62 = vld [vmem:[#allocation67_spill] sm:$0xff]  ;;  %v590_v58 = vmax.f32 %v2566_v54, 0.0  ;;  %v592_v35 = vmul.f32 %v584_v41, %v584_v41  ;;  %v596_v49 = vmul.f32 %v588_v48, %v588_v48 }
 0x151   : > { %v974_v44 = vadd.f32 %v5382_v62, %v5381_v13  ;;  %v2559_v13 = vadd.f32 -9.0, %v3507_v55  ;;  %v594_v42 = vmul.f32 %v586_v56, %v586_v56  ;;  %v587_v54 = vmax.f32 %v2563_v18, 0.0 }
 0x152   : > { %v988_v28 = vadd.f32 %v4444_v37, %v972_v38  ;;  %2824 = vmatpush3.bf16.msra.mxu0 %v1522_v10  ;;  %v598_v16 = vmul.f32 %v590_v58, %v590_v58  ;;  %v5383_v37 = vld [vmem:[#allocation68_spill] sm:$0xff]  ;;  %v5384_v10 = vld [vmem:[#allocation69_spill] sm:$0xff]  ;;  %v5388_v18 = vunpack.c.l.s8.bf16 %v4583_v53 }
 0x153   : > { %2844 = vmatpush3.bf16.msra.mxu1 %v1537_v27  ;;  %v990_v43 = vadd.f32 %v4464_v47, %v974_v44  ;;  %2853 = vmatprep.subr.bf16.mxu0 %v1555_v26  ;;  %v967_v27 = vadd.f32 %v5383_v37, %v4254_v6  ;;  %v971_v61 = vadd.f32 %v5384_v10, %v4256_v24  ;;  %v583_v31 = vmax.f32 %v2559_v13, 0.0 }
 0x154   : > { %2845 = vmatprep.subr.bf16.mxu1 %v1546_v59  ;;  %v4643_v59 = vmul.f32 %v592_v35, %v584_v41  ;;  %v4645_v26 = vmul.f32 %v596_v49, %v588_v48  ;;  %v4647_v38 = vmul.f32 %v594_v42, %v586_v56  ;;  %v4649_v62 = vmul.f32 %v598_v16, %v590_v58  ;;  %v5386_v56 = vld [vmem:[#allocation12_spill] sm:$0xff]  ;;  %v4671_v16 = vld [vmem:[%s3368_s19 + $0x330] sm:$0xff] }
 0x155   : > { %2088 = vmatmul.mubr.bf16.vlgmr.msra.gmra.mrb[20].mxu0 %v5385_v52  ;;  %v983_v6 = vadd.f32 %v4533_v40, %v967_v27  ;;  %v2561_v24 = vadd.f32 -9.0, %v3546_v2  ;;  %v591_v48 = vmul.f32 %v583_v31, %v583_v31  ;;  %v595_v41 = vmul.f32 %v587_v54, %v587_v54 }
 0x156   : > { %2854 = vmatpush3.bf16.msra.mxu0 %v1547_v51  ;;  %v992_v8 = vmul.f32 0.16666667, %v4643_v59  ;;  %v996_v20 = vmul.f32 0.16666667, %v4645_v26  ;;  %v998_v51 = vmul.f32 0.16666667, %v4649_v62  ;;  %v987_v44 = vadd.f32 %v4536_v19, %v971_v61 }
 0x157   : > { %2846 = vmatpush3.bf16.msra.mxu1 %v1538_v36  ;;  %2855 = vmatprep.subr.bf16.mxu0 %v1556_v14  ;;  %v994_v36 = vmul.f32 0.16666667, %v4647_v38  ;;  %v2565_v58 = vadd.f32 -9.0, %v5386_v56  ;;  %v5387_v35 = vpack.c.bf16 %v4576_v1, %v4574_v9  ;;  %v4662_v49 = vmul.f32 %v591_v48, %v583_v31  ;;  %v5393_v48 = vld [vmem:[#allocation71_spill] sm:$0xff] }
 0x158   : > { %2875 = vmatprep.subr.bf16.mxu1 %v1571_v50  ;;  %v1000_v50 = vadd.f32 %v992_v8, %v984_v33  ;;  %v1004_v14 = vadd.f32 %v996_v20, %v988_v28  ;;  %v4664_v13 = vmul.f32 %v595_v41, %v587_v54  ;;  %v5389_v42 = vunpack.c.h.s8.bf16 %v4565_v21  ;;  %v5392_v21 = vld [vmem:[#allocation70_spill] sm:$0xff] }
 0x159   : > { %v1002_v37 = vadd.f32 %v994_v36, %v986_v23  ;;  %v1006_v27 = vadd.f32 %v998_v51, %v990_v43  ;;  %v585_v10 = vmax.f32 %v2561_v24, 0.0  ;;  %v589_v61 = vmax.f32 %v2565_v58, 0.0 }
 0x15a   : > { %2129 = vmatmul.mubr.bf16.vlgmr.msra.gmra.mrb[20].mxu1 %v5387_v35  ;;  %2856 = vmatpush3.bf16.msra.mxu0 %v5389_v42  ;;  %v5390_v9 = vunpack.c.h.s8.bf16 %v4562_v0  ;;  %v5391_v28 = vunpack.c.l.s8.bf16 %v4591_v4  ;;  %v1176_v33 = vmul.f32 0.00048103163, %v1000_v50  ;;  %v1180_v1 = vmul.f32 0.00048103163, %v1004_v14  ;;  %v4691_v35 = vld [vmem:[%s3368_s19 + $0x370] sm:$0xff] }
 0x15b   : > { %2876 = vmatpush3.bf16.msra.mxu1 %v5388_v18  ;;  %v991_v52 = vmul.f32 0.16666667, %v4662_v49  ;;  %v969_v31 = vadd.f32 %v5392_v21, %v4261_v3  ;;  %v1178_v54 = vmul.f32 0.00048103163, %v1002_v37  ;;  %v1182_v8 = vmul.f32 0.00048103163, %v1006_v27 }
 0x15c   : > { %2877 = vmatprep.subr.bf16.mxu1 %v5390_v9  ;;  %2857 = vmatprep.subr.bf16.mxu0 %v5391_v28  ;;  %v995_v23 = vmul.f32 0.16666667, %v4664_v13  ;;  %v593_v43 = vmul.f32 %v585_v10, %v585_v10  ;;  %v1184_v24 = vpack.c.bf16 %v1180_v1, %v1176_v33  ;;  %v597_v20 = vmul.f32 %v589_v61, %v589_v61  ;;  %v4703_v37 = vld [vmem:[%s3368_s19 + $0x350] sm:$0xff]  ;;  %v5398_v33 = vld [vmem:[#allocation45_spill] sm:$0xff] }
 0x15d   : > { %v999_v0 = vadd.f32 %v991_v52, %v983_v6  ;;  %v973_v41 = vadd.f32 %v5393_v48, %v4270_v22  ;;  %v5394_v51 = vunpack.c.h.s8.bf16 %v4583_v53  ;;  %v5395_v3 = vunpack.c.l.s8.bf16 %v4597_v57  ;;  %v4700_v53 = vld [vmem:[%s3368_s19 + $0x310] sm:$0xff]  ;;  %v4742_v48 = vld [vmem:[%s3368_s19 + $0x318] sm:$0xff] }
 0x15e   : > { %v4683_v36 = vpop.f32.mrb[0].mxu0  ;;  %v1559_v58 = vunpack.c.l.s8.bf16 %v4671_v16  ;;  %v1186_v50 = vpack.c.bf16 %v1182_v8, %v1178_v54  ;;  %v1003_v14 = vadd.f32 %v995_v23, %v987_v44  ;;  %v4693_v18 = vmul.f32 %v593_v43, %v585_v10  ;;  %2169 = vmatprep.mubr.bf16.mxu0 %v1184_v24  ;;  %v4729_v23 = vld [vmem:[%s3368_s19 + $0x338] sm:$0xff] }
 0x15f   : > { %2878 = vmatpush3.bf16.msra.mxu1 %v5394_v51  ;;  %2858 = vmatpush3.bf16.msra.mxu0 %v5395_v3  ;;  %v2606_v6 = vpop.f32.mrb[1].mxu0  ;;  %v5396_v42 = vunpack.c.l.s8.bf16 %v4594_v15  ;;  %v5397_v22 = vunpack.c.h.s8.bf16 %v4591_v4  ;;  %v4705_v27 = vmul.f32 0.00048103163, %v999_v0  ;;  %v4707_v9 = vmul.f32 %v597_v20, %v589_v61  ;;  %v5399_v4 = vld [vmem:[#allocation42_spill] sm:$0xff] }
 0x160   : > { %v985_v44 = vadd.f32 %v4552_v29, %v969_v31  ;;  %v989_v10 = vadd.f32 %v4572_v32, %v973_v41  ;;  %v2608_v28 = vpop.f32.mrb[2].mxu0  ;;  %v4713_v1 = vadd.f32 %v4454_v30, %v5398_v33  ;;  %v4717_v52 = vadd.f32 %v4464_v47, %v5399_v4  ;;  %2210 = vmatprep.mubr.bf16.mxu1 %v1186_v50  ;;  %v4732_v47 = vld [vmem:[%s3368_s19 + $0x378] sm:$0xff] }
 0x161   : > { %2879 = vmatprep.subr.bf16.mxu1 %v5396_v42  ;;  %2859 = vmatprep.subr.bf16.mxu0 %v5397_v22  ;;  %v4719_v21 = vmul.f32 0.00048103163, %v1003_v14  ;;  %v993_v61 = vmul.f32 0.16666667, %v4693_v18  ;;  %v2609_v31 = vpop.f32.mrb[3].mxu0  ;;  %v4724_v54 = vadd.f32 %v4533_v40, %v4386_v7  ;;  %v1566_v30 = vunpack.c.h.s8.bf16 %v4604_v12  ;;  %v2627_v24 = vpop.f32.mrb[0].mxu1 }
 0x162   : > { %5400 = vst [vmem:[#allocation15_spill] sm:$0xff] %v4717_v52  ;;  %v1575_v8 = vunpack.c.l.s8.bf16 %v4691_v35  ;;  %v997_v43 = vmul.f32 0.16666667, %v4707_v9  ;;  %v5402_v0 = vunpack.c.l.s8.bf16 %v4604_v12  ;;  %v5403_v20 = vunpack.c.h.s8.bf16 %v4597_v57  ;;  %v4745_v41 = vld [vmem:[%s3368_s19 + $0x358] sm:$0xff]  ;;  %v2628_v50 = vpop.f32.mrb[1].mxu1  ;;  %v4793_v52 = vld [vmem:[%s3368_s19 + $0x388] sm:$0xff] }
 0x163   : > { %5401 = vst [vmem:[#allocation18_spill] sm:$0xff] %v4724_v54  ;;  %v1551_v7 = vunpack.c.l.s8.bf16 %v4700_v53  ;;  %v1567_v40 = vunpack.c.l.s8.bf16 %v4703_v37  ;;  %v1001_v3 = vadd.f32 %v993_v61, %v985_v44  ;;  %v5404_v12 = vunpack.c.h.s8.bf16 %v4594_v15  ;;  %v2630_v33 = vpop.f32.mrb[2].mxu1  ;;  %v4760_v15 = vld [vmem:[%s3368_s19 + $0x3a0] sm:$0xff] }
 0x164   : > { %2880 = vmatpush3.bf16.msra.mxu1 %v5402_v0  ;;  %2860 = vmatpush3.bf16.msra.mxu0 %v5403_v20  ;;  %v1560_v57 = vunpack.c.h.s8.bf16 %v4671_v16  ;;  %v1576_v14 = vunpack.c.h.s8.bf16 %v4691_v35  ;;  %v1552_v42 = vunpack.c.h.s8.bf16 %v4700_v53  ;;  %v1005_v22 = vadd.f32 %v997_v43, %v989_v10  ;;  %v2631_v16 = vpop.f32.mrb[3].mxu1  ;;  %v4771_v10 = vld [vmem:[%s3368_s19 + $0x380] sm:$0xff] }
 0x165   : > { %2881 = vmatprep.subr.bf16.mxu1 %v5404_v12  ;;  %2861 = vmatprep.subr.bf16.mxu0 %v1559_v58  ;;  %v1568_v4 = vunpack.c.h.s8.bf16 %v4703_v37  ;;  %v1561_v0 = vunpack.c.l.s8.bf16 %v4729_v23  ;;  %v1577_v44 = vunpack.c.l.s8.bf16 %v4732_v47  ;;  %v4757_v61 = vmul.f32 0.00048103163, %v1001_v3  ;;  %v4763_v58 = vld [vmem:[%s3368_s19 + $0x3e0] sm:$0xff] }
 0x166   : > { %v1553_v35 = vunpack.c.l.s8.bf16 %v4742_v48  ;;  %v1562_v53 = vunpack.c.h.s8.bf16 %v4729_v23  ;;  %v4768_v37 = vmul.f32 0.00048103163, %v1005_v22  ;;  %v4774_v43 = vld [vmem:[%s3368_s19 + $0x3c0] sm:$0xff]  ;;  %v1554_v12 = vunpack.c.h.s8.bf16 %v4742_v48 }
 0x167   : > { %v2607_v20 = vadd.f32 %v2606_v6, %v4683_v36  ;;  %v1587_v22 = vunpack.c.l.s8.bf16 %v4760_v15  ;;  %v2629_v3 = vadd.f32 %v2628_v50, %v2627_v24  ;;  %v2610_v36 = vadd.f32 %v2609_v31, %v2608_v28  ;;  %v5409_v50 = vld [vmem:[#allocation53_spill] sm:$0xff] }
 0x168   : > { %2882 = vmatpush3.bf16.msra.mxu1 %v1566_v30  ;;  %2862 = vmatpush3.bf16.msra.mxu0 %v1551_v7  ;;  %v4785_v30 = vld [vmem:[%s3368_s19 + $0x3a8] sm:$0xff]  ;;  %v2632_v6 = vadd.f32 %v2631_v16, %v2630_v33  ;;  %v2568_v33 = vadd.f32 -10.0, %v3492_v34  ;;  %v2572_v16 = vadd.f32 -10.0, %v3495_v45  ;;  %v1024_v51 = vmul.f32 -0.6666667, %v4643_v59 }
 0x169   : > { %2883 = vmatprep.subr.bf16.mxu1 %v1575_v8  ;;  %2863 = vmatprep.subr.bf16.mxu0 %v1560_v57  ;;  %v4788_v7 = vld [vmem:[%s3368_s19 + $0x3e8] sm:$0xff]  ;;  %v4798_v54 = vadd.f32 %v2629_v3, %v2607_v20  ;;  %v5408_v20 = vld [vmem:[#allocation19_spill] sm:$0xff]  ;;  %v2574_v31 = vadd.f32 -10.0, %v3499_v17  ;;  %v5410_v57 = vld [vmem:[#allocation29_spill] sm:$0xff] }
 0x16a   : > { %v4803_v48 = vadd.f32 %v2632_v6, %v2610_v36  ;;  %v1020_v3 = vadd.f32 %v5408_v20, %v4409_v63  ;;  %v1028_v36 = vmul.f32 -0.6666667, %v4645_v26  ;;  %v2570_v6 = vadd.f32 -10.0, %v3497_v46  ;;  %v5412_v8 = vld [vmem:[#allocation30_spill] sm:$0xff] }
 0x16b   : > { %5405 = vst [vmem:[#allocation58_spill] sm:$0xff] %v4798_v54  ;;  %v1030_v54 = vmul.f32 -0.6666667, %v4649_v62 }
 0x16c   : > { %2884 = vmatpush3.bf16.msra.mxu1 %v1567_v40  ;;  %2864 = vmatpush3.bf16.msra.mxu0 %v1552_v42  ;;  %5406 = vst [vmem:[#allocation59_spill] sm:$0xff] %v4803_v48  ;;  %v5407_v40 = vld [vmem:[#allocation25_spill] sm:$0xff]  ;;  %v1036_v24 = vadd.f32 %v1028_v36, %v1020_v3  ;;  %v618_v23 = vmax.f32 %v2570_v6, 0.0  ;;  %v5415_v6 = vunpack.c.h.s8.bf16 %v4732_v47 }
 0x16d   : > { %2885 = vmatprep.subr.bf16.mxu1 %v1576_v14  ;;  %2865 = vmatprep.subr.bf16.mxu0 %v1561_v0  ;;  %v1016_v42 = vadd.f32 %v5407_v40, %v4403_v60  ;;  %v616_v14 = vmax.f32 %v2568_v33, 0.0  ;;  %v620_v0 = vmax.f32 %v2572_v16, 0.0  ;;  %v1018_v60 = vadd.f32 %v5410_v57, %v5409_v50  ;;  %v5411_v16 = vld [vmem:[#allocation56_spill] sm:$0xff] }
 0x16e   : > { %v1026_v40 = vmul.f32 -0.6666667, %v4647_v38  ;;  %v622_v33 = vmax.f32 %v2574_v31, 0.0  ;;  %v1022_v48 = vadd.f32 %v5412_v8, %v5411_v16  ;;  %v626_v57 = vmul.f32 %v618_v23, %v618_v23  ;;  %v5414_v8 = vld [vmem:[#allocation34_spill] sm:$0xff] }
 0x16f   : > { %v1032_v28 = vadd.f32 %v1024_v51, %v1016_v42  ;;  %v624_v63 = vmul.f32 %v616_v14, %v616_v14  ;;  %v628_v20 = vmul.f32 %v620_v0, %v620_v0  ;;  %v2567_v51 = vadd.f32 -10.0, %v3507_v55 }
 0x170   : > { %2886 = vmatpush3.bf16.msra.mxu1 %v1568_v4  ;;  %2866 = vmatpush3.bf16.msra.mxu0 %v1553_v35  ;;  %v1034_v4 = vadd.f32 %v1026_v40, %v1018_v60  ;;  %v630_v50 = vmul.f32 %v622_v33, %v622_v33  ;;  %v2571_v31 = vadd.f32 -10.0, %v5269_v11  ;;  %v1015_v36 = vadd.f32 %v5414_v8, %v4467_v39 }
 0x171   : > { %2887 = vmatprep.subr.bf16.mxu1 %v1577_v44  ;;  %2867 = vmatprep.subr.bf16.mxu0 %v1562_v53  ;;  %v4824_v35 = vmul.f32 %v624_v63, %v616_v14  ;;  %v4826_v42 = vmul.f32 %v628_v20, %v620_v0  ;;  %v5413_v44 = vunpack.c.l.s8.bf16 %v4745_v41  ;;  %v1038_v53 = vadd.f32 %v1030_v54, %v1022_v48  ;;  %v5416_v48 = vld [vmem:[#allocation41_spill] sm:$0xff] }
 0x172   : > { %v615_v3 = vmax.f32 %v2567_v51, 0.0  ;;  %v4837_v60 = vmul.f32 %v626_v57, %v618_v23  ;;  %v4839_v40 = vmul.f32 %v630_v50, %v622_v33  ;;  %v1019_v63 = vadd.f32 %v5416_v48, %v4469_v5 }
 0x173   : > { %v1040_v14 = vmul.f32 0.16666667, %v4824_v35  ;;  %v1044_v0 = vmul.f32 0.16666667, %v4826_v42  ;;  %v1023_v20 = vmul.f32 -0.6666667, %v4662_v49  ;;  %v5417_v39 = vpack.c.bf16 %v4719_v21, %v4705_v27 }
 0x174   : > { %2888 = vmatpush3.bf16.msra.mxu1 %v5413_v44  ;;  %2868 = vmatpush3.bf16.msra.mxu0 %v1554_v12  ;;  %v619_v12 = vmax.f32 %v2571_v31, 0.0  ;;  %v623_v54 = vmul.f32 %v615_v3, %v615_v3  ;;  %v1042_v16 = vmul.f32 0.16666667, %v4837_v60  ;;  %v1046_v23 = vmul.f32 0.16666667, %v4839_v40 }
 0x175   : > { %2889 = vmatprep.subr.bf16.mxu1 %v5415_v6  ;;  %2897 = vmatprep.subr.bf16.mxu0 %v1587_v22  ;;  %v1048_v47 = vadd.f32 %v1040_v14, %v1032_v28  ;;  %v1052_v22 = vadd.f32 %v1044_v0, %v1036_v24  ;;  %v5418_v33 = vunpack.c.h.s8.bf16 %v4745_v41  ;;  %v5419_v51 = vunpack.c.l.s8.bf16 %v4771_v10 }
 0x176   : > { %v627_v57 = vmul.f32 %v619_v12, %v619_v12  ;;  %v4853_v5 = vmul.f32 %v623_v54, %v615_v3  ;;  %v1027_v50 = vmul.f32 -0.6666667, %v4664_v13  ;;  %v1031_v44 = vadd.f32 %v1023_v20, %v1015_v36 }
 0x177   : > { %2170 = vmatmul.mubr.bf16.vlgmr.msra.gmra.mrb[24].mxu0 %v5417_v39  ;;  %v5420_v27 = vunpack.c.l.s8.bf16 %v4763_v58  ;;  %v5421_v21 = vunpack.c.h.s8.bf16 %v4760_v15  ;;  %v1188_v24 = vmul.f32 0.000511682, %v1048_v47  ;;  %v1192_v28 = vmul.f32 0.000511682, %v1052_v22 }
 0x178   : > { %2890 = vmatpush3.bf16.msra.mxu1 %v5418_v33  ;;  %2898 = vmatpush3.bf16.msra.mxu0 %v5419_v51  ;;  %v1050_v41 = vadd.f32 %v1042_v16, %v1034_v4  ;;  %v1054_v31 = vadd.f32 %v1046_v23, %v1038_v53  ;;  %v4860_v8 = vmul.f32 %v627_v57, %v619_v12  ;;  %v1039_v3 = vmul.f32 0.16666667, %v4853_v5  ;;  %v4873_v12 = vld [vmem:[%s3368_s19 + $0x3c8] sm:$0xff]  ;;  %v5428_v33 = vld [vmem:[#allocation23_spill] sm:$0xff] }
 0x179   : > { %2919 = vmatprep.subr.bf16.mxu1 %v5420_v27  ;;  %2899 = vmatprep.subr.bf16.mxu0 %v5421_v21  ;;  %v1035_v6 = vadd.f32 %v1027_v50, %v1019_v63  ;;  %v2569_v14 = vadd.f32 -10.0, %v3546_v2  ;;  %v5422_v36 = vpack.c.bf16 %v4768_v37, %v4757_v61  ;;  %v1196_v0 = vpack.c.bf16 %v1192_v28, %v1188_v24  ;;  %v5425_v61 = vld [vmem:[#allocation43_spill] sm:$0xff]  ;;  %v5430_v21 = vld [vmem:[#allocation44_spill] sm:$0xff]  ;;  %v5431_v28 = vld [vmem:[#allocation50_spill] sm:$0xff] }
 0x17a   : > { %v1190_v54 = vmul.f32 0.000511682, %v1050_v41  ;;  %v1194_v15 = vmul.f32 0.000511682, %v1054_v31  ;;  %v2573_v48 = vadd.f32 -10.0, %v5386_v56  ;;  %v5423_v4 = vunpack.c.l.s8.bf16 %v4774_v43  ;;  %v4886_v50 = vld [vmem:[%s3368_s19 + $0x3b0] sm:$0xff] }
 0x17b   : > { %2211 = vmatmul.mubr.bf16.vlgmr.msra.gmra.mrb[24].mxu1 %v5422_v36  ;;  %v5424_v53 = vunpack.c.h.s8.bf16 %v4771_v10  ;;  %v1043_v63 = vmul.f32 0.16666667, %v4860_v8  ;;  %v1047_v20 = vadd.f32 %v1039_v3, %v1031_v44  ;;  %v617_v39 = vmax.f32 %v2569_v14, 0.0  ;;  %v5429_v10 = vld [vmem:[#allocation14_spill] sm:$0xff]  ;;  %2251 = vmatprep.mubr.bf16.mxu0 %v1196_v0  ;;  %v4909_v0 = vld [vmem:[%s3368_s19 + $0x390] sm:$0xff] }
 0x17c   : > { %2920 = vmatpush3.bf16.msra.mxu1 %v5423_v4  ;;  %v1017_v37 = vadd.f32 %v5425_v61, %v4471_v25  ;;  %v5426_v47 = vunpack.c.h.s8.bf16 %v4763_v58  ;;  %v5427_v22 = vunpack.c.l.s8.bf16 %v4785_v30  ;;  %v1198_v16 = vpack.c.bf16 %v1194_v15, %v1190_v54  ;;  %v5436_v61 = vld [vmem:[#allocation13_spill] sm:$0xff] }
 0x17d   : > { %2900 = vmatpush3.bf16.msra.mxu0 %v5424_v53  ;;  %v621_v23 = vmax.f32 %v2573_v48, 0.0  ;;  %v1021_v51 = vadd.f32 %v5429_v10, %v5428_v33  ;;  %v1025_v57 = vmul.f32 -0.6666667, %v4693_v18  ;;  %v1051_v25 = vadd.f32 %v1043_v63, %v1035_v6 }
 0x17e   : > { %2921 = vmatprep.subr.bf16.mxu1 %v5426_v47  ;;  %2901 = vmatprep.subr.bf16.mxu0 %v5427_v22  ;;  %v4888_v44 = vmul.f32 0.000511682, %v1047_v20  ;;  %v625_v58 = vmul.f32 %v617_v39, %v617_v39  ;;  %v1029_v27 = vmul.f32 -0.6666667, %v4707_v9  ;;  %v4893_v24 = vadd.f32 %v4536_v19, %v5430_v21  ;;  %v4906_v19 = vld [vmem:[%s3368_s19 + $0x3f0] sm:$0xff]  ;;  %v4932_v47 = vld [vmem:[%s3368_s19 + $0x3b8] sm:$0xff] }
 0x17f   : > { %v4897_v41 = vadd.f32 %v4552_v29, %v5431_v28  ;;  %v1597_v31 = vunpack.c.l.s8.bf16 %v4873_v12  ;;  %2292 = vmatprep.mubr.bf16.mxu1 %v1198_v16  ;;  %v629_v3 = vmul.f32 %v621_v23, %v621_v23  ;;  %v5432_v14 = vunpack.c.h.s8.bf16 %v4774_v43  ;;  %v4912_v29 = vld [vmem:[%s3368_s19 + $0x3d0] sm:$0xff]  ;;  %v4935_v22 = vld [vmem:[%s3368_s19 + $0x3f8] sm:$0xff] }
 0x180   : > { %v5433_v6 = vunpack.c.l.s8.bf16 %v4793_v52  ;;  %v1582_v36 = vunpack.c.h.s8.bf16 %v4793_v52  ;;  %v4914_v54 = vmul.f32 0.000511682, %v1051_v25  ;;  %v4916_v15 = vmul.f32 %v625_v58, %v617_v39 }
 0x181   : > { %2922 = vmatpush3.bf16.msra.mxu1 %v5432_v14  ;;  %v1033_v48 = vadd.f32 %v1025_v57, %v1017_v37  ;;  %v5434_v43 = vunpack.c.l.s8.bf16 %v4788_v7  ;;  %v5435_v4 = vunpack.c.h.s8.bf16 %v4785_v30  ;;  %v1606_v52 = vunpack.c.h.s8.bf16 %v4788_v7  ;;  %v4960_v14 = vld [vmem:[%s3368_s19 + $0x460] sm:$0xff] }
 0x182   : > { %2902 = vmatpush3.bf16.msra.mxu0 %v5433_v6  ;;  %v1591_v53 = vunpack.c.l.s8.bf16 %v4886_v50  ;;  %v4924_v63 = vmul.f32 %v629_v3, %v621_v23  ;;  %v1037_v20 = vadd.f32 %v1029_v27, %v1021_v51  ;;  %v4928_v39 = vadd.f32 %v4572_v32, %v5436_v61  ;;  %v4944_v32 = vld [vmem:[%s3368_s19 + $0x398] sm:$0xff]  ;;  %v4954_v27 = vld [vmem:[%s3368_s19 + $0x420] sm:$0xff] }
 0x183   : > { %2923 = vmatprep.subr.bf16.mxu1 %v5434_v43  ;;  %2903 = vmatprep.subr.bf16.mxu0 %v5435_v4  ;;  %v1598_v37 = vunpack.c.h.s8.bf16 %v4873_v12  ;;  %v1041_v7 = vmul.f32 0.16666667, %v4916_v15  ;;  %v1607_v16 = vunpack.c.l.s8.bf16 %v4906_v19  ;;  %v1583_v23 = vunpack.c.l.s8.bf16 %v4909_v0  ;;  %v4947_v12 = vld [vmem:[%s3368_s19 + $0x3d8] sm:$0xff]  ;;  %v4966_v6 = vld [vmem:[%s3368_s19 + $0x440] sm:$0xff] }
 0x184   : > { %v1599_v33 = vunpack.c.l.s8.bf16 %v4912_v29  ;;  %v1045_v10 = vmul.f32 0.16666667, %v4924_v63  ;;  %v1592_v51 = vunpack.c.h.s8.bf16 %v4886_v50  ;;  %v1608_v57 = vunpack.c.h.s8.bf16 %v4906_v19  ;;  %v4963_v50 = vld [vmem:[%s3368_s19 + $0x400] sm:$0xff] }
 0x185   : > { %2924 = vmatpush3.bf16.msra.mxu1 %v1597_v31  ;;  %v1584_v25 = vunpack.c.h.s8.bf16 %v4909_v0  ;;  %v1049_v58 = vadd.f32 %v1041_v7, %v1033_v48  ;;  %v1600_v21 = vunpack.c.h.s8.bf16 %v4912_v29  ;;  %v1593_v28 = vunpack.c.l.s8.bf16 %v4932_v47  ;;  %v5438_v7 = vld [vmem:[#allocation24_spill] sm:$0xff] }
 0x186   : > { %2904 = vmatpush3.bf16.msra.mxu0 %v1582_v36  ;;  %2925 = vmatprep.subr.bf16.mxu1 %v1606_v52  ;;  %v1609_v3 = vunpack.c.l.s8.bf16 %v4935_v22  ;;  %v1053_v31 = vadd.f32 %v1045_v10, %v1037_v20  ;;  %v1585_v36 = vunpack.c.l.s8.bf16 %v4944_v32  ;;  %v1601_v19 = vunpack.c.l.s8.bf16 %v4947_v12 }
 0x187   : > { %2905 = vmatprep.subr.bf16.mxu0 %v1591_v53  ;;  %v1594_v0 = vunpack.c.h.s8.bf16 %v4932_v47  ;;  %v4971_v48 = vmul.f32 0.000511682, %v1049_v58  ;;  %v1610_v29 = vunpack.c.h.s8.bf16 %v4935_v22  ;;  %v1586_v43 = vunpack.c.h.s8.bf16 %v4944_v32  ;;  %v4979_v53 = vld [vmem:[%s3368_s19 + $0x428] sm:$0xff] }
 0x188   : > { %v4976_v52 = vmul.f32 0.000511682, %v1053_v31  ;;  %v1619_v20 = vunpack.c.l.s8.bf16 %v4954_v27  ;;  %v2576_v61 = vadd.f32 -11.0, %v3492_v34  ;;  %v2580_v47 = vadd.f32 -11.0, %v3495_v45  ;;  %v5441_v32 = vld [vmem:[#allocation58_spill] sm:$0xff] }
 0x189   : > { %2926 = vmatpush3.bf16.msra.mxu1 %v1598_v37  ;;  %v1068_v10 = vadd.f32 %v5438_v7, %v4645_v26  ;;  %v1072_v58 = vmul.f32 -0.6666667, %v4824_v35  ;;  %v1076_v31 = vmul.f32 -0.6666667, %v4826_v42  ;;  %v2578_v4 = vadd.f32 -11.0, %v3497_v46 }
 0x18a   : > { %2906 = vmatpush3.bf16.msra.mxu0 %v1583_v23  ;;  %2927 = vmatprep.subr.bf16.mxu1 %v1607_v16  ;;  %v5437_v16 = vld [vmem:[#allocation57_spill] sm:$0xff]  ;;  %v648_v37 = vmax.f32 %v2576_v61, 0.0  ;;  %v652_v23 = vmax.f32 %v2580_v47, 0.0  ;;  %v2582_v34 = vadd.f32 -11.0, %v3499_v17  ;;  %v1074_v26 = vmul.f32 -0.6666667, %v4837_v60 }
 0x18b   : > { %2907 = vmatprep.subr.bf16.mxu0 %v1592_v51  ;;  %v1064_v51 = vadd.f32 %v5437_v16, %v4643_v59  ;;  %v1084_v30 = vadd.f32 %v1076_v31, %v1068_v10  ;;  %v1066_v59 = vadd.f32 %v4713_v1, %v4647_v38  ;;  %v650_v42 = vmax.f32 %v2578_v4, 0.0 }
 0x18c   : > { %v656_v35 = vmul.f32 %v648_v37, %v648_v37  ;;  %v660_v7 = vmul.f32 %v652_v23, %v652_v23  ;;  %v1078_v46 = vmul.f32 -0.6666667, %v4839_v40  ;;  %v2575_v17 = vadd.f32 -11.0, %v3507_v55 }
 0x18d   : > { %2928 = vmatpush3.bf16.msra.mxu1 %v1599_v33  ;;  %v1080_v45 = vadd.f32 %v1072_v58, %v1064_v51  ;;  %v654_v33 = vmax.f32 %v2582_v34, 0.0  ;;  %v1082_v47 = vadd.f32 %v1074_v26, %v1066_v59  ;;  %v658_v10 = vmul.f32 %v650_v42, %v650_v42  ;;  %v5440_v58 = vld [vmem:[#allocation18_spill] sm:$0xff] }
 0x18e   : > { %2908 = vmatpush3.bf16.msra.mxu0 %v1584_v25  ;;  %2929 = vmatprep.subr.bf16.mxu1 %v1608_v57  ;;  %v5439_v25 = vld [vmem:[#allocation15_spill] sm:$0xff]  ;;  %v664_v57 = vmul.f32 %v656_v35, %v648_v37  ;;  %v2579_v38 = vadd.f32 -11.0, %v5269_v11  ;;  %v647_v4 = vmax.f32 %v2575_v17, 0.0  ;;  %v1071_v11 = vmul.f32 -0.6666667, %v4853_v5  ;;  %v5025_v35 = vld [vmem:[%s3368_s19 + $0x408] sm:$0xff] }
 0x18f   : > { %2909 = vmatprep.subr.bf16.mxu0 %v1593_v28  ;;  %v1070_v61 = vadd.f32 %v5439_v25, %v4649_v62  ;;  %v668_v28 = vmul.f32 %v660_v7, %v652_v23  ;;  %v662_v1 = vmul.f32 %v654_v33, %v654_v33  ;;  %v1063_v62 = vadd.f32 %v5440_v58, %v4662_v49 }
 0x190   : > { %v1088_v40 = vmul.f32 0.16666667, %v664_v57  ;;  %v666_v51 = vmul.f32 %v658_v10, %v650_v42  ;;  %v651_v55 = vmax.f32 %v2579_v38, 0.0  ;;  %v655_v37 = vmul.f32 %v647_v4, %v647_v4 }
 0x191   : > { %2930 = vmatpush3.bf16.msra.mxu1 %v1600_v21  ;;  %v1086_v60 = vadd.f32 %v1078_v46, %v1070_v61  ;;  %v1092_v16 = vmul.f32 0.16666667, %v668_v28  ;;  %v1067_v23 = vadd.f32 %v4893_v24, %v4664_v13  ;;  %v5442_v22 = vpack.c.bf16 %v4914_v54, %v4888_v44  ;;  %v5445_v61 = vld [vmem:[#allocation59_spill] sm:$0xff] }
 0x192   : > { %2910 = vmatpush3.bf16.msra.mxu0 %v1585_v36  ;;  %2931 = vmatprep.subr.bf16.mxu1 %v1609_v3  ;;  %v2649_v31 = vpop.f32.mrb[4].mxu0  ;;  %v670_v36 = vmul.f32 %v662_v1, %v654_v33  ;;  %v1090_v59 = vmul.f32 0.16666667, %v666_v51  ;;  %v659_v5 = vmul.f32 %v651_v55, %v651_v55  ;;  %v663_v26 = vmul.f32 %v655_v37, %v647_v4  ;;  %v1352_v1 = vld [vmem:[%s3368_s19 + $0x468] sm:$0xff]  ;;  %v1345_v37 = vld [vmem:[%s3368_s19 + $0x430] sm:$0xff] }
 0x193   : > { %2911 = vmatprep.subr.bf16.mxu0 %v1594_v0  ;;  %v2650_v21 = vpop.f32.mrb[5].mxu0  ;;  %v1096_v0 = vadd.f32 %v1088_v40, %v1080_v45  ;;  %v1100_v34 = vadd.f32 %v1092_v16, %v1084_v30  ;;  %v1079_v33 = vadd.f32 %v1071_v11, %v1063_v62  ;;  %v5443_v25 = vunpack.c.h.s8.bf16 %v4947_v12 }
 0x194   : > { %v2651_v49 = vadd.f32 %v2650_v21, %v2649_v31  ;;  %v2652_v3 = vpop.f32.mrb[6].mxu0  ;;  %v1094_v24 = vmul.f32 0.16666667, %v670_v36  ;;  %v667_v42 = vmul.f32 %v659_v5, %v651_v55  ;;  %v1087_v28 = vmul.f32 0.16666667, %v663_v26  ;;  %v1353_v5 = vld [vmem:[%s3368_s19 + $0x470] sm:$0xff] }
 0x195   : > { %2932 = vmatpush3.bf16.msra.mxu1 %v1601_v19  ;;  %v2653_v13 = vpop.f32.mrb[7].mxu0  ;;  %v1075_v19 = vmul.f32 -0.6666667, %v4860_v8  ;;  %v1200_v30 = vmul.f32 0.00050249934, %v1096_v0  ;;  %v5444_v8 = vunpack.c.l.s8.bf16 %v4963_v50  ;;  %v5446_v44 = vunpack.c.l.s8.bf16 %v4960_v14 }
 0x196   : > { %2912 = vmatpush3.bf16.msra.mxu0 %v1586_v43  ;;  %2933 = vmatprep.subr.bf16.mxu1 %v1610_v29  ;;  %v5028_v43 = vadd.f32 %v2651_v49, %v5441_v32  ;;  %v2654_v45 = vadd.f32 %v2653_v13, %v2652_v3  ;;  %v1204_v7 = vmul.f32 0.00050249934, %v1100_v34  ;;  %v1098_v29 = vadd.f32 %v1090_v59, %v1082_v47 }
 0x197   : > { %2941 = vmatprep.subr.bf16.mxu0 %v1619_v20  ;;  %v1102_v20 = vadd.f32 %v1094_v24, %v1086_v60  ;;  %v1083_v57 = vadd.f32 %v1075_v19, %v1067_v23  ;;  %v5447_v54 = vunpack.c.h.s8.bf16 %v4954_v27  ;;  %v1613_v47 = vunpack.c.l.s8.bf16 %v5025_v35  ;;  %v1348_v27 = vld [vmem:[%s3368_s19 + $0x448] sm:$0xff]  ;;  %v1341_v24 = vld [vmem:[%s3368_s19 + $0x410] sm:$0xff] }
 0x198   : > { %v5038_v46 = vadd.f32 %v2654_v45, %v5445_v61  ;;  %v1208_v17 = vpack.c.bf16 %v1204_v7, %v1200_v30  ;;  %v1202_v12 = vmul.f32 0.00050249934, %v1098_v29  ;;  %v1091_v38 = vmul.f32 0.16666667, %v667_v42  ;;  %v1349_v29 = vld [vmem:[%s3368_s19 + $0x450] sm:$0xff] }
 0x199   : > { %2252 = vmatmul.mubr.bf16.vlgmr.msra.gmra.mrb[28].mxu0 %v5442_v22  ;;  %2934 = vmatpush3.bf16.msra.mxu1 %v5443_v25  ;;  %v1206_v10 = vmul.f32 0.00050249934, %v1102_v20  ;;  %v1095_v60 = vadd.f32 %v1087_v28, %v1079_v33  ;;  %v2577_v4 = vadd.f32 -11.0, %v3546_v2  ;;  %v2581_v58 = vadd.f32 -11.0, %v5386_v56 }
 0x19a   : > { %2942 = vmatpush3.bf16.msra.mxu0 %v5444_v8  ;;  %2963 = vmatprep.subr.bf16.mxu1 %v5446_v44  ;;  %v1065_v62 = vadd.f32 %v4897_v41, %v4693_v18  ;;  %v5448_v31 = vpack.c.bf16 %v4976_v52, %v4971_v48  ;;  %v1099_v16 = vadd.f32 %v1091_v38, %v1083_v57  ;;  %v1073_v55 = vmul.f32 -0.6666667, %v4916_v15  ;;  %v1346_v8 = vld [vmem:[%s3368_s19 + $0x438] sm:$0xff] }
 0x19b   : > { %2943 = vmatprep.subr.bf16.mxu0 %v5447_v54  ;;  %2333 = vmatprep.mubr.bf16.mxu0 %v1208_v17  ;;  %v1210_v40 = vpack.c.bf16 %v1206_v10, %v1202_v12  ;;  %v1069_v51 = vadd.f32 %v4928_v39, %v4707_v9  ;;  %v5449_v2 = vunpack.c.l.s8.bf16 %v4966_v6  ;;  %v5450_v56 = vunpack.c.h.s8.bf16 %v4963_v50 }
 0x19c   : > { %2293 = vmatmul.mubr.bf16.vlgmr.msra.gmra.mrb[28].mxu1 %v5448_v31  ;;  %v5061_v18 = vmul.f32 0.00050249934, %v1095_v60  ;;  %v649_v41 = vmax.f32 %v2577_v4, 0.0  ;;  %v653_v48 = vmax.f32 %v2581_v58, 0.0  ;;  %v1077_v52 = vmul.f32 -0.6666667, %v4924_v63 }
 0x19d   : > { %2964 = vmatpush3.bf16.msra.mxu1 %v5449_v2  ;;  %v5451_v21 = vunpack.c.h.s8.bf16 %v4960_v14  ;;  %v5452_v36 = vunpack.c.l.s8.bf16 %v4979_v53  ;;  %v1637_v9 = vunpack.c.l.s8.bf16 %v1352_v1  ;;  %v1622_v15 = vunpack.c.h.s8.bf16 %v4979_v53  ;;  %2374 = vmatprep.mubr.bf16.mxu1 %v1210_v40  ;;  %v1354_v60 = vld [vmem:[%s3368_s19 + $0x478] sm:$0xff] }
 0x19e   : > { %2944 = vmatpush3.bf16.msra.mxu0 %v5450_v56  ;;  %v5069_v39 = vmul.f32 0.00050249934, %v1099_v16  ;;  %v657_v50 = vmul.f32 %v649_v41, %v649_v41  ;;  %v661_v23 = vmul.f32 %v653_v48, %v653_v48  ;;  %v1629_v11 = vunpack.c.l.s8.bf16 %v1348_v27 }
 0x19f   : > { %2965 = vmatprep.subr.bf16.mxu1 %v5451_v21  ;;  %2945 = vmatprep.subr.bf16.mxu0 %v5452_v36  ;;  %v1081_v14 = vadd.f32 %v1073_v55, %v1065_v62  ;;  %v5453_v49 = vunpack.c.h.s8.bf16 %v4966_v6  ;;  %v1614_v3 = vunpack.c.h.s8.bf16 %v5025_v35  ;;  %v1085_v34 = vadd.f32 %v1077_v52, %v1069_v51  ;;  %v1350_v62 = vld [vmem:[%s3368_s19 + $0x458] sm:$0xff] }
 0x1a0   : > { %v1207_v63 = vpack.c.bf16 %v5069_v39, %v5061_v18  ;;  %v665_v53 = vmul.f32 %v657_v50, %v649_v41  ;;  %v669_v0 = vmul.f32 %v661_v23, %v653_v48  ;;  %v1638_v59 = vunpack.c.h.s8.bf16 %v1352_v1  ;;  %v1342_v1 = vld [vmem:[%s3368_s19 + $0x418] sm:$0xff] }
 0x1a1   : > { %2966 = vmatpush3.bf16.msra.mxu1 %v5453_v49  ;;  %v1623_v13 = vunpack.c.l.s8.bf16 %v1345_v37  ;;  %v1630_v6 = vunpack.c.h.s8.bf16 %v1348_v27  ;;  %v1615_v45 = vunpack.c.l.s8.bf16 %v1341_v24  ;;  %v1639_v22 = vunpack.c.l.s8.bf16 %v1353_v5 }
 0x1a2   : > { %2946 = vmatpush3.bf16.msra.mxu0 %v1613_v47  ;;  %2967 = vmatprep.subr.bf16.mxu1 %v1637_v9  ;;  %v1089_v26 = vmul.f32 0.16666667, %v665_v53  ;;  %v1093_v19 = vmul.f32 0.16666667, %v669_v0  ;;  %v1624_v42 = vunpack.c.h.s8.bf16 %v1345_v37  ;;  %v1631_v44 = vunpack.c.l.s8.bf16 %v1349_v29 }
 0x1a3   : > { %2947 = vmatprep.subr.bf16.mxu0 %v1622_v15  ;;  %v1616_v54 = vunpack.c.h.s8.bf16 %v1341_v24  ;;  %v1640_v12 = vunpack.c.h.s8.bf16 %v1353_v5  ;;  %v1625_v38 = vunpack.c.l.s8.bf16 %v1346_v8  ;;  %v1632_v4 = vunpack.c.h.s8.bf16 %v1349_v29 }
 0x1a4   : > { %v2671_v32 = vpop.f32.mrb[4].mxu1  ;;  %v1097_v35 = vadd.f32 %v1089_v26, %v1081_v14  ;;  %v1101_v7 = vadd.f32 %v1093_v19, %v1085_v34  ;;  %v1617_v58 = vunpack.c.l.s8.bf16 %v1342_v1  ;;  %v1626_v31 = vunpack.c.h.s8.bf16 %v1346_v8 }
 0x1a5   : > { %2968 = vmatpush3.bf16.msra.mxu1 %v1629_v11  ;;  %v2672_v30 = vpop.f32.mrb[5].mxu1  ;;  %v1633_v27 = vunpack.c.l.s8.bf16 %v1350_v62  ;;  %v1618_v40 = vunpack.c.h.s8.bf16 %v1342_v1  ;;  %v1642_v16 = vunpack.c.h.s8.bf16 %v1354_v60 }
 0x1a6   : > { %2948 = vmatpush3.bf16.msra.mxu0 %v1614_v3  ;;  %2969 = vmatprep.subr.bf16.mxu1 %v1638_v59  ;;  %v2673_v20 = vadd.f32 %v2672_v30, %v2671_v32  ;;  %v2674_v33 = vpop.f32.mrb[6].mxu1  ;;  %v1201_v61 = vmul.f32 0.00050249934, %v1097_v35  ;;  %v1205_v17 = vmul.f32 0.00050249934, %v1101_v7 }
 0x1a7   : > { %2949 = vmatprep.subr.bf16.mxu0 %v1623_v13  ;;  %v2675_v25 = vpop.f32.mrb[7].mxu1 }
 0x1a8   : > { %v1803_v57 = vadd.f32 %v2673_v20, %v5028_v43  ;;  %v2676_v28 = vadd.f32 %v2675_v25, %v2674_v33  ;;  %v1209_v47 = vpack.c.bf16 %v1205_v17, %v1201_v61  ;;  %v1641_v43 = vunpack.c.l.s8.bf16 %v1354_v60 }
 0x1a9   : > { %2970 = vmatpush3.bf16.msra.mxu1 %v1630_v6 }
 0x1aa   : > { %2950 = vmatpush3.bf16.msra.mxu0 %v1615_v45  ;;  %2971 = vmatprep.subr.bf16.mxu1 %v1639_v22  ;;  %v1806_v10 = vadd.f32 %v2676_v28, %v5038_v46  ;;  %v1634_v46 = vunpack.c.h.s8.bf16 %v1350_v62 }
 0x1ab   : > { %2951 = vmatprep.subr.bf16.mxu0 %v1624_v42 }
 0x1ad   : > { %2972 = vmatpush3.bf16.msra.mxu1 %v1631_v44 }
 0x1ae   : > { %2952 = vmatpush3.bf16.msra.mxu0 %v1616_v54  ;;  %2973 = vmatprep.subr.bf16.mxu1 %v1640_v12 }
 0x1af   : > { %2953 = vmatprep.subr.bf16.mxu0 %v1625_v38 }
 0x1b1   : > { %2974 = vmatpush3.bf16.msra.mxu1 %v1632_v4 }
 0x1b2   : > { %2954 = vmatpush3.bf16.msra.mxu0 %v1617_v58  ;;  %2975 = vmatprep.subr.bf16.mxu1 %v1641_v43 }
 0x1b3   : > { %2955 = vmatprep.subr.bf16.mxu0 %v1626_v31 }
 0x1b5   : > { %2976 = vmatpush3.bf16.msra.mxu1 %v1633_v27 }
 0x1b6   : > { %2956 = vmatpush3.bf16.msra.mxu0 %v1618_v40  ;;  %2977 = vmatprep.subr.bf16.mxu1 %v1642_v16 }
 0x1b9   : > { %2334 = vmatmul.mubr.bf16.vlgmr.msra.gmra.mrb[32].mxu0 %v1207_v63  ;;  %2978 = vmatpush3.bf16.msra.mxu1 %v1634_v46 }
 0x1bc   : > { %2375 = vmatmul.mubr.bf16.vlgmr.msra.gmra.mrb[32].mxu1 %v1209_v47 }
 0x1c1   : > { %v2693_v51 = vpop.f32.mrb[8].mxu0 }
 0x1c2   : > { %v2694_v55 = vpop.f32.mrb[9].mxu0 }
 0x1c3   : > { %v2695_v2 = vadd.f32 %v2694_v55, %v2693_v51  ;;  %v2696_v56 = vpop.f32.mrb[10].mxu0 }
 0x1c4   : > { %v2697_v41 = vpop.f32.mrb[11].mxu0 }
 0x1c5   : > { %v1844_v48 = vadd.f32 %v2695_v2, %v1803_v57  ;;  %v2698_v52 = vadd.f32 %v2697_v41, %v2696_v56 }
 0x1c7   : > { %v1847_v21 = vadd.f32 %v2698_v52, %v1806_v10 }
 0x1c8   : > { %v2715_v36 = vpop.f32.mrb[8].mxu1 }
 0x1c9   : > { %v2716_v9 = vpop.f32.mrb[9].mxu1 }
 0x1ca   : > { %v2717_v15 = vadd.f32 %v2716_v9, %v2715_v36  ;;  %v2718_v37 = vpop.f32.mrb[10].mxu1 }
 0x1cb   : > { %v2719_v50 = vpop.f32.mrb[11].mxu1 }
 0x1cc   : > { %v1885_v23 = vadd.f32 %v2717_v15, %v1844_v48  ;;  %v2720_v11 = vadd.f32 %v2719_v50, %v2718_v37 }
 0x1ce   : > { %v1888_v14 = vadd.f32 %v2720_v11, %v1847_v21 }
 0x1e4   : > { %v2737_v18 = vpop.f32.mrb[12].mxu0 }
 0x1e5   : > { %v2738_v39 = vpop.f32.mrb[13].mxu0 }
 0x1e6   : > { %v2739_v63 = vadd.f32 %v2738_v39, %v2737_v18  ;;  %v2740_v49 = vpop.f32.mrb[14].mxu0 }
 0x1e7   : > { %v2741_v3 = vpop.f32.mrb[15].mxu0 }
 0x1e8   : > { %v1926_v53 = vadd.f32 %v2739_v63, %v1885_v23  ;;  %v2742_v0 = vadd.f32 %v2741_v3, %v2740_v49 }
 0x1ea   : > { %v1929_v59 = vadd.f32 %v2742_v0, %v1888_v14 }
 0x1eb   : > { %v2759_v34 = vpop.f32.mrb[12].mxu1 }
 0x1ec   : > { %v2760_v13 = vpop.f32.mrb[13].mxu1 }
 0x1ed   : > { %v2761_v24 = vadd.f32 %v2760_v13, %v2759_v34  ;;  %v2762_v5 = vpop.f32.mrb[14].mxu1 }
 0x1ee   : > { %v2763_v26 = vpop.f32.mrb[15].mxu1 }
 0x1ef   : > { %v1967_v19 = vadd.f32 %v2761_v24, %v1926_v53  ;;  %v2764_v32 = vadd.f32 %v2763_v26, %v2762_v5 }
 0x1f1   : > { %v1970_v6 = vadd.f32 %v2764_v32, %v1929_v59 }
 0x208   : > { %v2781_v45 = vpop.f32.mrb[16].mxu0 }
 0x209   : > { %v2782_v30 = vpop.f32.mrb[17].mxu0 }
 0x20a   : > { %v2783_v35 = vadd.f32 %v2782_v30, %v2781_v45  ;;  %v2784_v7 = vpop.f32.mrb[18].mxu0 }
 0x20b   : > { %v2785_v22 = vpop.f32.mrb[19].mxu0 }
 0x20c   : > { %v2008_v20 = vadd.f32 %v2783_v35, %v1967_v19  ;;  %v2786_v42 = vadd.f32 %v2785_v22, %v2784_v7 }
 0x20d   : > { %v2803_v29 = vpop.f32.mrb[16].mxu1 }
 0x20e   : > { %v2804_v33 = vpop.f32.mrb[17].mxu1  ;;  %v2011_v61 = vadd.f32 %v2786_v42, %v1970_v6 }
 0x20f   : > { %v2805_v25 = vadd.f32 %v2804_v33, %v2803_v29  ;;  %v2806_v8 = vpop.f32.mrb[18].mxu1 }
 0x210   : > { %v2807_v17 = vpop.f32.mrb[19].mxu1 }
 0x211   : > { %v2049_v57 = vadd.f32 %v2805_v25, %v2008_v20  ;;  %v2808_v28 = vadd.f32 %v2807_v17, %v2806_v8  ;;  %v1643_v17 = vld [vmem:[#allocation7] sm:$0xff] }
 0x213   : > { %v2052_v44 = vadd.f32 %v2808_v28, %v2011_v61 }
 0x228   : > { %v2825_v54 = vpop.f32.mrb[20].mxu0 }
 0x229   : > { %v2826_v47 = vpop.f32.mrb[21].mxu0 }
 0x22a   : > { %v2827_v12 = vadd.f32 %v2826_v47, %v2825_v54  ;;  %v2828_v10 = vpop.f32.mrb[22].mxu0  ;;  %v1644_v54 = vld [vmem:[#allocation7 + $0x8] sm:$0xff] }
 0x22b   : > { %v2829_v38 = vpop.f32.mrb[23].mxu0 }
 0x22c   : > { %v2090_v60 = vadd.f32 %v2827_v12, %v2049_v57  ;;  %v2830_v4 = vadd.f32 %v2829_v38, %v2828_v10 }
 0x22d   : > { %v2847_v1 = vpop.f32.mrb[20].mxu1 }
 0x22e   : > { %v2848_v58 = vpop.f32.mrb[21].mxu1  ;;  %v2093_v31 = vadd.f32 %v2830_v4, %v2052_v44 }
 0x22f   : > { %v2849_v43 = vadd.f32 %v2848_v58, %v2847_v1  ;;  %v2850_v62 = vpop.f32.mrb[22].mxu1 }
 0x230   : > { %v2851_v27 = vpop.f32.mrb[23].mxu1 }
 0x231   : > { %v2131_v40 = vadd.f32 %v2849_v43, %v2090_v60  ;;  %v2852_v16 = vadd.f32 %v2851_v27, %v2850_v62 }
 0x233   : > { %v2134_v46 = vadd.f32 %v2852_v16, %v2093_v31 }
 0x24a   : > { %v2869_v51 = vpop.f32.mrb[24].mxu0 }
 0x24b   : > { %v2870_v55 = vpop.f32.mrb[25].mxu0 }
 0x24c   : > { %v2871_v2 = vadd.f32 %v2870_v55, %v2869_v51  ;;  %v2872_v56 = vpop.f32.mrb[26].mxu0 }
 0x24d   : > { %v2873_v41 = vpop.f32.mrb[27].mxu0 }
 0x24e   : > { %v2891_v48 = vpop.f32.mrb[24].mxu1  ;;  %v2172_v52 = vadd.f32 %v2871_v2, %v2131_v40  ;;  %v2874_v21 = vadd.f32 %v2873_v41, %v2872_v56 }
 0x24f   : > { %v2892_v36 = vpop.f32.mrb[25].mxu1 }
 0x250   : > { %v2893_v9 = vadd.f32 %v2892_v36, %v2891_v48  ;;  %v2894_v15 = vpop.f32.mrb[26].mxu1  ;;  %v2175_v37 = vadd.f32 %v2874_v21, %v2134_v46 }
 0x251   : > { %v2895_v50 = vpop.f32.mrb[27].mxu1 }
 0x252   : > { %v2213_v23 = vadd.f32 %v2893_v9, %v2172_v52  ;;  %v2896_v11 = vadd.f32 %v2895_v50, %v2894_v15 }
 0x254   : > { %v2216_v14 = vadd.f32 %v2896_v11, %v2175_v37 }
 0x26c   : > { %v2913_v18 = vpop.f32.mrb[28].mxu0 }
 0x26d   : > { %v2914_v39 = vpop.f32.mrb[29].mxu0 }
 0x26e   : > { %v2915_v63 = vadd.f32 %v2914_v39, %v2913_v18  ;;  %v2916_v49 = vpop.f32.mrb[30].mxu0 }
 0x26f   : > { %v2917_v3 = vpop.f32.mrb[31].mxu0  ;;  %v2935_v53 = vpop.f32.mrb[28].mxu1 }
 0x270   : > { %v2254_v0 = vadd.f32 %v2915_v63, %v2213_v23  ;;  %v2918_v34 = vadd.f32 %v2917_v3, %v2916_v49  ;;  %v2936_v59 = vpop.f32.mrb[29].mxu1 }
 0x271   : > { %v2937_v13 = vadd.f32 %v2936_v59, %v2935_v53  ;;  %v2938_v24 = vpop.f32.mrb[30].mxu1 }
 0x272   : > { %v2257_v5 = vadd.f32 %v2918_v34, %v2216_v14  ;;  %v2939_v26 = vpop.f32.mrb[31].mxu1 }
 0x273   : > { %v2295_v19 = vadd.f32 %v2937_v13, %v2254_v0  ;;  %v2940_v32 = vadd.f32 %v2939_v26, %v2938_v24 }
 0x275   : > { %v2298_v6 = vadd.f32 %v2940_v32, %v2257_v5 }
 0x28c   : > { %v2957_v45 = vpop.f32.mrb[32].mxu0 }
 0x28d   : > { %v2958_v30 = vpop.f32.mrb[33].mxu0 }
 0x28e   : > { %v2959_v35 = vadd.f32 %v2958_v30, %v2957_v45  ;;  %v2960_v7 = vpop.f32.mrb[34].mxu0 }
 0x28f   : > { %v2961_v22 = vpop.f32.mrb[35].mxu0  ;;  %v2979_v29 = vpop.f32.mrb[32].mxu1 }
 0x290   : > { %v2336_v20 = vadd.f32 %v2959_v35, %v2295_v19  ;;  %v2962_v42 = vadd.f32 %v2961_v22, %v2960_v7  ;;  %v2980_v33 = vpop.f32.mrb[33].mxu1 }
 0x291   : > { %v2981_v25 = vadd.f32 %v2980_v33, %v2979_v29  ;;  %v2982_v8 = vpop.f32.mrb[34].mxu1 }
 0x292   : > { %v2339_v61 = vadd.f32 %v2962_v42, %v2298_v6  ;;  %v2983_v57 = vpop.f32.mrb[35].mxu1 }
 0x293   : > { %v2377_v28 = vadd.f32 %v2981_v25, %v2336_v20  ;;  %v2984_v44 = vadd.f32 %v2983_v57, %v2982_v8 }
 0x295   : > { %v2383_v47 = vadd.f32 %v2377_v28, %v1643_v17  ;;  %v2380_v12 = vadd.f32 %v2984_v44, %v2339_v61 }
 0x297   : > { %2385 = vst [vmem:[#allocation7] sm:$0xff] %v2383_v47  ;;  %v2384_v10 = vadd.f32 %v2380_v12, %v1644_v54 }
 0x299   : > { %2386 = vst [vmem:[#allocation7 + $0x8] sm:$0xff] %v2384_v10 }
 0x29a   : > { %3151 = shalt.err (!%p3148_p4)
}
 0x29b   : > { %s3152_s12 = scalar_lea.hbm %s5127_s2, 256 }
 0x29c   : > { %p3153_p5 = scmp.ne.s32.totalorder %s5127_s2, %s3152_s12  ;;  %p3158_p13 = scmp.lt.u32.totalorder %s3152_s12, %s5127_s2 }
 0x29e   : > { %p3154_p9 = pnand %p3153_p5, %p3003_p10 }
 0x2a0   : > { %p3155_p11 = pneg %p3154_p9 }
 0x2a2   : > { %p3160_p7 = pnand %p3158_p13, %p3155_p11 }
 0x2a4   : > { %3163 = shalt.err (!%p3160_p7)
}
 0x2a5   : > { %s3217_s9 = smov 128   ;;  %s3218_s15 = smov 8  }
 0x2a6   : > { %2992 = dma.vmem_to_hbm [thread:$0]  (%p3003_p10), %s2394_s23, 256, %s5127_s2, [#allocation4], %s3217_s9, %s3217_s9, %s3218_s15  }
 0x2a7   : > { %3189 = dma.done.wait (%p3003_p10), [#allocation4], 256  }
 0x2a8   : > { %3191 = vsyncadd (%p3003_p10), [#allocation4], 4294967040 }
 0x2a9 PF: > { %p16_p8 = scmp.ge.s32.totalorder %s3256_s14, 6   ;;  %s5454_s9 = smov %s3198_s10 }
 0x2aa   : > { %s5455_s10 = smov %s3202_s11  ;;  %s5456_s11 = smov %s3266_s17 }
 0x2ab   : > { %s5457_s12 = smov %s3256_s14  ;;  %18 = sbr.rel (!%p16_p8) target bundleno = 6 (0x6), region = 82 }
 0x2b2   :  { %2409 = vsyncpa [#allocation3], 1 }
 0x2b3   :  { %2411 = vsyncpa [#allocation3 + $0x1], 1 }
 0x2b4   :  { %2412 = vsyncpa [#allocation6], 1 }
 0x2b5   :  { %2414 = vsyncpa [#allocation6 + $0x1], 1 }
 0x2b6   :  { %2415 = vsyncpa [#allocation4], 1 }
 0x2b7   :  { %2417 = vsyncpa [#allocation4 + $0x1], 1 }

</bundles_post_ra>
